<compile_context>
chip_gen: v7x
topology: tpu7x:2x2x1
jax: 0.10.0
libtpu: 0.0.40
codegen_flags: <defaults>
</compile_context>

<pallas_src>
import functools
import math

import jax
import jax.numpy as jnp
from jax.experimental import pallas as pl
from jax.experimental.pallas import tpu as pltpu


# ----------------------------------------------------------------------------
# Fused LeFF kernel
# ----------------------------------------------------------------------------
def _gelu(x):
    # exact (erf-based) GELU, matching torch.nn.GELU() default
    return 0.5 * x * (1.0 + jax.lax.erf(x * (1.0 / math.sqrt(2.0))))


def _leff_kernel(x_ref, wup_ref, bup_ref, dw_ref, t2_ref, ml_ref, mr_ref,
                 wdn_ref, bdn_ref, o_ref, pad_ref, *, h_img, w_img, pad_rows):
    n_tok = h_img * w_img
    c_dim = wup_ref.shape[1]

    x = x_ref[0].astype(jnp.float32)                                   # (N, dim)

    # ---- up_proj: Linear (BN1 scale/shift folded into W/b) + GELU ----------
    h = jnp.dot(x, wup_ref[...], preferred_element_type=jnp.float32) + bup_ref[...]
    h = _gelu(h)                                                       # (N, C)

    # ---- depthwise 3x3 conv (padding=1, groups=C, no bias) -----------------
    # Stage h into a zero-padded slab: rows [0, pad_rows) and
    # [pad_rows+N, pad_rows+N+pad_rows) are zero, so vertical out-of-bounds
    # taps read zeros.  Horizontal wrap-around is removed by the column masks.
    zeros_pad = jnp.zeros((pad_rows, c_dim), jnp.float32)
    pad_ref[pl.ds(0, pad_rows), :] = zeros_pad
    pad_ref[pl.ds(pad_rows + n_tok, pad_rows), :] = zeros_pad
    pad_ref[pl.ds(pad_rows, n_tok), :] = h

    # Hoisted lane-broadcasts of the (N,1) column-boundary masks.
    ml = jnp.broadcast_to(ml_ref[...], (n_tok, c_dim))                 # j-1 >= 0 valid
    mr = jnp.broadcast_to(mr_ref[...], (n_tok, c_dim))                 # j+1 <= W-1 valid
    dw = dw_ref[...]                                                   # (9, C), BN2 scale folded in

    acc = jnp.zeros((n_tok, c_dim), jnp.float32)
    for a in range(3):
        da = a - 1
        for b in range(3):
            db = b - 1
            off = da * w_img + db                                      # static flat offset
            tap = a * 3 + b
            shifted = pad_ref[pl.ds(pad_rows + off, n_tok), :]         # (N, C) static slice
            if db == -1:
                shifted = shifted * ml
            elif db == 1:
                shifted = shifted * mr
            acc = acc + shifted * dw[tap:tap + 1, :]                   # per-channel tap FMA

    # BN2 shift (scale already folded into dw) + GELU
    g = _gelu(acc + t2_ref[...])                                       # (N, C)

    # ---- down_proj: Linear (BN3 folded) + GELU ------------------------------
    y = jnp.dot(g, wdn_ref[...], preferred_element_type=jnp.float32) + bdn_ref[...]
    y = _gelu(y)
    o_ref[0] = y.astype(o_ref.dtype)


# ----------------------------------------------------------------------------
# Wrapper
# ----------------------------------------------------------------------------
def leff_forward(params, x, h_img=14, w_img=14):
    B, N, dim = x.shape
    C = params["w_up"].shape[1]
    eps = 1e-5

    def bn_affine(g, b, m, v):
        s = g * jax.lax.rsqrt(v + eps)
        t = b - m * s
        return s, t

    s1, t1 = bn_affine(params["bn1_g"], params["bn1_b"], params["bn1_m"], params["bn1_v"])
    s2, t2 = bn_affine(params["bn2_g"], params["bn2_b"], params["bn2_m"], params["bn2_v"])
    s3, t3 = bn_affine(params["bn3_g"], params["bn3_b"], params["bn3_m"], params["bn3_v"])

    # Fold BN affines into the adjacent linear / conv weights (trace-time, free).
    w_up = params["w_up"] * s1[None, :]
    b_up = (params["b_up"] * s1 + t1).reshape(1, C)
    dw = params["dw"] * s2[None, :]                   # conv is linear & bias-free
    t2r = t2.reshape(1, C)
    w_dn = params["w_dn"] * s3[None, :]
    b_dn = (params["b_dn"] * s3 + t3).reshape(1, dim)

    # Column-boundary masks for horizontal taps (depend only on h_img/w_img).
    col = jnp.arange(N, dtype=jnp.int32) % w_img
    mask_l = (col >= 1).astype(jnp.float32).reshape(N, 1)              # db = -1 valid
    mask_r = (col <= w_img - 2).astype(jnp.float32).reshape(N, 1)      # db = +1 valid

    pad_rows = w_img + 2                               # covers |offset| <= w_img + 1

    def rep(shape):                                    # same block at every grid point
        return pl.BlockSpec(shape, lambda b: (0,) * len(shape))

    kernel = functools.partial(_leff_kernel, h_img=h_img, w_img=w_img, pad_rows=pad_rows)
    return pl.pallas_call(
        kernel,
        out_shape=jax.ShapeDtypeStruct((B, N, dim), x.dtype),
        grid=(B,),
        in_specs=[
            pl.BlockSpec((1, N, dim), lambda b: (b, 0, 0)),            # x: one image per step
            rep((dim, C)), rep((1, C)),                                # up proj (BN1 folded)
            rep((9, C)), rep((1, C)),                                  # depthwise taps + BN2 shift
            rep((N, 1)), rep((N, 1)),                                  # column boundary masks
            rep((C, dim)), rep((1, dim)),                              # down proj (BN3 folded)
        ],
        out_specs=pl.BlockSpec((1, N, dim), lambda b: (b, 0, 0)),
        scratch_shapes=[pltpu.VMEM((N + 2 * pad_rows, C), jnp.float32)],
        compiler_params=pltpu.CompilerParams(dimension_semantics=("parallel",)),
    )(x, w_up, b_up, dw, t2r, mask_l, mask_r, w_dn, b_dn)


# ----------------------------------------------------------------------------
# Pure-JAX reference (independent implementation, uses lax depthwise conv)
# ----------------------------------------------------------------------------
def leff_reference(params, x, h_img=14, w_img=14):
    eps = 1e-5
    B, N, dim = x.shape
    C = params["w_up"].shape[1]
    hp = jax.lax.Precision.HIGHEST

    def bn(v, g, b, m, var):
        return (v - m) * jax.lax.rsqrt(var + eps) * g + b

    h = jnp.dot(x, params["w_up"], precision=hp) + params["b_up"]
    h = _gelu(bn(h, params["bn1_g"], params["bn1_b"], params["bn1_m"], params["bn1_v"]))
    img = h.reshape(B, h_img, w_img, C)
    wconv = params["dw"].reshape(3, 3, C)[:, :, None, :]      # HWIO, I=1 (grouped)
    g = jax.lax.conv_general_dilated(
        img, wconv, window_strides=(1, 1), padding="SAME",
        dimension_numbers=("NHWC", "HWIO", "NHWC"),
        feature_group_count=C, precision=hp)
    g = _gelu(bn(g, params["bn2_g"], params["bn2_b"], params["bn2_m"], params["bn2_v"]))
    g = g.reshape(B, N, C)
    y = jnp.dot(g, params["w_dn"], precision=hp) + params["b_dn"]
    y = _gelu(bn(y, params["bn3_g"], params["bn3_b"], params["bn3_m"], params["bn3_v"]))
    return y


# ----------------------------------------------------------------------------
# Main
# ----------------------------------------------------------------------------
if __name__ == "__main__":
    # Small config consistent with the module: h=w=14 is hard-coded by LeFF's
    # Rearrange, so N = 196.  dim=32, scale=4 -> scale_dim = 128 (lane-dense).
    dim = 32
    scale = 4
    C = dim * scale
    H_IMG = W_IMG = 14
    N = H_IMG * W_IMG
    B = 2

    key = jax.random.PRNGKey(0)
    ks = jax.random.split(key, 20)
    x = jax.random.normal(ks[0], (B, N, dim), dtype=jnp.float32)

    params = dict(
        # up_proj Linear
        w_up=(jax.random.normal(ks[1], (dim, C)) / math.sqrt(dim)).astype(jnp.float32),
        b_up=(0.02 * jax.random.normal(ks[2], (C,))).astype(jnp.float32),
        # BatchNorm1d(scale_dim) — eval-mode stats
        bn1_g=(1.0 + 0.1 * jax.random.normal(ks[3], (C,))).astype(jnp.float32),
        bn1_b=(0.1 * jax.random.normal(ks[4], (C,))).astype(jnp.float32),
        bn1_m=(0.1 * jax.random.normal(ks[5], (C,))).astype(jnp.float32),
        bn1_v=jax.random.uniform(ks[6], (C,), minval=0.5, maxval=1.5).astype(jnp.float32),
        # depthwise Conv2d weights, stored as (9 taps, C) with tap = 3*a + b
        dw=(math.sqrt(2.0 / 9.0) * jax.random.normal(ks[7], (9, C))).astype(jnp.float32),
        # BatchNorm2d(scale_dim)
        bn2_g=(1.0 + 0.1 * jax.random.normal(ks[8], (C,))).astype(jnp.float32),
        bn2_b=(0.1 * jax.random.normal(ks[9], (C,))).astype(jnp.float32),
        bn2_m=(0.1 * jax.random.normal(ks[10], (C,))).astype(jnp.float32),
        bn2_v=jax.random.uniform(ks[11], (C,), minval=0.5, maxval=1.5).astype(jnp.float32),
        # down_proj Linear
        w_dn=(jax.random.normal(ks[12], (C, dim)) / math.sqrt(C)).astype(jnp.float32),
        b_dn=(0.02 * jax.random.normal(ks[13], (dim,))).astype(jnp.float32),
        # BatchNorm1d(dim)
        bn3_g=(1.0 + 0.1 * jax.random.normal(ks[14], (dim,))).astype(jnp.float32),
        bn3_b=(0.1 * jax.random.normal(ks[15], (dim,))).astype(jnp.float32),
        bn3_m=(0.1 * jax.random.normal(ks[16], (dim,))).astype(jnp.float32),
        bn3_v=jax.random.uniform(ks[17], (dim,), minval=0.5, maxval=1.5).astype(jnp.float32),
    )

    fwd = jax.jit(functools.partial(leff_forward, h_img=H_IMG, w_img=W_IMG))
    out = fwd(params, x)
    jax.block_until_ready(out)

    ref = leff_reference(params, x, H_IMG, W_IMG)
    assert out.shape == (B, N, dim)
    assert bool(jnp.all(jnp.isfinite(out)))
    max_err = float(jnp.max(jnp.abs(out - ref)))
    assert max_err < 2e-3, f"mismatch vs reference: max abs err = {max_err}"
    print("KERNEL_OK")
</pallas_src>

<mosaic_0001>
module attributes {stable_mosaic.version = 11 : i64} {
  func.func @_leff_kernel(%arg0: i32, %arg1: memref<1x196x32xf32, #tpu.memory_space<vmem>>, %arg2: memref<32x128xf32, #tpu.memory_space<vmem>>, %arg3: memref<1x128xf32, #tpu.memory_space<vmem>>, %arg4: memref<9x128xf32, #tpu.memory_space<vmem>>, %arg5: memref<1x128xf32, #tpu.memory_space<vmem>>, %arg6: memref<196x1xf32, #tpu.memory_space<vmem>>, %arg7: memref<196x1xf32, #tpu.memory_space<vmem>>, %arg8: memref<128x32xf32, #tpu.memory_space<vmem>>, %arg9: memref<1x32xf32, #tpu.memory_space<vmem>>, %arg10: memref<1x196x32xf32, #tpu.memory_space<vmem>>, %arg11: memref<228x128xf32, #tpu.memory_space<vmem>>) attributes {dimension_semantics = [#tpu.dimension_semantics<parallel>], iteration_bounds = array<i64: 2>, scalar_prefetch = 0 : i64, scratch_operands = 1 : i64, tpu.core_type = #tpu.core_type<tc>, window_params = [{transform_indices = @transform_0, window_bounds = array<i64: 1, 196, 32>}, {pipeline_mode = #tpu.pipeline_mode<synchronous>, transform_indices = @transform_1, window_bounds = array<i64: 32, 128>}, {pipeline_mode = #tpu.pipeline_mode<synchronous>, transform_indices = @transform_2, window_bounds = array<i64: 1, 128>}, {pipeline_mode = #tpu.pipeline_mode<synchronous>, transform_indices = @transform_3, window_bounds = array<i64: 9, 128>}, {pipeline_mode = #tpu.pipeline_mode<synchronous>, transform_indices = @transform_4, window_bounds = array<i64: 1, 128>}, {pipeline_mode = #tpu.pipeline_mode<synchronous>, transform_indices = @transform_5, window_bounds = array<i64: 196, 1>}, {pipeline_mode = #tpu.pipeline_mode<synchronous>, transform_indices = @transform_6, window_bounds = array<i64: 196, 1>}, {pipeline_mode = #tpu.pipeline_mode<synchronous>, transform_indices = @transform_7, window_bounds = array<i64: 128, 32>}, {pipeline_mode = #tpu.pipeline_mode<synchronous>, transform_indices = @transform_8, window_bounds = array<i64: 1, 32>}, {transform_indices = @transform_9, window_bounds = array<i64: 1, 196, 32>}]} {
    %c0 = arith.constant 0 : index
    %c0_0 = arith.constant 0 : index
    %c0_1 = arith.constant 0 : index
    %0 = vector.load %arg1[%c0, %c0_0, %c0_1] : memref<1x196x32xf32, #tpu.memory_space<vmem>>, vector<1x196x32xf32>
    %1 = vector.shape_cast %0 : vector<1x196x32xf32> to vector<196x32xf32>
    %c0_2 = arith.constant 0 : index
    %c0_3 = arith.constant 0 : index
    %2 = vector.load %arg2[%c0_2, %c0_3] : memref<32x128xf32, #tpu.memory_space<vmem>>, vector<32x128xf32>
    %cst = arith.constant dense<0.000000e+00> : vector<196x128xf32>
    %3 = tpu.matmul %1, %2, %cst {dimension_numbers = #tpu.dot_dimension_numbers<[1], [0], [0], [1], [0, 0, 1, 1], [], []>} : vector<196x32xf32>, vector<32x128xf32>, vector<196x128xf32> -> vector<196x128xf32>
    %c0_4 = arith.constant 0 : index
    %c0_5 = arith.constant 0 : index
    %4 = vector.load %arg3[%c0_4, %c0_5] : memref<1x128xf32, #tpu.memory_space<vmem>>, vector<1x128xf32>
    %5 = vector.broadcast %4 : vector<1x128xf32> to vector<196x128xf32>
    %6 = arith.addf %3, %5 : vector<196x128xf32>
    %cst_6 = arith.constant 5.000000e-01 : f32
    %7 = vector.broadcast %cst_6 : f32 to vector<196x128xf32>
    %8 = arith.mulf %7, %6 : vector<196x128xf32>
    %cst_7 = arith.constant 0.707106769 : f32
    %9 = vector.broadcast %cst_7 : f32 to vector<196x128xf32>
    %10 = arith.mulf %6, %9 : vector<196x128xf32>
    %11 = math.erf %10 : vector<196x128xf32>
    %cst_8 = arith.constant 1.000000e+00 : f32
    %12 = vector.broadcast %cst_8 : f32 to vector<196x128xf32>
    %13 = arith.addf %12, %11 : vector<196x128xf32>
    %14 = arith.mulf %8, %13 : vector<196x128xf32>
    %cst_9 = arith.constant 0.000000e+00 : f32
    %15 = vector.broadcast %cst_9 : f32 to vector<16x128xf32>
    %c0_10 = arith.constant 0 : index
    %c0_11 = arith.constant 0 : index
    %16 = vector.load %arg11[%c0_10, %c0_11] : memref<228x128xf32, #tpu.memory_space<vmem>>, vector<16x128xf32>
    tpu.vector_store %arg11[%c0_10, %c0_11], %15 {strides = array<i32>} : memref<228x128xf32, #tpu.memory_space<vmem>>, vector<16x128xf32>,
    %c212 = arith.constant 212 : index
    %c0_12 = arith.constant 0 : index
    %17 = vector.load %arg11[%c212, %c0_12] : memref<228x128xf32, #tpu.memory_space<vmem>>, vector<16x128xf32>
    tpu.vector_store %arg11[%c212, %c0_12], %15 {strides = array<i32>} : memref<228x128xf32, #tpu.memory_space<vmem>>, vector<16x128xf32>,
    %c16 = arith.constant 16 : index
    %c0_13 = arith.constant 0 : index
    %18 = vector.load %arg11[%c16, %c0_13] : memref<228x128xf32, #tpu.memory_space<vmem>>, vector<196x128xf32>
    tpu.vector_store %arg11[%c16, %c0_13], %14 {strides = array<i32>} : memref<228x128xf32, #tpu.memory_space<vmem>>, vector<196x128xf32>,
    %c0_14 = arith.constant 0 : index
    %c0_15 = arith.constant 0 : index
    %19 = vector.load %arg6[%c0_14, %c0_15] : memref<196x1xf32, #tpu.memory_space<vmem>>, vector<196x1xf32>
    %20 = vector.shape_cast %19 : vector<196x1xf32> to vector<196x1xf32>
    %21 = vector.broadcast %20 : vector<196x1xf32> to vector<196x128xf32>
    %c0_16 = arith.constant 0 : index
    %c0_17 = arith.constant 0 : index
    %22 = vector.load %arg7[%c0_16, %c0_17] : memref<196x1xf32, #tpu.memory_space<vmem>>, vector<196x1xf32>
    %23 = vector.shape_cast %22 : vector<196x1xf32> to vector<196x1xf32>
    %24 = vector.broadcast %23 : vector<196x1xf32> to vector<196x128xf32>
    %c0_18 = arith.constant 0 : index
    %c0_19 = arith.constant 0 : index
    %25 = vector.load %arg4[%c0_18, %c0_19] : memref<9x128xf32, #tpu.memory_space<vmem>>, vector<9x128xf32>
    %cst_20 = arith.constant 0.000000e+00 : f32
    %26 = vector.broadcast %cst_20 : f32 to vector<196x128xf32>
    %c1 = arith.constant 1 : index
    %c0_21 = arith.constant 0 : index
    %27 = vector.load %arg11[%c1, %c0_21] : memref<228x128xf32, #tpu.memory_space<vmem>>, vector<196x128xf32>
    %28 = arith.mulf %27, %21 : vector<196x128xf32>
    %29 = vector.extract_strided_slice %25 {offsets = [0, 0], sizes = [1, 128], strides = [1, 1]} : vector<9x128xf32> to vector<1x128xf32>
    %30 = vector.broadcast %29 : vector<1x128xf32> to vector<196x128xf32>
    %31 = arith.mulf %28, %30 : vector<196x128xf32>
    %32 = arith.addf %26, %31 : vector<196x128xf32>
    %c2 = arith.constant 2 : index
    %c0_22 = arith.constant 0 : index
    %33 = vector.load %arg11[%c2, %c0_22] : memref<228x128xf32, #tpu.memory_space<vmem>>, vector<196x128xf32>
    %34 = vector.extract_strided_slice %25 {offsets = [1, 0], sizes = [1, 128], strides = [1, 1]} : vector<9x128xf32> to vector<1x128xf32>
    %35 = vector.broadcast %34 : vector<1x128xf32> to vector<196x128xf32>
    %36 = arith.mulf %33, %35 : vector<196x128xf32>
    %37 = arith.addf %32, %36 : vector<196x128xf32>
    %c3 = arith.constant 3 : index
    %c0_23 = arith.constant 0 : index
    %38 = vector.load %arg11[%c3, %c0_23] : memref<228x128xf32, #tpu.memory_space<vmem>>, vector<196x128xf32>
    %39 = arith.mulf %38, %24 : vector<196x128xf32>
    %40 = vector.extract_strided_slice %25 {offsets = [2, 0], sizes = [1, 128], strides = [1, 1]} : vector<9x128xf32> to vector<1x128xf32>
    %41 = vector.broadcast %40 : vector<1x128xf32> to vector<196x128xf32>
    %42 = arith.mulf %39, %41 : vector<196x128xf32>
    %43 = arith.addf %37, %42 : vector<196x128xf32>
    %c15 = arith.constant 15 : index
    %c0_24 = arith.constant 0 : index
    %44 = vector.load %arg11[%c15, %c0_24] : memref<228x128xf32, #tpu.memory_space<vmem>>, vector<196x128xf32>
    %45 = arith.mulf %44, %21 : vector<196x128xf32>
    %46 = vector.extract_strided_slice %25 {offsets = [3, 0], sizes = [1, 128], strides = [1, 1]} : vector<9x128xf32> to vector<1x128xf32>
    %47 = vector.broadcast %46 : vector<1x128xf32> to vector<196x128xf32>
    %48 = arith.mulf %45, %47 : vector<196x128xf32>
    %49 = arith.addf %43, %48 : vector<196x128xf32>
    %c16_25 = arith.constant 16 : index
    %c0_26 = arith.constant 0 : index
    %50 = vector.load %arg11[%c16_25, %c0_26] : memref<228x128xf32, #tpu.memory_space<vmem>>, vector<196x128xf32>
    %51 = vector.extract_strided_slice %25 {offsets = [4, 0], sizes = [1, 128], strides = [1, 1]} : vector<9x128xf32> to vector<1x128xf32>
    %52 = vector.broadcast %51 : vector<1x128xf32> to vector<196x128xf32>
    %53 = arith.mulf %50, %52 : vector<196x128xf32>
    %54 = arith.addf %49, %53 : vector<196x128xf32>
    %c17 = arith.constant 17 : index
    %c0_27 = arith.constant 0 : index
    %55 = vector.load %arg11[%c17, %c0_27] : memref<228x128xf32, #tpu.memory_space<vmem>>, vector<196x128xf32>
    %56 = arith.mulf %55, %24 : vector<196x128xf32>
    %57 = vector.extract_strided_slice %25 {offsets = [5, 0], sizes = [1, 128], strides = [1, 1]} : vector<9x128xf32> to vector<1x128xf32>
    %58 = vector.broadcast %57 : vector<1x128xf32> to vector<196x128xf32>
    %59 = arith.mulf %56, %58 : vector<196x128xf32>
    %60 = arith.addf %54, %59 : vector<196x128xf32>
    %c29 = arith.constant 29 : index
    %c0_28 = arith.constant 0 : index
    %61 = vector.load %arg11[%c29, %c0_28] : memref<228x128xf32, #tpu.memory_space<vmem>>, vector<196x128xf32>
    %62 = arith.mulf %61, %21 : vector<196x128xf32>
    %63 = vector.extract_strided_slice %25 {offsets = [6, 0], sizes = [1, 128], strides = [1, 1]} : vector<9x128xf32> to vector<1x128xf32>
    %64 = vector.broadcast %63 : vector<1x128xf32> to vector<196x128xf32>
    %65 = arith.mulf %62, %64 : vector<196x128xf32>
    %66 = arith.addf %60, %65 : vector<196x128xf32>
    %c30 = arith.constant 30 : index
    %c0_29 = arith.constant 0 : index
    %67 = vector.load %arg11[%c30, %c0_29] : memref<228x128xf32, #tpu.memory_space<vmem>>, vector<196x128xf32>
    %68 = vector.extract_strided_slice %25 {offsets = [7, 0], sizes = [1, 128], strides = [1, 1]} : vector<9x128xf32> to vector<1x128xf32>
    %69 = vector.broadcast %68 : vector<1x128xf32> to vector<196x128xf32>
    %70 = arith.mulf %67, %69 : vector<196x128xf32>
    %71 = arith.addf %66, %70 : vector<196x128xf32>
    %c31 = arith.constant 31 : index
    %c0_30 = arith.constant 0 : index
    %72 = vector.load %arg11[%c31, %c0_30] : memref<228x128xf32, #tpu.memory_space<vmem>>, vector<196x128xf32>
    %73 = arith.mulf %72, %24 : vector<196x128xf32>
    %74 = vector.extract_strided_slice %25 {offsets = [8, 0], sizes = [1, 128], strides = [1, 1]} : vector<9x128xf32> to vector<1x128xf32>
    %75 = vector.broadcast %74 : vector<1x128xf32> to vector<196x128xf32>
    %76 = arith.mulf %73, %75 : vector<196x128xf32>
    %77 = arith.addf %71, %76 : vector<196x128xf32>
    %c0_31 = arith.constant 0 : index
    %c0_32 = arith.constant 0 : index
    %78 = vector.load %arg5[%c0_31, %c0_32] : memref<1x128xf32, #tpu.memory_space<vmem>>, vector<1x128xf32>
    %79 = vector.broadcast %78 : vector<1x128xf32> to vector<196x128xf32>
    %80 = arith.addf %77, %79 : vector<196x128xf32>
    %cst_33 = arith.constant 5.000000e-01 : f32
    %81 = vector.broadcast %cst_33 : f32 to vector<196x128xf32>
    %82 = arith.mulf %81, %80 : vector<196x128xf32>
    %cst_34 = arith.constant 0.707106769 : f32
    %83 = vector.broadcast %cst_34 : f32 to vector<196x128xf32>
    %84 = arith.mulf %80, %83 : vector<196x128xf32>
    %85 = math.erf %84 : vector<196x128xf32>
    %cst_35 = arith.constant 1.000000e+00 : f32
    %86 = vector.broadcast %cst_35 : f32 to vector<196x128xf32>
    %87 = arith.addf %86, %85 : vector<196x128xf32>
    %88 = arith.mulf %82, %87 : vector<196x128xf32>
    %c0_36 = arith.constant 0 : index
    %c0_37 = arith.constant 0 : index
    %89 = vector.load %arg8[%c0_36, %c0_37] : memref<128x32xf32, #tpu.memory_space<vmem>>, vector<128x32xf32>
    %cst_38 = arith.constant dense<0.000000e+00> : vector<196x32xf32>
    %90 = tpu.matmul %88, %89, %cst_38 {dimension_numbers = #tpu.dot_dimension_numbers<[1], [0], [0], [1], [0, 0, 1, 1], [], []>} : vector<196x128xf32>, vector<128x32xf32>, vector<196x32xf32> -> vector<196x32xf32>
    %c0_39 = arith.constant 0 : index
    %c0_40 = arith.constant 0 : index
    %91 = vector.load %arg9[%c0_39, %c0_40] : memref<1x32xf32, #tpu.memory_space<vmem>>, vector<1x32xf32>
    %92 = vector.broadcast %91 : vector<1x32xf32> to vector<196x32xf32>
    %93 = arith.addf %90, %92 : vector<196x32xf32>
    %cst_41 = arith.constant 5.000000e-01 : f32
    %94 = vector.broadcast %cst_41 : f32 to vector<196x32xf32>
    %95 = arith.mulf %94, %93 : vector<196x32xf32>
    %cst_42 = arith.constant 0.707106769 : f32
    %96 = vector.broadcast %cst_42 : f32 to vector<196x32xf32>
    %97 = arith.mulf %93, %96 : vector<196x32xf32>
    %98 = math.erf %97 : vector<196x32xf32>
    %cst_43 = arith.constant 1.000000e+00 : f32
    %99 = vector.broadcast %cst_43 : f32 to vector<196x32xf32>
    %100 = arith.addf %99, %98 : vector<196x32xf32>
    %101 = arith.mulf %95, %100 : vector<196x32xf32>
    %c0_44 = arith.constant 0 : index
    %c0_45 = arith.constant 0 : index
    %c0_46 = arith.constant 0 : index
    %102 = vector.load %arg10[%c0_44, %c0_45, %c0_46] : memref<1x196x32xf32, #tpu.memory_space<vmem>>, vector<1x196x32xf32>
    %103 = vector.shape_cast %102 : vector<1x196x32xf32> to vector<196x32xf32>
    %104 = vector.shape_cast %101 : vector<196x32xf32> to vector<1x196x32xf32>
    tpu.vector_store %arg10[%c0_44, %c0_45, %c0_46], %104 {strides = array<i32>} : memref<1x196x32xf32, #tpu.memory_space<vmem>>, vector<1x196x32xf32>,
    return
  }
  func.func @transform_0(%arg0: i32) -> (i32, i32, i32) {
    %c0_i32 = arith.constant 0 : i32
    %c0_i32_0 = arith.constant 0 : i32
    %c0_i32_1 = arith.constant 0 : i32
    return %arg0, %c0_i32, %c0_i32_0 : i32, i32, i32
  }
  func.func @transform_1(%arg0: i32) -> (i32, i32) {
    %c0_i32 = arith.constant 0 : i32
    %c0_i32_0 = arith.constant 0 : i32
    %c0_i32_1 = arith.constant 0 : i32
    return %c0_i32, %c0_i32_0 : i32, i32
  }
  func.func @transform_2(%arg0: i32) -> (i32, i32) {
    %c0_i32 = arith.constant 0 : i32
    %c0_i32_0 = arith.constant 0 : i32
    %c0_i32_1 = arith.constant 0 : i32
    return %c0_i32, %c0_i32_0 : i32, i32
  }
  func.func @transform_3(%arg0: i32) -> (i32, i32) {
    %c0_i32 = arith.constant 0 : i32
    %c0_i32_0 = arith.constant 0 : i32
    %c0_i32_1 = arith.constant 0 : i32
    return %c0_i32, %c0_i32_0 : i32, i32
  }
  func.func @transform_4(%arg0: i32) -> (i32, i32) {
    %c0_i32 = arith.constant 0 : i32
    %c0_i32_0 = arith.constant 0 : i32
    %c0_i32_1 = arith.constant 0 : i32
    return %c0_i32, %c0_i32_0 : i32, i32
  }
  func.func @transform_5(%arg0: i32) -> (i32, i32) {
    %c0_i32 = arith.constant 0 : i32
    %c0_i32_0 = arith.constant 0 : i32
    %c0_i32_1 = arith.constant 0 : i32
    return %c0_i32, %c0_i32_0 : i32, i32
  }
  func.func @transform_6(%arg0: i32) -> (i32, i32) {
    %c0_i32 = arith.constant 0 : i32
    %c0_i32_0 = arith.constant 0 : i32
    %c0_i32_1 = arith.constant 0 : i32
    return %c0_i32, %c0_i32_0 : i32, i32
  }
  func.func @transform_7(%arg0: i32) -> (i32, i32) {
    %c0_i32 = arith.constant 0 : i32
    %c0_i32_0 = arith.constant 0 : i32
    %c0_i32_1 = arith.constant 0 : i32
    return %c0_i32, %c0_i32_0 : i32, i32
  }
  func.func @transform_8(%arg0: i32) -> (i32, i32) {
    %c0_i32 = arith.constant 0 : i32
    %c0_i32_0 = arith.constant 0 : i32
    %c0_i32_1 = arith.constant 0 : i32
    return %c0_i32, %c0_i32_0 : i32, i32
  }
  func.func @transform_9(%arg0: i32) -> (i32, i32, i32) {
    %c0_i32 = arith.constant 0 : i32
    %c0_i32_0 = arith.constant 0 : i32
    %c0_i32_1 = arith.constant 0 : i32
    return %arg0, %c0_i32, %c0_i32_0 : i32, i32, i32
  }
}

</mosaic_0001>

<bundles_post_ra>
// kernel: leff_forward.1
= control target key start
LH: loop header
LB: loop body
LE: loop exit
PB: predicated region body
PF: predicated region fallthrough
CT: control target
= control target key end

     0   :  { %s3062_s30 = smov 0   ;;  %s4375_s0 = inlined_call_operand.vmem [shape: f32[2,196,32], index: 0, kind: input, shape index: {}]   ;;  %s4376_s1 = inlined_call_operand.vmem [shape: f32[32,128], index: 1, kind: input, shape index: {}]   ;;  %s4377_s2 = inlined_call_operand.vmem [shape: f32[1,128], index: 2, kind: input, shape index: {}]   ;;  %s4378_s3 = inlined_call_operand.vmem [shape: f32[9,128], index: 3, kind: input, shape index: {}]   ;;  %s4379_s4 = inlined_call_operand.vmem [shape: f32[1,128], index: 4, kind: input, shape index: {}]   ;;  %s4380_s5 = inlined_call_operand.vmem [shape: f32[196,1], index: 5, kind: input, shape index: {}]   ;;  %s4381_s6 = inlined_call_operand.vmem [shape: f32[196,1], index: 6, kind: input, shape index: {}]   ;;  %s4382_s7 = inlined_call_operand.vmem [shape: f32[128,32], index: 7, kind: input, shape index: {}]   ;;  %s4383_s8 = inlined_call_operand.vmem [shape: f32[1,32], index: 8, kind: input, shape index: {}]   ;;  %s4384_s9 = inlined_call_operand.vmem [shape: f32[2,196,32], index: 9, kind: output, shape index: {}]  }
   0x1 LB: > { %s2484_s10 = sadd.s32 4294967295, %s3006_s30   ;;  %p2488_p0 = scmp.ge.s32.totalorder %s3006_s30, 1  ;;  %s3006_s30 = sphi %s3062_s30, %s19_s30  }
   0x2   : > { %p287_p1 = scmp.lt.s32.totalorder %s3006_s30, 3 }
   0x4   : > { %p288_p2 = pnand %p2488_p0, %p287_p1 }
   0x6   : > { %291 = sbr.rel (%p288_p2) target bundleno = 726 (0x2d6), region = 56 }
   0xd   : > { %v358_v0 = vld [vmem:[%s4376_s1] sm:$0xff]  ;;  %v359_v1 = vld [vmem:[%s4376_s1 + $0x8] sm:$0xff]  ;;  %v360_v2 = vld [vmem:[%s4376_s1 + $0x10] sm:$0xff]  ;;  %v3008_v3 = vmov 0.0|0.0   ;;  %vm3009_vm0 = vmmov 0   ;;  %v3010_v6 = vmov 0.0  }
   0xe   : > { %2782 = vmatprep.subr.bf16.mxu0 %v3008_v3  ;;  %v2783_v4 = vpack.c.bf16 %v359_v1, %v358_v0  ;;  %v361_v5 = vld [vmem:[%s4376_s1 + $0x18] sm:$0xff]  ;;  %2600 = vmatprep.mubr.msk.f32.mxu0 %vm3009_vm0, %v3010_v6  ;;  %760 = vst [vmem:[#allocation2] sm:$0xff] %v3010_v6  ;;  %761 = vst [vmem:[#allocation2 + $0x8] sm:$0xff] %v3010_v6  ;;  %p323_p3 = scmp.lt.s32.totalorder %s2484_s10, 1  ;;  %v793_v7 = vld [vmem:[%s4380_s5 + $0x20] sm:$0xff]  ;;  %v3011_v9 = vmov 0  }
   0xf   : > { %762 = vst [vmem:[#allocation2 + $0xd4] sm:$0xff] %v3010_v6  ;;  %763 = vst [vmem:[#allocation2 + $0xdc] sm:$0xff] %v3010_v6  ;;  %v792_v8 = vld [vmem:[%s4380_s5 + $0x18] sm:$0xff]  ;;  %2842 = vset.pattern.permute.xlu1 %v3011_v9  ;;  %2841 = vset.pattern.permute.xlu0 %v3011_v9  ;;  %v2786_v10 = vpack.c.bf16 %v361_v5, %v360_v2  ;;  %v943_v11 = vld [vmem:[%s4381_s6 + $0x20] sm:$0xff]  ;;  %vm369_vm1 = vcmask 261120   ;;  %vm2427_vm2 = vcmask 257024  }
  0x10   : > { %2784 = vmatpush3.bf16.msra.mxu0 %v2783_v4  ;;  %s4491_s10 = smov (!%p323_p3, %s2484_s10), 1  ;;  %836 = vperm.xlu1 %2842, %v793_v7   ;;  %v942_v12 = vld [vmem:[%s4381_s6 + $0x18] sm:$0xff]  ;;  %v944_v14 = vld [vmem:[%s4381_s6 + $0x28] sm:$0xff]  ;;  %v945_v17 = vld [vmem:[%s4381_s6 + $0x30] sm:$0xff] }
  0x11   : > { %2785 = vmatprep.subr.bf16.mxu0 %v3008_v3  ;;  %831 = vperm.xlu0 %2841, %v792_v8   ;;  %s2828_s25 = smul.u32 200, %s4491_s10  ;;  %v794_v15 = vld [vmem:[%s4380_s5 + $0x28] sm:$0xff]  ;;  %v795_v18 = vld [vmem:[%s4380_s5 + $0x30] sm:$0xff]  ;;  %v946_v20 = vld [vmem:[%s4381_s6 + $0x38] sm:$0xff] }
  0x12   : > { %2812 = vmatprep.subr.bf16.mxu1 %v3008_v3  ;;  %2716 = vmatprep.mubr.msk.f32.mxu1 %vm3009_vm0, %v3010_v6  ;;  %v796_v21 = vld [vmem:[%s4380_s5 + $0x38] sm:$0xff]  ;;  %v947_v23 = vld [vmem:[%s4381_s6 + $0x40] sm:$0xff]  ;;  %v948_v26 = vld [vmem:[%s4381_s6 + $0x48] sm:$0xff] }
  0x13   : > { %s3113_s11 = scalar_lea.vmem %s4375_s0, %s2828_s25  ;;  %v797_v24 = vld [vmem:[%s4380_s5 + $0x40] sm:$0xff]  ;;  %v798_v27 = vld [vmem:[%s4380_s5 + $0x48] sm:$0xff]  ;;  %v949_v29 = vld [vmem:[%s4381_s6 + $0x50] sm:$0xff] }
  0x14   : > { %2787 = vmatpush3.bf16.msra.mxu0 %v2786_v10  ;;  %986 = vperm.xlu1 %2842, %v943_v11   ;;  %v333_v13 = vld [vmem:[%s3113_s11] sm:$0xff]  ;;  %v334_v16 = vld [vmem:[%s3113_s11 + $0x8] sm:$0xff]  ;;  %v335_v19 = vld [vmem:[%s3113_s11 + $0x10] sm:$0xff] }
  0x15   : > { %981 = vperm.xlu0 %2841, %v942_v12   ;;  %2788 = vmatprep.subr.bf16.mxu0 %v3008_v3  ;;  %v336_v22 = vld [vmem:[%s3113_s11 + $0x18] sm:$0xff]  ;;  %v337_v25 = vld [vmem:[%s3113_s11 + $0x20] sm:$0xff]  ;;  %v338_v28 = vld [vmem:[%s3113_s11 + $0x28] sm:$0xff] }
  0x16   : > { %v799_v30 = vld [vmem:[%s4380_s5 + $0x50] sm:$0xff]  ;;  %v950_v32 = vld [vmem:[%s4381_s6 + $0x58] sm:$0xff]  ;;  %v951_v35 = vld [vmem:[%s4381_s6 + $0x60] sm:$0xff] }
  0x17   : > { %2601 = vmatmul.mubr.msk.f32.vlgmr.msra.gmra.mrb[0].mxu0 %vm369_vm1, %v333_v13  ;;  %v339_v31 = vld [vmem:[%s3113_s11 + $0x30] sm:$0xff]  ;;  %v800_v33 = vld [vmem:[%s4380_s5 + $0x58] sm:$0xff]  ;;  %v801_v36 = vld [vmem:[%s4380_s5 + $0x60] sm:$0xff] }
  0x18   : > { %2603 = vmatprep.mubr.msk.f32.mxu0 %vm3009_vm0, %v3010_v6  ;;  %991 = vperm.xlu1 %2842, %v944_v14   ;;  %v340_v34 = vld [vmem:[%s3113_s11 + $0x38] sm:$0xff]  ;;  %v341_v37 = vld [vmem:[%s3113_s11 + $0x40] sm:$0xff]  ;;  %v952_v38 = vld [vmem:[%s4381_s6 + $0x68] sm:$0xff] }
  0x19   : > { %841 = vperm.xlu0 %2841, %v794_v15   ;;  %v802_v39 = vld [vmem:[%s4380_s5 + $0x68] sm:$0xff]  ;;  %v953_v41 = vld [vmem:[%s4381_s6 + $0x70] sm:$0xff]  ;;  %v954_v44 = vld [vmem:[%s4381_s6 + $0x78] sm:$0xff] }
  0x1a   : > { %v342_v40 = vld [vmem:[%s3113_s11 + $0x48] sm:$0xff]  ;;  %v803_v42 = vld [vmem:[%s4380_s5 + $0x70] sm:$0xff]  ;;  %v804_v45 = vld [vmem:[%s4380_s5 + $0x78] sm:$0xff] }
  0x1b   : > { %2604 = vmatmul.mubr.msk.f32.gmra.mrb[2].mxu0 %vm369_vm1, %v334_v16  ;;  %v343_v43 = vld [vmem:[%s3113_s11 + $0x50] sm:$0xff]  ;;  %v344_v46 = vld [vmem:[%s3113_s11 + $0x58] sm:$0xff]  ;;  %v955_v47 = vld [vmem:[%s4381_s6 + $0x80] sm:$0xff] }
  0x1c   : > { %2606 = vmatprep.mubr.msk.f32.mxu0 %vm3009_vm0, %v3010_v6  ;;  %996 = vperm.xlu1 %2842, %v945_v17   ;;  %v805_v48 = vld [vmem:[%s4380_s5 + $0x80] sm:$0xff]  ;;  %v956_v50 = vld [vmem:[%s4381_s6 + $0x88] sm:$0xff]  ;;  %v957_v53 = vld [vmem:[%s4381_s6 + $0x90] sm:$0xff] }
  0x1d   : > { %846 = vperm.xlu0 %2841, %v795_v18   ;;  %v345_v49 = vld [vmem:[%s3113_s11 + $0x60] sm:$0xff]  ;;  %v806_v51 = vld [vmem:[%s4380_s5 + $0x88] sm:$0xff]  ;;  %v807_v54 = vld [vmem:[%s4380_s5 + $0x90] sm:$0xff] }
  0x1e   : > { %v346_v52 = vld [vmem:[%s3113_s11 + $0x68] sm:$0xff]  ;;  %v347_v55 = vld [vmem:[%s3113_s11 + $0x70] sm:$0xff]  ;;  %v958_v56 = vld [vmem:[%s4381_s6 + $0x98] sm:$0xff] }
  0x1f   : > { %2607 = vmatmul.mubr.msk.f32.gmra.mrb[4].mxu0 %vm369_vm1, %v335_v19  ;;  %v808_v57 = vld [vmem:[%s4380_s5 + $0x98] sm:$0xff]  ;;  %v959_v59 = vld [vmem:[%s4381_s6 + $0xa0] sm:$0xff]  ;;  %v960_v62 = vld [vmem:[%s4381_s6 + $0xa8] sm:$0xff] }
  0x20   : > { %2609 = vmatprep.mubr.msk.f32.mxu0 %vm3009_vm0, %v3010_v6  ;;  %1001 = vperm.xlu1 %2842, %v946_v20   ;;  %v348_v58 = vld [vmem:[%s3113_s11 + $0x78] sm:$0xff]  ;;  %v809_v60 = vld [vmem:[%s4380_s5 + $0xa0] sm:$0xff]  ;;  %v810_v63 = vld [vmem:[%s4380_s5 + $0xa8] sm:$0xff] }
  0x21   : > { %851 = vperm.xlu0 %2841, %v796_v21   ;;  %v349_v61 = vld [vmem:[%s3113_s11 + $0x80] sm:$0xff]  ;;  %v350_v0 = vld [vmem:[%s3113_s11 + $0x88] sm:$0xff]  ;;  %v811_v1 = vld [vmem:[%s4380_s5 + $0xb0] sm:$0xff] }
  0x22   : > { %v789_v2 = vld [vmem:[%s4380_s5] sm:$0xff]  ;;  %v351_v4 = vld [vmem:[%s3113_s11 + $0x90] sm:$0xff]  ;;  %v352_v8 = vld [vmem:[%s3113_s11 + $0x98] sm:$0xff] }
  0x23   : > { %2610 = vmatmul.mubr.msk.f32.gmra.mrb[6].mxu0 %vm369_vm1, %v336_v22  ;;  %v961_v5 = vld [vmem:[%s4381_s6 + $0xb0] sm:$0xff]  ;;  %v939_v7 = vld [vmem:[%s4381_s6] sm:$0xff]  ;;  %v812_v9 = vld [vmem:[%s4380_s5 + $0xb8] sm:$0xff] }
  0x24   : > { %2612 = vmatprep.mubr.msk.f32.mxu0 %vm3009_vm0, %v3010_v6  ;;  %1006 = vperm.xlu1 %2842, %v947_v23   ;;  %v790_v10 = vld [vmem:[%s4380_s5 + $0x8] sm:$0xff]  ;;  %v353_v11 = vld [vmem:[%s3113_s11 + $0xa0] sm:$0xff]  ;;  %v962_v12 = vld [vmem:[%s4381_s6 + $0xb8] sm:$0xff] }
  0x25   : > { %856 = vperm.xlu0 %2841, %v797_v24   ;;  %v940_v13 = vld [vmem:[%s4381_s6 + $0x8] sm:$0xff]  ;;  %v813_v15 = vld [vmem:[%s4380_s5 + $0xc0] sm:$0xf]  ;;  %v791_v16 = vld [vmem:[%s4380_s5 + $0x10] sm:$0xff] }
  0x26   : > { %v354_v14 = vld [vmem:[%s3113_s11 + $0xa8] sm:$0xff]  ;;  %v355_v17 = vld [vmem:[%s3113_s11 + $0xb0] sm:$0xff]  ;;  %v963_v18 = vld [vmem:[%s4381_s6 + $0xc0] sm:$0xf] }
  0x27   : > { %2613 = vmatmul.mubr.msk.f32.gmra.mrb[8].mxu0 %vm369_vm1, %v337_v25  ;;  %v941_v19 = vld [vmem:[%s4381_s6 + $0x10] sm:$0xff]  ;;  %v356_v20 = vld [vmem:[%s3113_s11 + $0xb8] sm:$0xff]  ;;  %v357_v21 = vld [vmem:[%s3113_s11 + $0xc0] sm:$0xf]  ;;  %s4297_s11 = scalar_lea.vmem %s4384_s9, %s2828_s25 }
  0x28   : > { %2615 = vmatprep.mubr.msk.f32.mxu0 %vm3009_vm0, %v3010_v6  ;;  %1011 = vperm.xlu1 %2842, %v948_v26  }
  0x29   : > { %861 = vperm.xlu0 %2841, %v798_v27  }
  0x2b   : > { %2616 = vmatmul.mubr.msk.f32.gmra.mrb[10].mxu0 %vm369_vm1, %v338_v28 }
  0x2c   : > { %2618 = vmatprep.mubr.msk.f32.mxu0 %vm3009_vm0, %v3010_v6  ;;  %1016 = vperm.xlu1 %2842, %v949_v29  }
  0x2d   : > { %866 = vperm.xlu0 %2841, %v799_v30  }
  0x2f   : > { %2619 = vmatmul.mubr.msk.f32.gmra.mrb[12].mxu0 %vm369_vm1, %v339_v31  ;;  %v2066_v31 = vld [vmem:[%s4382_s7 + $0x8] sm:$0xff] }
  0x30   : > { %2621 = vmatprep.mubr.msk.f32.mxu0 %vm3009_vm0, %v3010_v6  ;;  %1021 = vperm.xlu1 %2842, %v950_v32  }
  0x31   : > { %871 = vperm.xlu0 %2841, %v800_v33  }
  0x33   : > { %2622 = vmatmul.mubr.msk.f32.gmra.mrb[14].mxu0 %vm369_vm1, %v340_v34 }
  0x34   : > { %2624 = vmatprep.mubr.msk.f32.mxu0 %vm3009_vm0, %v3010_v6  ;;  %1026 = vperm.xlu1 %2842, %v951_v35   ;;  %v2067_v35 = vld [vmem:[%s4382_s7 + $0x10] sm:$0xff] }
  0x35   : > { %876 = vperm.xlu0 %2841, %v801_v36   ;;  %v2068_v36 = vld [vmem:[%s4382_s7 + $0x18] sm:$0xff] }
  0x37   : > { %2625 = vmatmul.mubr.msk.f32.gmra.mrb[16].mxu0 %vm369_vm1, %v341_v37 }
  0x38   : > { %2627 = vmatprep.mubr.msk.f32.mxu0 %vm3009_vm0, %v3010_v6  ;;  %1031 = vperm.xlu1 %2842, %v952_v38   ;;  %v2792_v38 = vpack.c.bf16 %v2068_v36, %v2067_v35  ;;  %v1141_v36 = vlaneseq }
  0x39   : > { %881 = vperm.xlu0 %2841, %v802_v39  }
  0x3b   : > { %2628 = vmatmul.mubr.msk.f32.gmra.mrb[18].mxu0 %vm369_vm1, %v342_v40  ;;  %v2069_v40 = vld [vmem:[%s4382_s7 + $0x20] sm:$0xff] }
  0x3c   : > { %2630 = vmatprep.mubr.msk.f32.mxu0 %vm3009_vm0, %v3010_v6  ;;  %1036 = vperm.xlu1 %2842, %v953_v41   ;;  %v2070_v41 = vld [vmem:[%s4382_s7 + $0x28] sm:$0xff] }
  0x3d   : > { %886 = vperm.xlu0 %2841, %v803_v42  }
  0x3f   : > { %2631 = vmatmul.mubr.msk.f32.gmra.mrb[20].mxu0 %vm369_vm1, %v343_v43  ;;  %v2795_v43 = vpack.c.bf16 %v2070_v41, %v2069_v40 }
  0x40   : > { %2633 = vmatprep.mubr.msk.f32.mxu0 %vm3009_vm0, %v3010_v6  ;;  %1041 = vperm.xlu1 %2842, %v954_v44   ;;  %v2071_v44 = vld [vmem:[%s4382_s7 + $0x30] sm:$0xff] }
  0x41   : > { %891 = vperm.xlu0 %2841, %v804_v45   ;;  %v2072_v45 = vld [vmem:[%s4382_s7 + $0x38] sm:$0xff] }
  0x43   : > { %2634 = vmatmul.mubr.msk.f32.gmra.mrb[22].mxu0 %vm369_vm1, %v344_v46 }
  0x44   : > { %2636 = vmatprep.mubr.msk.f32.mxu0 %vm3009_vm0, %v3010_v6  ;;  %1046 = vperm.xlu1 %2842, %v955_v47  }
  0x45   : > { %896 = vperm.xlu0 %2841, %v805_v48   ;;  %v2798_v48 = vpack.c.bf16 %v2072_v45, %v2071_v44 }
  0x47   : > { %2637 = vmatmul.mubr.msk.f32.gmra.mrb[24].mxu0 %vm369_vm1, %v345_v49  ;;  %v2073_v49 = vld [vmem:[%s4382_s7 + $0x40] sm:$0xff] }
  0x48   : > { %2639 = vmatprep.mubr.msk.f32.mxu0 %vm3009_vm0, %v3010_v6  ;;  %1051 = vperm.xlu1 %2842, %v956_v50   ;;  %v2074_v50 = vld [vmem:[%s4382_s7 + $0x48] sm:$0xff] }
  0x49   : > { %901 = vperm.xlu0 %2841, %v806_v51  }
  0x4b   : > { %2640 = vmatmul.mubr.msk.f32.gmra.mrb[26].mxu0 %vm369_vm1, %v346_v52  ;;  %v2801_v52 = vpack.c.bf16 %v2074_v50, %v2073_v49 }
  0x4c   : > { %2642 = vmatprep.mubr.msk.f32.mxu0 %vm3009_vm0, %v3010_v6  ;;  %1056 = vperm.xlu1 %2842, %v957_v53  }
  0x4d   : > { %906 = vperm.xlu0 %2841, %v807_v54   ;;  %v2075_v54 = vld [vmem:[%s4382_s7 + $0x50] sm:$0xff] }
  0x4f   : > { %2643 = vmatmul.mubr.msk.f32.gmra.mrb[28].mxu0 %vm369_vm1, %v347_v55  ;;  %v2076_v55 = vld [vmem:[%s4382_s7 + $0x58] sm:$0xff] }
  0x50   : > { %2645 = vmatprep.mubr.msk.f32.mxu0 %vm3009_vm0, %v3010_v6  ;;  %1061 = vperm.xlu1 %2842, %v958_v56   ;;  %v2804_v56 = vpack.c.bf16 %v2076_v55, %v2075_v54 }
  0x51   : > { %911 = vperm.xlu0 %2841, %v808_v57  }
  0x53   : > { %2646 = vmatmul.mubr.msk.f32.gmra.mrb[30].mxu0 %vm369_vm1, %v348_v58  ;;  %v2077_v58 = vld [vmem:[%s4382_s7 + $0x60] sm:$0xff] }
  0x54   : > { %2648 = vmatprep.mubr.msk.f32.mxu0 %vm3009_vm0, %v3010_v6  ;;  %1066 = vperm.xlu1 %2842, %v959_v59   ;;  %v2078_v59 = vld [vmem:[%s4382_s7 + $0x68] sm:$0xff] }
  0x55   : > { %916 = vperm.xlu0 %2841, %v809_v60  }
  0x57   : > { %2649 = vmatmul.mubr.msk.f32.gmra.mrb[32].mxu0 %vm369_vm1, %v349_v61  ;;  %v2807_v61 = vpack.c.bf16 %v2078_v59, %v2077_v58  ;;  %v3511_v59 = vld [vmem:[%s4378_s3] sm:$0xff] }
  0x58   : > { %2651 = vmatprep.mubr.msk.f32.mxu0 %vm3009_vm0, %v3010_v6  ;;  %1071 = vperm.xlu1 %2842, %v960_v62   ;;  %v2079_v62 = vld [vmem:[%s4382_s7 + $0x70] sm:$0xff] }
  0x59   : > { %921 = vperm.xlu0 %2841, %v810_v63   ;;  %v2080_v63 = vld [vmem:[%s4382_s7 + $0x78] sm:$0xff] }
  0x5b   : > { %2652 = vmatmul.mubr.msk.f32.gmra.mrb[34].mxu0 %vm369_vm1, %v350_v0 }
  0x5c   : > { %2654 = vmatprep.mubr.msk.f32.mxu0 %vm3009_vm0, %v3010_v6  ;;  %926 = vperm.xlu1 %2842, %v811_v1   ;;  %v2810_v1 = vpack.c.bf16 %v2080_v63, %v2079_v62 }
  0x5d   : > { %816 = vperm.xlu0 %2841, %v789_v2  }
  0x5f   : > { %2655 = vmatmul.mubr.msk.f32.gmra.mrb[36].mxu0 %vm369_vm1, %v351_v4 }
  0x60   : > { %2657 = vmatprep.mubr.msk.f32.mxu0 %vm3009_vm0, %v3010_v6  ;;  %1076 = vperm.xlu1 %2842, %v961_v5  }
  0x61   : > { %966 = vperm.xlu0 %2841, %v939_v7  }
  0x63   : > { %2658 = vmatmul.mubr.msk.f32.gmra.mrb[38].mxu0 %vm369_vm1, %v352_v8 }
  0x64   : > { %2660 = vmatprep.mubr.msk.f32.mxu0 %vm3009_vm0, %v3010_v6  ;;  %931 = vperm.xlu1 %2842, %v812_v9  }
  0x65   : > { %821 = vperm.xlu0 %2841, %v790_v10  }
  0x67   : > { %2661 = vmatmul.mubr.msk.f32.gmra.mrb[40].mxu0 %vm369_vm1, %v353_v11 }
  0x68   : > { %2663 = vmatprep.mubr.msk.f32.mxu0 %vm3009_vm0, %v3010_v6  ;;  %1081 = vperm.xlu1 %2842, %v962_v12  }
  0x69   : > { %971 = vperm.xlu0 %2841, %v940_v13  }
  0x6b   : > { %2664 = vmatmul.mubr.msk.f32.gmra.mrb[42].mxu0 %vm369_vm1, %v354_v14 }
  0x6c   : > { %2666 = vmatprep.mubr.msk.f32.mxu0 %vm3009_vm0, %v3010_v6  ;;  %936 = vperm.xlu1 %2842, %v813_v15  }
  0x6d   : > { %826 = vperm.xlu0 %2841, %v791_v16  }
  0x6f   : > { %2667 = vmatmul.mubr.msk.f32.gmra.mrb[44].mxu0 %vm369_vm1, %v355_v17 }
  0x70   : > { %2669 = vmatprep.mubr.msk.f32.mxu0 %vm3009_vm0, %v3010_v6  ;;  %1086 = vperm.xlu1 %2842, %v963_v18   ;;  %v3491_v18 = vld [vmem:[%s4377_s2] ss:$0 sm:$0xff] }
  0x71   : > { %976 = vperm.xlu0 %2841, %v941_v19  }
  0x73   : > { %2670 = vmatmul.mubr.msk.f32.gmra.mrb[46].mxu0 %vm369_vm1, %v356_v20 }
  0x74   : > { %2672 = vmatprep.mubr.msk.f32.mxu0 %vm3009_vm0, %v3010_v6 }
  0x77   : > { %2673 = vmatmul.mubr.msk.f32.gmra.mrb[48].mxu0 %vm369_vm1, %v357_v21 }
  0x78   : > { %2707 = vmatprep.mubr.msk.f32.mxu0 %vm3009_vm0, %v3010_v6  ;;  %v2065_v6 = vld [vmem:[%s4382_s7] sm:$0xff] }
  0x79   : > { %v2789_v33 = vpack.c.bf16 %v2066_v31, %v2065_v6 }
  0x7b   : > { %2790 = vmatpush3.bf16.msra.mxu0 %v2789_v33  ;;  %2820 = vmatpush3.bf16.msra.mxu1 %v2789_v33 }
  0x7c   : > { %2791 = vmatprep.subr.bf16.mxu0 %v3008_v3  ;;  %2813 = vmatprep.subr.bf16.mxu1 %v3008_v3 }
  0x7f   : > { %2793 = vmatpush3.bf16.msra.mxu0 %v2792_v38  ;;  %2821 = vmatpush3.bf16.msra.mxu1 %v2792_v38 }
  0x80   : > { %2794 = vmatprep.subr.bf16.mxu0 %v3008_v3  ;;  %2814 = vmatprep.subr.bf16.mxu1 %v3008_v3 }
  0x83   : > { %2796 = vmatpush3.bf16.msra.mxu0 %v2795_v43  ;;  %2822 = vmatpush3.bf16.msra.mxu1 %v2795_v43  ;;  %v3499_v43 = vshrl.u32 %v1141_v36, 7 }
  0x84   : > { %2797 = vmatprep.subr.bf16.mxu0 %v3008_v3  ;;  %2815 = vmatprep.subr.bf16.mxu1 %v3008_v3 }
  0x85   : > { %v1143_v54 = vsub.s32 0, %v3499_v43  ;;  %v1326_v36 = vsub.s32 2, %v3499_v43 }
  0x87   : > { %2799 = vmatpush3.bf16.msra.mxu0 %v2798_v48  ;;  %2823 = vmatpush3.bf16.msra.mxu1 %v2798_v48 }
  0x88   : > { %2800 = vmatprep.subr.bf16.mxu0 %v3008_v3  ;;  %2816 = vmatprep.subr.bf16.mxu1 %v3008_v3 }
  0x8b   : > { %2802 = vmatpush3.bf16.msra.mxu0 %v2801_v52  ;;  %2824 = vmatpush3.bf16.msra.mxu1 %v2801_v52  ;;  %v1222_v52 = vsub.s32 1, %v3499_v43 }
  0x8c   : > { %2803 = vmatprep.subr.bf16.mxu0 %v3008_v3  ;;  %2817 = vmatprep.subr.bf16.mxu1 %v3008_v3 }
  0x8d   : > { %v3517_v63 = vrot.slane %v3511_v59, %v1222_v52 }
  0x8f   : > { %v3354_v22 = vpop.permute.xlu1 %836  ;;  %2805 = vmatpush3.bf16.msra.mxu0 %v2804_v56  ;;  %2825 = vmatpush3.bf16.msra.mxu1 %v2804_v56  ;;  %v1091_v56 = vld [vmem:[#allocation2 + $0x1] sm:$0xff] }
  0x90   : > { %v3356_v23 = vpop.permute.xlu0 %831  ;;  %2806 = vmatprep.subr.bf16.mxu0 %v3008_v3  ;;  %2818 = vmatprep.subr.bf16.mxu1 %v3008_v3 }
  0x93   : > { %v3358_v24 = vpop.permute.xlu1 %986  ;;  %2808 = vmatpush3.bf16.msra.mxu0 %v2807_v61  ;;  %2826 = vmatpush3.bf16.msra.mxu1 %v2807_v61 }
  0x94   : > { %v3360_v25 = vpop.permute.xlu0 %981  ;;  %2809 = vmatprep.subr.bf16.mxu0 %v3008_v3  ;;  %2819 = vmatprep.subr.bf16.mxu1 %v3008_v3 }
  0x97   : > { %v3362_v26 = vpop.permute.xlu1 %991  ;;  %2811 = vmatpush3.bf16.msra.mxu0 %v2810_v1  ;;  %2827 = vmatpush3.bf16.msra.mxu1 %v2810_v1 }
  0x98   : > { %v3364_v27 = vpop.permute.xlu0 %841 }
  0x9b   : > { %v3366_v28 = vpop.permute.xlu1 %996 }
  0x9c   : > { %v3368_v29 = vpop.permute.xlu0 %846 }
  0x9f   : > { %v3370_v30 = vpop.permute.xlu1 %1001 }
  0xa0   : > { %4420 = vst [vmem:[#allocation3_spill] sm:$0xff] %v3370_v30  ;;  %v3378_v32 = vpop.permute.xlu0 %851 }
  0xa3   : > { %v3380_v34 = vpop.permute.xlu1 %1006 }
  0xa4   : > { %4421 = vst [vmem:[#allocation4_spill] sm:$0xff] %v3380_v34  ;;  %v3390_v37 = vpop.permute.xlu0 %856 }
  0xa7   : > { %v3392_v39 = vpop.permute.xlu1 %1011 }
  0xa8   : > { %4422 = vst [vmem:[#allocation5_spill] sm:$0xff] %v3392_v39  ;;  %v3402_v42 = vpop.permute.xlu0 %861 }
  0xa9   : > { %4423 = vst [vmem:[#allocation6_spill] sm:$0xff] %v3402_v42 }
  0xab   : > { %v3412_v46 = vpop.permute.xlu1 %1016 }
  0xac   : > { %4424 = vst [vmem:[#allocation7_spill] sm:$0xff] %v3412_v46  ;;  %v3414_v47 = vpop.permute.xlu0 %866 }
  0xad   : > { %4425 = vst [vmem:[#allocation8_spill] sm:$0xff] %v3414_v47 }
  0xaf   : > { %v3426_v53 = vpop.permute.xlu1 %1021 }
  0xb0   : > { %v3424_v51 = vpop.permute.xlu0 %871  ;;  %4427 = vst [vmem:[#allocation10_spill] sm:$0xff] %v3426_v53 }
  0xb1   : > { %4426 = vst [vmem:[#allocation9_spill] sm:$0xff] %v3424_v51 }
  0xb3   : > { %v3446_v60 = vpop.permute.xlu1 %1026 }
  0xb4   : > { %v3436_v57 = vpop.permute.xlu0 %876  ;;  %4429 = vst [vmem:[#allocation12_spill] sm:$0xff] %v3446_v60 }
  0xb5   : > { %4428 = vst [vmem:[#allocation11_spill] sm:$0xff] %v3436_v57 }
  0xb7   : > { %v3458_v2 = vpop.permute.xlu1 %1031 }
  0xb8   : > { %v3456_v0 = vpop.permute.xlu0 %881  ;;  %4431 = vst [vmem:[#allocation14_spill] sm:$0xff] %v3458_v2 }
  0xb9   : > { %4430 = vst [vmem:[#allocation13_spill] sm:$0xff] %v3456_v0 }
  0xbb   : > { %v3462_v5 = vpop.permute.xlu1 %1036 }
  0xbc   : > { %v3460_v4 = vpop.permute.xlu0 %886  ;;  %4433 = vst [vmem:[#allocation16_spill] sm:$0xff] %v3462_v5 }
  0xbd   : > { %4432 = vst [vmem:[#allocation15_spill] sm:$0xff] %v3460_v4 }
  0xbf   : > { %v3466_v8 = vpop.permute.xlu1 %1041 }
  0xc0   : > { %v3464_v7 = vpop.permute.xlu0 %891  ;;  %4435 = vst [vmem:[#allocation18_spill] sm:$0xff] %v3466_v8 }
  0xc1   : > { %4434 = vst [vmem:[#allocation17_spill] sm:$0xff] %v3464_v7 }
  0xc3   : > { %v3470_v10 = vpop.permute.xlu1 %1046 }
  0xc4   : > { %v3468_v9 = vpop.permute.xlu0 %896  ;;  %4437 = vst [vmem:[#allocation20_spill] sm:$0xff] %v3470_v10 }
  0xc5   : > { %4436 = vst [vmem:[#allocation19_spill] sm:$0xff] %v3468_v9 }
  0xc7   : > { %v3474_v11 = vpop.permute.xlu1 %1051 }
  0xc8   : > { %v3472_v3 = vpop.permute.xlu0 %901  ;;  %4439 = vst [vmem:[#allocation22_spill] sm:$0xff] %v3474_v11 }
  0xc9   : > { %4438 = vst [vmem:[#allocation21_spill] sm:$0xff] %v3472_v3 }
  0xcb   : > { %v3478_v13 = vpop.permute.xlu1 %1056 }
  0xcc   : > { %v3476_v12 = vpop.permute.xlu0 %906  ;;  %4441 = vst [vmem:[#allocation24_spill] sm:$0xff] %v3478_v13 }
  0xcd   : > { %4440 = vst [vmem:[#allocation23_spill] sm:$0xff] %v3476_v12 }
  0xcf   : > { %v3482_v15 = vpop.permute.xlu1 %1061 }
  0xd0   : > { %v3480_v14 = vpop.permute.xlu0 %911  ;;  %4443 = vst [vmem:[#allocation26_spill] sm:$0xff] %v3482_v15  ;;  %v1509_v15 = vsub.s32 4, %v3499_v43 }
  0xd1   : > { %4442 = vst [vmem:[#allocation25_spill] sm:$0xff] %v3480_v14 }
  0xd3   : > { %v3486_v17 = vpop.permute.xlu1 %1066 }
  0xd4   : > { %v3484_v16 = vpop.permute.xlu0 %916  ;;  %4445 = vst [vmem:[#allocation28_spill] sm:$0xff] %v3486_v17 }
  0xd5   : > { %4444 = vst [vmem:[#allocation27_spill] sm:$0xff] %v3484_v16 }
  0xd7   : > { %v3496_v33 = vpop.permute.xlu1 %1071 }
  0xd8   : > { %v3494_v6 = vpop.permute.xlu0 %921  ;;  %4447 = vst [vmem:[#allocation30_spill] sm:$0xff] %v3496_v33  ;;  %v1695_v33 = vsub.s32 6, %v3499_v43 }
  0xd9   : > { %4446 = vst [vmem:[#allocation29_spill] sm:$0xff] %v3494_v6  ;;  %v1591_v6 = vsub.s32 5, %v3499_v43 }
  0xdb   : > { %v3504_v50 = vpop.permute.xlu1 %926 }
  0xdc   : > { %v3501_v44 = vpop.permute.xlu0 %816  ;;  %4448 = vst [vmem:[#allocation31_spill] sm:$0xff] %v3504_v50 }
  0xe0   : > { %v3519_v1 = vpop.permute.xlu0 %966 }
  0xea   : > { %v511_v19 = vpop.f32.mrb[0].mxu0 }
  0xeb   : > { %v512_v20 = vadd.f32 %v3491_v18, %v511_v19  ;;  %v2602_v21 = vpop.f32.mrb[1].mxu0 }
  0xec   : > { %v3522_v21 = vrot.slane %v3511_v59, %v1143_v54 }
  0xed   : > { %v660_v31 = vmul.f32 0.70710677, %v512_v20 }
  0xee   : > { %v516_v35 = vpop.f32.mrb[2].mxu0 }
  0xef   : > { %2843 = verf.f32 %v660_v31  ;;  %v517_v38 = vadd.f32 %v3491_v18, %v516_v35  ;;  %v2605_v40 = vpop.f32.mrb[3].mxu0  ;;  %v1116_v31 = vmul.f32 %v1091_v56, %v3501_v44  ;;  %v1195_v35 = vld [vmem:[#allocation2 + $0x2] sm:$0xff] }
  0xf0   : > { %v1224_v56 = vmul.f32 %v3517_v63, %v1195_v35 }
  0xf1   : > { %v661_v41 = vmul.f32 0.70710677, %v517_v38  ;;  %v1145_v17 = vmul.f32 %v3522_v21, %v1116_v31 }
  0xf2   : > { %v521_v45 = vpop.f32.mrb[4].mxu0 }
  0xf3   : > { %2845 = verf.f32 %v661_v41  ;;  %v522_v48 = vadd.f32 %v3491_v18, %v521_v45  ;;  %v2608_v49 = vpop.f32.mrb[5].mxu0  ;;  %v635_v41 = vmul.f32 0.5, %v512_v20  ;;  %v3538_v20 = vrot.slane %v3511_v59, %v1326_v36 }
  0xf4   : > { %v3527_v49 = vpop.permute.xlu1 %1076  ;;  %v1249_v14 = vadd.f32 %v1224_v56, %v1145_v17  ;;  %v3568_v17 = vrot.slane %v3511_v59, %v1509_v15  ;;  %v3571_v56 = vrot.slane %v3511_v59, %v1591_v6 }
  0xf5   : > { %v662_v55 = vmul.f32 0.70710677, %v522_v48  ;;  %4449 = vst [vmem:[#allocation32_spill] sm:$0xff] %v3527_v49  ;;  %v1430_v49 = vsub.s32 3, %v3499_v43 }
  0xf6   : > { %v526_v58 = vpop.f32.mrb[6].mxu0 }
  0xf7   : > { %2847 = verf.f32 %v662_v55  ;;  %v3514_v61 = vadd.f32 %v3491_v18, %v526_v58  ;;  %v2611_v62 = vpop.f32.mrb[7].mxu0  ;;  %v1274_v55 = vld [vmem:[#allocation2 + $0x3] sm:$0xff] }
  0xf8   : > { %v3557_v13 = vpop.permute.xlu1 %931 }
  0xf9   : > { %v2844_v19 = vpop.eup %2843  ;;  %v663_v40 = vmul.f32 0.70710677, %v3514_v61  ;;  %4450 = vst [vmem:[#allocation33_spill] sm:$0xff] %v3557_v13  ;;  %v638_v6 = vmul.f32 0.5, %v3514_v61 }
  0xfa   : > { %v710_v45 = vadd.f32 1.0, %v2844_v19  ;;  %v531_v52 = vpop.f32.mrb[8].mxu0  ;;  %v1299_v19 = vmul.f32 %v1274_v55, %v3519_v1 }
  0xfb   : > { %2849 = verf.f32 %v663_v40  ;;  %v3530_v58 = vadd.f32 %v3491_v18, %v531_v52  ;;  %v2614_v62 = vpop.f32.mrb[9].mxu0  ;;  %v636_v52 = vmul.f32 0.5, %v517_v38  ;;  %v3554_v38 = vrot.slane %v3511_v59, %v1695_v33 }
  0xfc   : > { %v3532_v54 = vmul.f32 %v710_v45, %v635_v41  ;;  %v1666_v41 = vld [vmem:[#allocation2 + $0xd5] sm:$0xff]  ;;  %v3543_v45 = vpop.permute.xlu0 %821  ;;  %v1328_v11 = vmul.f32 %v3538_v20, %v1299_v19  ;;  %v3584_v3 = vpop.permute.xlu1 %1081 }
  0xfd   : > { %v2846_v50 = vpop.eup %2845  ;;  %v664_v40 = vmul.f32 0.70710677, %v3530_v58  ;;  %v1827_v19 = vld [vmem:[#allocation2 + $0xd7] sm:$0xff]  ;;  %4452 = vst [vmem:[#allocation35_spill] sm:$0xff] %v3584_v3 }
  0xfe   : > { %764 = vst [vmem:[#allocation2 + $0x10] sm:$0xff] %v3532_v54  ;;  %v711_v62 = vadd.f32 1.0, %v2846_v50  ;;  %v536_v35 = vpop.f32.mrb[10].mxu0  ;;  %v1774_v50 = vsub.s32 7, %v3499_v43  ;;  %v3565_v43 = vrot.slane %v3511_v59, %v1430_v49  ;;  %v1511_v2 = vmul.f32 %v3568_v17, %v3532_v54 }
  0xff   : > { %2851 = verf.f32 %v664_v40  ;;  %v3548_v31 = vadd.f32 %v3491_v18, %v536_v35  ;;  %v2617_v36 = vpop.f32.mrb[11].mxu0  ;;  %v1691_v40 = vmul.f32 %v1666_v41, %v3557_v13 }
 0x100   : > { %v3550_v55 = vmul.f32 %v711_v62, %v636_v52  ;;  %v637_v52 = vmul.f32 0.5, %v522_v48  ;;  %v3573_v41 = vpop.permute.xlu0 %971 }
 0x101   : > { %v2848_v16 = vpop.eup %2847  ;;  %v665_v35 = vmul.f32 0.70710677, %v3548_v31 }
 0x102   : > { %765 = vst [vmem:[#allocation2 + $0x18] sm:$0xff] %v3550_v55  ;;  %v712_v62 = vadd.f32 1.0, %v2848_v16  ;;  %v541_v36 = vpop.f32.mrb[12].mxu0  ;;  %v1512_v54 = vmul.f32 %v3568_v17, %v3550_v55 }
 0x103   : > { %2853 = verf.f32 %v665_v35  ;;  %v542_v33 = vadd.f32 %v3491_v18, %v541_v36  ;;  %v2620_v10 = vpop.f32.mrb[13].mxu0  ;;  %v3576_v35 = vrot.slane %v3511_v59, %v1774_v50  ;;  %v1353_v36 = vadd.f32 %v1328_v11, %v1249_v14 }
 0x104   : > { %v737_v12 = vmul.f32 %v712_v62, %v637_v52  ;;  %v3579_v10 = vmul.f32 %v3554_v38, %v1691_v40  ;;  %v3588_v14 = vmul.f32 %v1827_v19, %v3584_v3  ;;  %v639_v19 = vmul.f32 0.5, %v3530_v58 }
 0x105   : > { %v2850_v48 = vpop.eup %2849  ;;  %v1378_v16 = vld [vmem:[#allocation2 + $0xf] sm:$0xff]  ;;  %v666_v62 = vmul.f32 0.70710677, %v542_v33  ;;  %v640_v58 = vmul.f32 0.5, %v3548_v31 }
 0x106   : > { %4451 = vst [vmem:[#allocation34_spill] sm:$0xff] %v3579_v10  ;;  %v1092_v49 = vld [vmem:[#allocation2 + $0x9] sm:$0xff]  ;;  %v1403_v15 = vmul.f32 %v1378_v16, %v3501_v44  ;;  %766 = vst [vmem:[#allocation2 + $0x20] sm:$0xff] %v737_v12  ;;  %v713_v13 = vadd.f32 1.0, %v2850_v48  ;;  %v546_v59 = vpop.f32.mrb[14].mxu0  ;;  %v3615_v55 = vmul.f32 %v3568_v17, %v737_v12 }
 0x107   : > { %v1196_v52 = vld [vmem:[#allocation2 + $0xa] sm:$0xff]  ;;  %v1117_v8 = vmul.f32 %v1092_v49, %v3543_v45  ;;  %4453 = vst [vmem:[#allocation36_spill] sm:$0xff] %v3588_v14  ;;  %v547_v40 = vadd.f32 %v3491_v18, %v546_v59  ;;  %v2623_v16 = vpop.f32.mrb[15].mxu0  ;;  %2855 = verf.f32 %v666_v62 }
 0x108   : > { %v1275_v5 = vld [vmem:[#allocation2 + $0xb] sm:$0xff]  ;;  %v1225_v11 = vmul.f32 %v3517_v63, %v1196_v52  ;;  %v1432_v10 = vmul.f32 %v3565_v43, %v1403_v15  ;;  %v738_v61 = vmul.f32 %v713_v13, %v638_v6 }
 0x109   : > { %v1300_v50 = vmul.f32 %v1275_v5, %v3573_v41  ;;  %v1146_v48 = vmul.f32 %v3522_v21, %v1117_v8  ;;  %v2852_v49 = vpop.eup %2851  ;;  %v1093_v9 = vld [vmem:[#allocation2 + $0x11] sm:$0xff]  ;;  %v667_v5 = vmul.f32 0.70710677, %v547_v40  ;;  %v3600_v8 = vpop.permute.xlu0 %826  ;;  %v3617_v31 = vmul.f32 0.5, %v547_v40 }
 0x10a   : > { %v1379_v52 = vld [vmem:[#allocation2 + $0x17] sm:$0xff]  ;;  %v1457_v3 = vadd.f32 %v1432_v10, %v1353_v36  ;;  %v1564_v59 = vmul.f32 %v1093_v9, %v3519_v1  ;;  %767 = vst [vmem:[#allocation2 + $0x28] sm:$0xff] %v738_v61  ;;  %v3602_v62 = vpop.f32.mrb[16].mxu0  ;;  %v714_v6 = vadd.f32 1.0, %v2852_v49  ;;  %v3612_v49 = vmul.f32 0.5, %v542_v33 }
 0x10b   : > { %v1329_v14 = vmul.f32 %v3538_v20, %v1300_v50  ;;  %v1250_v15 = vadd.f32 %v1225_v11, %v1146_v48  ;;  %v1404_v13 = vmul.f32 %v1379_v52, %v3543_v45  ;;  %v1118_v50 = vmul.f32 %v1093_v9, %v3600_v8  ;;  %v2626_v16 = vpop.f32.mrb[17].mxu0 }
 0x10c   : > { %v1536_v36 = vadd.f32 %v1511_v2, %v1457_v3  ;;  %v1593_v10 = vmul.f32 %v3571_v56, %v1564_v59  ;;  %v3610_v0 = vmul.f32 %v714_v6, %v639_v19  ;;  %2857 = verf.f32 %v667_v5 }
 0x10d   : > { %v1433_v11 = vmul.f32 %v3565_v43, %v1404_v13  ;;  %v1354_v48 = vadd.f32 %v1329_v14, %v1250_v15  ;;  %v2854_v52 = vpop.eup %2853  ;;  %v1380_v7 = vld [vmem:[#allocation2 + $0x1f] sm:$0xff]  ;;  %v3621_v14 = vmul.f32 %v3568_v17, %v738_v61  ;;  %v3624_v15 = vmul.f32 %v3522_v21, %v1118_v50 }
 0x10e   : > { %v1643_v60 = vld [vmem:[#allocation2 + $0x1d] sm:$0xff]  ;;  %v3626_v19 = vpop.f32.mrb[18].mxu0  ;;  %v1829_v33 = vmul.f32 %v1380_v7, %v3519_v1  ;;  %768 = vst [vmem:[#allocation2 + $0x30] sm:$0xff] %v3610_v0  ;;  %v1618_v13 = vadd.f32 %v1593_v10, %v1536_v36  ;;  %v715_v50 = vadd.f32 1.0, %v2854_v52  ;;  %v1197_v52 = vld [vmem:[#allocation2 + $0x12] sm:$0xff] }
 0x10f   : > { %v1747_v4 = vld [vmem:[#allocation2 + $0x1e] sm:$0xff]  ;;  %v1668_v2 = vmul.f32 %v1643_v60, %v3501_v44  ;;  %v1458_v44 = vadd.f32 %v1433_v11, %v1354_v48  ;;  %v2629_v40 = vpop.f32.mrb[19].mxu0  ;;  %v3640_v11 = vld [vmem:[%s4378_s3 + $0x8] ss:$0 sm:$0xff] }
 0x110   : > { %v1094_v9 = vld [vmem:[#allocation2 + $0x19] sm:$0xff]  ;;  %v1776_v5 = vmul.f32 %v3576_v35, %v1747_v4 }
 0x111   : > { %v1198_v3 = vld [vmem:[#allocation2 + $0x1a] sm:$0xff]  ;;  %v1119_v12 = vmul.f32 %v1094_v9, %v3356_v23  ;;  %v1697_v61 = vmul.f32 %v3554_v38, %v1668_v2  ;;  %v1565_v6 = vmul.f32 %v1094_v9, %v3573_v41  ;;  %v1644_v16 = vld [vmem:[#allocation2 + $0x25] sm:$0xff]  ;;  %v1537_v46 = vadd.f32 %v1512_v54, %v1458_v44  ;;  %v2856_v39 = vpop.eup %2855 }
 0x112   : > { %v1277_v59 = vld [vmem:[#allocation2 + $0x1b] sm:$0xff]  ;;  %v1227_v1 = vmul.f32 %v3517_v63, %v1198_v3  ;;  %v1381_v57 = vld [vmem:[#allocation2 + $0x27] sm:$0xff]  ;;  %v1669_v10 = vmul.f32 %v1644_v16, %v3543_v45  ;;  %v3645_v2 = vpop.f32.mrb[20].mxu0  ;;  %v1858_v9 = vmul.f32 %v3640_v11, %v1829_v33 }
 0x113   : > { %v1302_v60 = vmul.f32 %v1277_v59, %v3360_v25  ;;  %v1148_v53 = vmul.f32 %v3522_v21, %v1119_v12  ;;  %v1722_v36 = vadd.f32 %v1697_v61, %v1618_v13  ;;  %v1406_v48 = vmul.f32 %v1381_v57, %v3356_v23  ;;  %v1748_v59 = vld [vmem:[#allocation2 + $0x26] sm:$0xff]  ;;  %v2632_v44 = vpop.f32.mrb[21].mxu0 }
 0x114   : > { %v1594_v4 = vmul.f32 %v3571_v56, %v1565_v6  ;;  %v3649_v12 = vmul.f32 %v715_v50, %v640_v58  ;;  %v1698_v13 = vmul.f32 %v3554_v38, %v1669_v10  ;;  %v1095_v16 = vld [vmem:[#allocation2 + $0x21] sm:$0xff]  ;;  %v3656_v6 = vld [vmem:[%s4379_s4] ss:$0 sm:$0xff]  ;;  %v1226_v58 = vmul.f32 %v3517_v63, %v1197_v52  ;;  %v1276_v50 = vld [vmem:[#allocation2 + $0x13] sm:$0xff]  ;;  %v977_v52 = vpop.permute.xlu0 %976 }
 0x115   : > { %v1252_v3 = vadd.f32 %v1227_v1, %v1148_v53  ;;  %v1331_v54 = vmul.f32 %v3538_v20, %v1302_v60  ;;  %v1801_v40 = vadd.f32 %v1776_v5, %v1722_v36  ;;  %v1435_v45 = vmul.f32 %v3565_v43, %v1406_v48  ;;  %v1096_v1 = vld [vmem:[#allocation2 + $0x29] sm:$0xff] }
 0x116   : > { %v1619_v61 = vadd.f32 %v1594_v4, %v1537_v46  ;;  %v1830_v53 = vmul.f32 %v1381_v57, %v3573_v41  ;;  %769 = vst [vmem:[#allocation2 + $0x38] sm:$0xff] %v3649_v12  ;;  %v716_v60 = vadd.f32 1.0, %v2856_v39  ;;  %v1777_v46 = vmul.f32 %v3576_v35, %v1748_v59  ;;  %v1645_v48 = vld [vmem:[#allocation2 + $0x2d] sm:$0xff]  ;;  %v1199_v4 = vld [vmem:[#allocation2 + $0x22] sm:$0xff]  ;;  %v3663_v44 = vpop.f32.mrb[22].mxu0 }
 0x117   : > { %v1356_v33 = vadd.f32 %v1331_v54, %v1252_v3  ;;  %v1883_v5 = vadd.f32 %v1858_v9, %v1801_v40  ;;  %v1405_v10 = vmul.f32 %v1380_v7, %v3600_v8  ;;  %v1121_v3 = vmul.f32 %v1096_v1, %v3364_v27  ;;  %v1200_v57 = vld [vmem:[#allocation2 + $0x2a] sm:$0xff]  ;;  %v2635_v9 = vpop.f32.mrb[23].mxu0  ;;  %v2858_v40 = vpop.eup %2857 }
 0x118   : > { %v1723_v36 = vadd.f32 %v1698_v13, %v1619_v61  ;;  %v1567_v54 = vmul.f32 %v1096_v1, %v3360_v25  ;;  %v1120_v39 = vmul.f32 %v1095_v16, %v3354_v22  ;;  %v1251_v7 = vadd.f32 %v1226_v58, %v3624_v15  ;;  %v1278_v61 = vld [vmem:[#allocation2 + $0x23] sm:$0xff]  ;;  %v1382_v1 = vld [vmem:[#allocation2 + $0x2f] sm:$0xff] }
 0x119   : > { %v1460_v41 = vadd.f32 %v1435_v45, %v1356_v33  ;;  %v1915_v13 = vadd.f32 %v3656_v6, %v1883_v5  ;;  %v1301_v51 = vmul.f32 %v1276_v50, %v977_v52  ;;  %v1859_v47 = vmul.f32 %v3640_v11, %v1830_v53 }
 0x11a   : > { %v1802_v59 = vadd.f32 %v1777_v46, %v1723_v36  ;;  %v1670_v34 = vmul.f32 %v1645_v48, %v3600_v8  ;;  %v3673_v45 = vmul.f32 %v716_v60, %v3612_v49  ;;  %v1228_v33 = vmul.f32 %v3517_v63, %v1199_v4  ;;  %v571_v15 = vpop.f32.mrb[24].mxu0 }
 0x11b   : > { %v1965_v42 = vmul.f32 0.70710677, %v1915_v13  ;;  %v1150_v9 = vmul.f32 %v3522_v21, %v1121_v3  ;;  %v1229_v5 = vmul.f32 %v3517_v63, %v1200_v57  ;;  %v1434_v36 = vmul.f32 %v3565_v43, %v1405_v10  ;;  %v2638_v60 = vpop.f32.mrb[25].mxu0 }
 0x11c   : > { %4454 = vst [vmem:[#allocation37_spill] sm:$0xff] %v3673_v45  ;;  %v1539_v58 = vadd.f32 %v3621_v14, %v1460_v41  ;;  %v1596_v53 = vmul.f32 %v3571_v56, %v1567_v54  ;;  %770 = vst [vmem:[#allocation2 + $0x40] sm:$0xff] %v3673_v45  ;;  %v1149_v8 = vmul.f32 %v3522_v21, %v1120_v39  ;;  %v3684_v50 = vmul.f32 0.5, %v1915_v13 }
 0x11d   : > { %v1303_v49 = vmul.f32 %v1278_v61, %v3358_v24  ;;  %v3686_v46 = vadd.f32 %v1859_v47, %v1802_v59  ;;  %v1097_v48 = vld [vmem:[#allocation2 + $0x31] sm:$0xff]  ;;  %v1330_v4 = vmul.f32 %v3538_v20, %v1301_v51  ;;  %v1407_v10 = vmul.f32 %v1382_v1, %v3354_v22 }
 0x11e   : > { %v1699_v14 = vmul.f32 %v3554_v38, %v1670_v34  ;;  %v1122_v3 = vmul.f32 %v1097_v48, %v3368_v29  ;;  %v1253_v57 = vadd.f32 %v1228_v33, %v1149_v8  ;;  %2859 = verf.f32 %v1965_v42  ;;  %v1201_v54 = vld [vmem:[#allocation2 + $0x32] sm:$0xff]  ;;  %v576_v47 = vpop.f32.mrb[26].mxu0 }
 0x11f   : > { %v1332_v41 = vmul.f32 %v3538_v20, %v1303_v49  ;;  %v1355_v39 = vadd.f32 %v1330_v4, %v1251_v7  ;;  %v1436_v13 = vmul.f32 %v3565_v43, %v1407_v10  ;;  %v1566_v61 = vmul.f32 %v1095_v16, %v977_v52  ;;  %v2641_v34 = vpop.f32.mrb[27].mxu0  ;;  %v1749_v42 = vld [vmem:[#allocation2 + $0x2e] sm:$0xff] }
 0x120   : > { %v3694_v59 = vadd.f32 %v1229_v5, %v1150_v9  ;;  %v3696_v60 = vadd.f32 %v1596_v53, %v1539_v58  ;;  %v1568_v30 = vmul.f32 %v1097_v48, %v3358_v24  ;;  %v1151_v45 = vmul.f32 %v3522_v21, %v1122_v3 }
 0x121   : > { %v1357_v51 = vadd.f32 %v1332_v41, %v1253_v57  ;;  %v1459_v33 = vadd.f32 %v1434_v36, %v1355_v39  ;;  %v1595_v8 = vmul.f32 %v3571_v56, %v1566_v61  ;;  %v717_v49 = vadd.f32 1.0, %v2858_v40 }
 0x122   : > { %v1230_v7 = vmul.f32 %v3517_v63, %v1201_v54  ;;  %v1831_v16 = vmul.f32 %v1382_v1, %v977_v52  ;;  %v552_v9 = vadd.f32 %v3491_v18, %v3602_v62  ;;  %v557_v36 = vadd.f32 %v3491_v18, %v3626_v19  ;;  %v581_v40 = vpop.f32.mrb[28].mxu0 }
 0x123   : > { %v1461_v4 = vadd.f32 %v1436_v13, %v1357_v51  ;;  %v1538_v5 = vadd.f32 %v3615_v55, %v1459_v33  ;;  %v1647_v58 = vld [vmem:[#allocation2 + $0x3d] sm:$0xff]  ;;  %v3706_v53 = vmul.f32 %v717_v49, %v3617_v31  ;;  %v562_v48 = vadd.f32 %v3491_v18, %v3645_v2  ;;  %v2644_v55 = vpop.f32.mrb[29].mxu0 }
 0x124   : > { %v1515_v10 = vmul.f32 %v3568_v17, %v3610_v0  ;;  %v1597_v52 = vmul.f32 %v3571_v56, %v1568_v30  ;;  %v1778_v62 = vmul.f32 %v3576_v35, %v1749_v42  ;;  %v668_v1 = vmul.f32 0.70710677, %v552_v9 }
 0x125   : > { %v3716_v3 = vadd.f32 %v1230_v7, %v1151_v45  ;;  %v1620_v31 = vadd.f32 %v1595_v8, %v1538_v5  ;;  %v1672_v57 = vmul.f32 %v1647_v58, %v3354_v22  ;;  %771 = vst [vmem:[#allocation2 + $0x48] sm:$0xff] %v3706_v53  ;;  %v669_v19 = vmul.f32 0.70710677, %v557_v36 }
 0x126   : > { %v1540_v41 = vadd.f32 %v1515_v10, %v1461_v4  ;;  %v1860_v2 = vmul.f32 %v3640_v11, %v1831_v16  ;;  %2861 = verf.f32 %v668_v1  ;;  %v670_v54 = vmul.f32 0.70710677, %v562_v48  ;;  %v586_v45 = vpop.f32.mrb[30].mxu0 }
 0x127   : > { %v1724_v0 = vadd.f32 %v1699_v14, %v1620_v31  ;;  %2863 = verf.f32 %v669_v19  ;;  %v567_v30 = vadd.f32 %v3491_v18, %v3663_v44  ;;  %v572_v39 = vadd.f32 %v3491_v18, %v571_v15  ;;  %v2647_v51 = vpop.f32.mrb[31].mxu0  ;;  %v1646_v31 = vld [vmem:[#allocation2 + $0x35] sm:$0xff] }
 0x128   : > { %v643_v13 = vmul.f32 0.5, %v552_v9  ;;  %2865 = verf.f32 %v670_v54  ;;  %v577_v22 = vadd.f32 %v3491_v18, %v576_v47  ;;  %v582_v61 = vadd.f32 %v3491_v18, %v581_v40  ;;  %v2860_v34 = vpop.eup %2859 }
 0x129   : > { %v1701_v33 = vmul.f32 %v3554_v38, %v1672_v57  ;;  %v1803_v8 = vadd.f32 %v1778_v62, %v1724_v0  ;;  %v644_v42 = vmul.f32 0.5, %v557_v36  ;;  %v671_v14 = vmul.f32 0.70710677, %v567_v30 }
 0x12a   : > { %v1622_v49 = vadd.f32 %v1597_v52, %v1540_v41  ;;  %v645_v7 = vmul.f32 0.5, %v562_v48  ;;  %v672_v4 = vmul.f32 0.70710677, %v572_v39  ;;  %v673_v44 = vmul.f32 0.70710677, %v577_v22  ;;  %v591_v5 = vpop.f32.mrb[32].mxu0 }
 0x12b   : > { %v1885_v16 = vadd.f32 %v1860_v2, %v1803_v8  ;;  %2867 = verf.f32 %v671_v14  ;;  %v674_v15 = vmul.f32 0.70710677, %v582_v61  ;;  %v587_v9 = vadd.f32 %v3491_v18, %v586_v45  ;;  %v2650_v58 = vpop.f32.mrb[33].mxu0 }
 0x12c   : > { %2869 = verf.f32 %v672_v4  ;;  %v592_v47 = vadd.f32 %v3491_v18, %v591_v5  ;;  %v2015_v40 = vadd.f32 1.0, %v2860_v34  ;;  %v1916_v10 = vadd.f32 %v3656_v6, %v3686_v46  ;;  %v1750_v4 = vld [vmem:[#allocation2 + $0x36] sm:$0xff] }
 0x12d   : > { %v3731_v36 = vadd.f32 %v1701_v33, %v1622_v49  ;;  %v1917_v48 = vadd.f32 %v3656_v6, %v1885_v16  ;;  %2871 = verf.f32 %v673_v44  ;;  %v675_v52 = vmul.f32 0.70710677, %v587_v9 }
 0x12e   : > { %v3734_v62 = vmul.f32 0.5, %v567_v30  ;;  %2873 = verf.f32 %v674_v15  ;;  %v676_v1 = vmul.f32 0.70710677, %v592_v47  ;;  %v2040_v55 = vmul.f32 %v2015_v40, %v3684_v50  ;;  %v596_v41 = vpop.f32.mrb[34].mxu0 }
 0x12f   : > { %v3737_v57 = vmul.f32 0.5, %v572_v39  ;;  %v3739_v19 = vmul.f32 0.5, %v577_v22  ;;  %2875 = verf.f32 %v675_v52  ;;  %v1966_v46 = vmul.f32 0.70710677, %v1916_v10  ;;  %v2653_v30 = vpop.f32.mrb[35].mxu0  ;;  %v3746_v39 = vld [vmem:[#allocation2] sm:$0xff] }
 0x130   : > { %v2862_v2 = vpop.eup %2861  ;;  %v3741_v54 = vmul.f32 0.5, %v582_v61  ;;  %2877 = verf.f32 %v676_v1  ;;  %2708 = vmatmul.mubr.f32.vlgmr.msra.gmra.mrb[50].mxu0 %v2040_v55  ;;  %v597_v0 = vadd.f32 %v3491_v18, %v596_v41  ;;  %v1967_v45 = vmul.f32 0.70710677, %v1917_v48  ;;  %v1383_v22 = vld [vmem:[#allocation2 + $0x37] sm:$0xff]  ;;  %v1384_v30 = vld [vmem:[#allocation2 + $0x3f] sm:$0xff] }
 0x131   : > { %v2864_v51 = vpop.eup %2863  ;;  %v718_v34 = vadd.f32 1.0, %v2862_v2  ;;  %v3744_v50 = vmul.f32 0.5, %v587_v9  ;;  %2710 = vmatprep.mubr.msk.f32.mxu0 %vm3009_vm0, %v3746_v39  ;;  %2879 = verf.f32 %v1966_v46  ;;  %v1671_v61 = vmul.f32 %v1646_v31, %v3356_v23  ;;  %v1751_v52 = vld [vmem:[#allocation2 + $0x3e] sm:$0xff] }
 0x132   : > { %v2866_v33 = vpop.eup %2865  ;;  %v719_v8 = vadd.f32 1.0, %v2864_v51  ;;  %v3751_v14 = vmul.f32 0.5, %v592_v47  ;;  %v677_v49 = vmul.f32 0.70710677, %v597_v0  ;;  %2881 = verf.f32 %v1967_v45  ;;  %v601_v9 = vpop.f32.mrb[36].mxu0 }
 0x133   : > { %v3753_v44 = vmul.f32 %v718_v34, %v643_v13  ;;  %v720_v16 = vadd.f32 1.0, %v2866_v33  ;;  %v3755_v15 = vmul.f32 0.5, %v1916_v10  ;;  %v1700_v5 = vmul.f32 %v3554_v38, %v1671_v61  ;;  %v2656_v40 = vpop.f32.mrb[37].mxu0 }
 0x134   : > { %v3758_v58 = vmul.f32 %v719_v8, %v644_v42  ;;  %2883 = verf.f32 %v677_v49  ;;  %v3761_v23 = vadd.f32 %v3491_v18, %v601_v9  ;;  %v1832_v47 = vmul.f32 %v1383_v22, %v3360_v25 }
 0x135   : > { %v2868_v1 = vpop.eup %2867  ;;  %772 = vst [vmem:[#allocation2 + $0x50] sm:$0xff] %v3753_v44  ;;  %v3765_v13 = vmul.f32 %v720_v16, %v645_v7  ;;  %v3767_v10 = vmul.f32 0.5, %v1917_v48  ;;  %v1725_v55 = vadd.f32 %v1700_v5, %v3696_v60  ;;  %v1779_v42 = vmul.f32 %v3576_v35, %v1750_v4 }
 0x136   : > { %v2870_v31 = vpop.eup %2869  ;;  %773 = vst [vmem:[#allocation2 + $0x58] sm:$0xff] %v3758_v58  ;;  %v721_v41 = vadd.f32 1.0, %v2868_v1  ;;  %v3772_v46 = vmul.f32 0.5, %v597_v0  ;;  %v678_v25 = vmul.f32 0.70710677, %v3761_v23  ;;  %v1408_v2 = vmul.f32 %v1383_v22, %v3364_v27  ;;  %v606_v48 = vpop.f32.mrb[38].mxu0 }
 0x137   : > { %v2872_v45 = vpop.eup %2871  ;;  %774 = vst [vmem:[#allocation2 + $0x60] sm:$0xff] %v3765_v13  ;;  %v722_v7 = vadd.f32 1.0, %v2870_v31  ;;  %v1804_v51 = vadd.f32 %v1779_v42, %v1725_v55  ;;  %v1861_v60 = vmul.f32 %v3640_v11, %v1832_v47  ;;  %v1780_v34 = vmul.f32 %v3576_v35, %v1751_v52  ;;  %v2659_v22 = vpop.f32.mrb[39].mxu0 }
 0x138   : > { %v2874_v61 = vpop.eup %2873  ;;  %v3780_v33 = vmul.f32 %v721_v41, %v3734_v62  ;;  %v723_v0 = vadd.f32 1.0, %v2872_v45  ;;  %2885 = verf.f32 %v678_v25  ;;  %v607_v8 = vadd.f32 %v3491_v18, %v606_v48  ;;  %v1098_v48 = vld [vmem:[#allocation2 + $0x39] sm:$0xff] }
 0x139   : > { %v2876_v49 = vpop.eup %2875  ;;  %v3784_v4 = vmul.f32 %v722_v7, %v3737_v57  ;;  %v724_v16 = vadd.f32 1.0, %v2874_v61  ;;  %v1886_v9 = vadd.f32 %v1861_v60, %v1804_v51  ;;  %v1833_v5 = vmul.f32 %v1384_v30, %v3358_v24  ;;  %v1279_v61 = vld [vmem:[#allocation2 + $0x2b] sm:$0xff] }
 0x13a   : > { %v2878_v40 = vpop.eup %2877  ;;  %775 = vst [vmem:[#allocation2 + $0x68] sm:$0xff] %v3780_v33  ;;  %v3789_v47 = vmul.f32 %v723_v0, %v3739_v19  ;;  %v725_v62 = vadd.f32 1.0, %v2876_v49  ;;  %v679_v52 = vmul.f32 0.70710677, %v607_v8  ;;  %v1805_v1 = vadd.f32 %v1780_v34, %v3731_v36  ;;  %v611_v41 = vpop.f32.mrb[40].mxu0 }
 0x13b   : > { %v2880_v55 = vpop.eup %2879  ;;  %776 = vst [vmem:[#allocation2 + $0x70] sm:$0xff] %v3784_v4  ;;  %v749_v57 = vmul.f32 %v724_v16, %v3741_v54  ;;  %v726_v42 = vadd.f32 1.0, %v2878_v40  ;;  %v1918_v31 = vadd.f32 %v3656_v6, %v1886_v9  ;;  %v1862_v24 = vmul.f32 %v3640_v11, %v1833_v5  ;;  %v2662_v7 = vpop.f32.mrb[41].mxu0 }
 0x13c   : > { %v2882_v25 = vpop.eup %2881  ;;  %777 = vst [vmem:[#allocation2 + $0x78] sm:$0xff] %v3789_v47  ;;  %v750_v19 = vmul.f32 %v725_v62, %v3744_v50  ;;  %v2016_v45 = vadd.f32 1.0, %v2880_v55  ;;  %2887 = verf.f32 %v679_v52  ;;  %v612_v36 = vadd.f32 %v3491_v18, %v611_v41  ;;  %v1385_v62 = vld [vmem:[#allocation2 + $0x47] sm:$0xff] }
 0x13d   : > { %778 = vst [vmem:[#allocation2 + $0x80] sm:$0xff] %v749_v57  ;;  %v751_v54 = vmul.f32 %v726_v42, %v3751_v14  ;;  %v2017_v51 = vadd.f32 1.0, %v2882_v25  ;;  %v1968_v60 = vmul.f32 0.70710677, %v1918_v31  ;;  %v1409_v34 = vmul.f32 %v1384_v30, %v3368_v29  ;;  %v1648_v42 = vld [vmem:[#allocation2 + $0x45] sm:$0xff] }
 0x13e   : > { %v2884_v0 = vpop.eup %2883  ;;  %779 = vst [vmem:[#allocation2 + $0x88] sm:$0xff] %v750_v19  ;;  %v2041_v22 = vmul.f32 %v2016_v45, %v3755_v15  ;;  %v1437_v50 = vmul.f32 %v3565_v43, %v1408_v2  ;;  %v680_v49 = vmul.f32 0.70710677, %v612_v36  ;;  %v1887_v16 = vadd.f32 %v1862_v24, %v1805_v1  ;;  %v616_v40 = vpop.f32.mrb[42].mxu0 }
 0x13f   : > { %780 = vst [vmem:[#allocation2 + $0x90] sm:$0xff] %v751_v54  ;;  %v727_v9 = vadd.f32 1.0, %v2884_v0  ;;  %v2042_v5 = vmul.f32 %v2017_v51, %v3767_v10  ;;  %2889 = verf.f32 %v1968_v60  ;;  %v1123_v14 = vmul.f32 %v1098_v48, %v3378_v32  ;;  %v2665_v15 = vpop.f32.mrb[43].mxu0 }
 0x140   : > { %2711 = vmatmul.mubr.f32.gmra.mrb[52].mxu0 %v2041_v22  ;;  %2891 = verf.f32 %v680_v49  ;;  %v1919_v30 = vadd.f32 %v3656_v6, %v1887_v16  ;;  %v617_v52 = vadd.f32 %v3491_v18, %v616_v40  ;;  %v1304_v2 = vmul.f32 %v1279_v61, %v3362_v26  ;;  %v1280_v61 = vld [vmem:[#allocation2 + $0x33] sm:$0xff] }
 0x141   : > { %v752_v1 = vmul.f32 %v727_v9, %v3772_v46  ;;  %v653_v55 = vmul.f32 0.5, %v3761_v23  ;;  %2713 = vmatprep.mubr.msk.f32.mxu0 %vm3009_vm0, %v3746_v39  ;;  %v654_v10 = vmul.f32 0.5, %v607_v8  ;;  %v3813_v57 = vmul.f32 %v3565_v43, %v1409_v34 }
 0x142   : > { %v2886_v41 = vpop.eup %2885  ;;  %v1943_v24 = vmul.f32 0.5, %v1918_v31  ;;  %v1969_v25 = vmul.f32 0.70710677, %v1919_v30  ;;  %v681_v19 = vmul.f32 0.70710677, %v617_v52  ;;  %v1410_v45 = vmul.f32 %v1385_v62, %v3378_v32  ;;  %v621_v51 = vpop.f32.mrb[44].mxu0 }
 0x143   : > { %781 = vst [vmem:[#allocation2 + $0x98] sm:$0xff] %v752_v1  ;;  %v728_v7 = vadd.f32 1.0, %v2886_v41  ;;  %v655_v54 = vmul.f32 0.5, %v612_v36  ;;  %v1333_v46 = vmul.f32 %v3538_v20, %v1304_v2  ;;  %v1569_v23 = vmul.f32 %v1098_v48, %v3362_v26  ;;  %v2668_v34 = vpop.f32.mrb[45].mxu0  ;;  %v1752_v48 = vld [vmem:[#allocation2 + $0x46] sm:$0xff] }
 0x144   : > { %2714 = vmatmul.mubr.f32.gmra.mrb[54].mxu0 %v2042_v5  ;;  %2893 = verf.f32 %v1969_v25  ;;  %v3819_v8 = vmul.f32 %v3522_v21, %v1123_v14  ;;  %v1673_v60 = vmul.f32 %v1648_v42, %v3364_v27  ;;  %v1834_v31 = vmul.f32 %v1385_v62, %v3362_v26  ;;  %v1099_v27 = vld [vmem:[#allocation2 + $0x41] sm:$0xff] }
 0x145   : > { %v753_v0 = vmul.f32 %v728_v7, %v653_v55  ;;  %2895 = verf.f32 %v681_v19  ;;  %v1358_v36 = vadd.f32 %v1333_v46, %v3694_v59  ;;  %v1516_v22 = vmul.f32 %v3568_v17, %v3649_v12  ;;  %v1649_v12 = vld [vmem:[#allocation2 + $0x4d] sm:$0xff] }
 0x146   : > { %v2888_v49 = vpop.eup %2887  ;;  %v3826_v16 = vmul.f32 0.5, %v1919_v30  ;;  %v3828_v9 = vmul.f32 0.5, %v617_v52  ;;  %v3831_v5 = vmul.f32 %v3565_v43, %v1410_v45  ;;  %v622_v26 = vadd.f32 %v3491_v18, %v621_v51  ;;  %v626_v15 = vpop.f32.mrb[46].mxu0  ;;  %v1386_v55 = vld [vmem:[#allocation2 + $0x4f] sm:$0xff] }
 0x147   : > { %782 = vst [vmem:[#allocation2 + $0xa0] sm:$0xff] %v753_v0  ;;  %v729_v40 = vadd.f32 1.0, %v2888_v49  ;;  %v1462_v14 = vadd.f32 %v1437_v50, %v1358_v36  ;;  %v1598_v59 = vmul.f32 %v3571_v56, %v1569_v23  ;;  %v1305_v62 = vmul.f32 %v1280_v61, %v3366_v28  ;;  %v2671_v42 = vpop.f32.mrb[47].mxu0  ;;  %v1281_v0 = vld [vmem:[#allocation2 + $0x3b] sm:$0xff] }
 0x148   : > { %v1702_v30 = vmul.f32 %v3554_v38, %v1673_v60  ;;  %v1781_v52 = vmul.f32 %v3576_v35, %v1752_v48  ;;  %v1863_v2 = vmul.f32 %v3640_v11, %v1834_v31  ;;  %v682_v1 = vmul.f32 0.70710677, %v622_v26  ;;  %v4455_v49 = vld [vmem:[#allocation37_spill] sm:$0xff] }
 0x149   : > { %v2890_v41 = vpop.eup %2889  ;;  %v754_v25 = vmul.f32 %v729_v40, %v654_v10  ;;  %v1541_v19 = vadd.f32 %v1516_v22, %v1462_v14  ;;  %v1124_v50 = vmul.f32 %v1099_v27, %v3390_v37  ;;  %v1334_v45 = vmul.f32 %v3538_v20, %v1305_v62  ;;  %v1202_v10 = vld [vmem:[#allocation2 + $0x3a] sm:$0xff] }
 0x14a   : > { %v2892_v7 = vpop.eup %2891  ;;  %v2018_v46 = vadd.f32 1.0, %v2890_v41  ;;  %2897 = verf.f32 %v682_v1  ;;  %v1570_v23 = vmul.f32 %v1099_v27, %v3366_v28  ;;  %v1674_v51 = vmul.f32 %v1649_v12, %v3368_v29  ;;  %v3845_v36 = vpop.f32.mrb[48].mxu0  ;;  %v1100_v12 = vld [vmem:[#allocation2 + $0x49] sm:$0xff] }
 0x14b   : > { %783 = vst [vmem:[#allocation2 + $0xa8] sm:$0xff] %v754_v25  ;;  %v730_v60 = vadd.f32 1.0, %v2892_v7  ;;  %v1623_v31 = vadd.f32 %v1598_v59, %v1541_v19  ;;  %v1359_v34 = vadd.f32 %v1334_v45, %v3716_v3  ;;  %v1411_v61 = vmul.f32 %v1386_v55, %v3390_v37  ;;  %v2674_v14 = vpop.f32.mrb[49].mxu0  ;;  %v4456_v41 = vld [vmem:[#allocation3_spill] sm:$0xff]  ;;  %v4457_v7 = vld [vmem:[#allocation6_spill] sm:$0xff] }
 0x14c   : > { %v2043_v22 = vmul.f32 %v2018_v46, %v1943_v24  ;;  %v657_v48 = vmul.f32 0.5, %v622_v26  ;;  %v1517_v40 = vmul.f32 %v3568_v17, %v4455_v49  ;;  %v1599_v27 = vmul.f32 %v3571_v56, %v1570_v23 }
 0x14d   : > { %v755_v29 = vmul.f32 %v730_v60, %v655_v54  ;;  %v1727_v62 = vadd.f32 %v1702_v30, %v1623_v31  ;;  %v1463_v59 = vadd.f32 %v3813_v57, %v1359_v34  ;;  %v627_v3 = vadd.f32 %v3491_v18, %v626_v15  ;;  %v1753_v15 = vld [vmem:[#allocation2 + $0x4e] sm:$0xff] }
 0x14e   : > { %v2894_v1 = vpop.eup %2893  ;;  %2717 = vmatmul.mubr.f32.vlgmr.msra.gmra.mrb[0].mxu1 %v2043_v22  ;;  %v3853_v42 = vmul.f32 %v3522_v21, %v1124_v50  ;;  %v1703_v24 = vmul.f32 %v3554_v38, %v1674_v51  ;;  %v1231_v26 = vmul.f32 %v3517_v63, %v1202_v10  ;;  %v1306_v25 = vmul.f32 %v1281_v0, %v4456_v41  ;;  %v1650_v10 = vld [vmem:[#allocation2 + $0x55] sm:$0xff] }
 0x14f   : > { %v2896_v19 = vpop.eup %2895  ;;  %784 = vst [vmem:[#allocation2 + $0xb0] sm:$0xff] %v755_v29  ;;  %2719 = vmatprep.mubr.msk.f32.mxu1 %vm3009_vm0, %v3746_v39  ;;  %v2019_v57 = vadd.f32 1.0, %v2894_v1  ;;  %v1806_v54 = vadd.f32 %v1781_v52, %v1727_v62  ;;  %v1542_v18 = vadd.f32 %v1517_v40, %v1463_v59  ;;  %v1835_v30 = vmul.f32 %v1386_v55, %v3366_v28  ;;  %v1387_v55 = vld [vmem:[#allocation2 + $0x57] sm:$0xff]  ;;  %v1203_v1 = vld [vmem:[#allocation2 + $0x42] sm:$0xff] }
 0x150   : > { %v731_v45 = vadd.f32 1.0, %v2896_v19  ;;  %v683_v50 = vmul.f32 0.70710677, %v627_v3  ;;  %v1125_v46 = vmul.f32 %v1100_v12, %v4457_v7  ;;  %v1256_v23 = vadd.f32 %v1231_v26, %v3819_v8 }
 0x151   : > { %v2044_v51 = vmul.f32 %v2019_v57, %v3826_v16  ;;  %v1888_v60 = vadd.f32 %v1863_v2, %v1806_v54  ;;  %v1624_v31 = vadd.f32 %v1599_v27, %v1542_v18  ;;  %v1335_v34 = vmul.f32 %v3538_v20, %v1306_v25  ;;  %v2994_v54 = vld [vmem:[%s4377_s2] ss:$0 sm:$0xff] }
 0x152   : > { %v756_v0 = vmul.f32 %v731_v45, %v3828_v9  ;;  %v3867_v52 = vmul.f32 %v3565_v43, %v1411_v61  ;;  %v1782_v28 = vmul.f32 %v3576_v35, %v1753_v15  ;;  %2899 = verf.f32 %v683_v50  ;;  %v4458_v45 = vld [vmem:[#allocation4_spill] sm:$0xff] }
 0x153   : > { %2720 = vmatmul.mubr.f32.gmra.mrb[2].mxu1 %v2044_v51  ;;  %v1920_v22 = vadd.f32 %v3656_v6, %v1888_v60  ;;  %v1728_v8 = vadd.f32 %v1703_v24, %v1624_v31  ;;  %v1360_v49 = vadd.f32 %v1335_v34, %v1256_v23  ;;  %v1571_v16 = vmul.f32 %v1100_v12, %v4456_v41  ;;  %v1282_v12 = vld [vmem:[#allocation2 + $0x43] sm:$0xff] }
 0x154   : > { %v2898_v2 = vpop.eup %2897  ;;  %785 = vst [vmem:[#allocation2 + $0xb8] sm:$0xff] %v756_v0  ;;  %2722 = vmatprep.mubr.msk.f32.mxu1 %vm3009_vm0, %v3746_v39  ;;  %v1864_v9 = vmul.f32 %v3640_v11, %v1835_v30  ;;  %v658_v61 = vmul.f32 0.5, %v627_v3  ;;  %v3876_v40 = vmul.f32 %v3522_v21, %v1125_v46  ;;  %v1675_v27 = vmul.f32 %v1650_v10, %v3378_v32  ;;  %v1754_v3 = vld [vmem:[#allocation2 + $0x56] sm:$0xff]  ;;  %v1388_v34 = vld [vmem:[#allocation2 + $0x5f] sm:$0xff] }
 0x155   : > { %v1970_v14 = vmul.f32 0.70710677, %v1920_v22  ;;  %v732_v29 = vadd.f32 1.0, %v2898_v2  ;;  %v1807_v62 = vadd.f32 %v1782_v28, %v1728_v8  ;;  %v1412_v59 = vmul.f32 %v1387_v55, %v4457_v7  ;;  %v1101_v30 = vld [vmem:[#allocation2 + $0x51] sm:$0xff]  ;;  %v1651_v10 = vld [vmem:[#allocation2 + $0x5d] sm:$0xff] }
 0x156   : > { %v1464_v24 = vadd.f32 %v3831_v5, %v1360_v49  ;;  %v1518_v26 = vmul.f32 %v3568_v17, %v3706_v53  ;;  %v1600_v25 = vmul.f32 %v3571_v56, %v1571_v16  ;;  %v1836_v19 = vmul.f32 %v1387_v55, %v4456_v41  ;;  %v4459_v55 = vld [vmem:[#allocation8_spill] sm:$0xff] }
 0x157   : > { %2901 = verf.f32 %v1970_v14  ;;  %v757_v57 = vmul.f32 %v732_v29, %v657_v48  ;;  %v1889_v32 = vadd.f32 %v1864_v9, %v1807_v62  ;;  %v632_v18 = vadd.f32 %v2994_v54, %v3845_v36  ;;  %v1102_v62 = vld [vmem:[#allocation2 + $0x59] sm:$0xff] }
 0x158   : > { %v1543_v15 = vadd.f32 %v1518_v26, %v1464_v24  ;;  %v1704_v5 = vmul.f32 %v3554_v38, %v1675_v27  ;;  %v1232_v53 = vmul.f32 %v3517_v63, %v1203_v1  ;;  %v1307_v50 = vmul.f32 %v1282_v12, %v4458_v45  ;;  %v1204_v27 = vld [vmem:[#allocation2 + $0x4a] sm:$0xff] }
 0x159   : > { %786 = vst [vmem:[#allocation2 + $0xc0] sm:$0xff] %v757_v57  ;;  %v1921_v41 = vadd.f32 %v3656_v6, %v1889_v32  ;;  %v3894_v48 = vmul.f32 %v3565_v43, %v1412_v59  ;;  %v1783_v46 = vmul.f32 %v3576_v35, %v1754_v3  ;;  %v684_v23 = vmul.f32 0.70710677, %v632_v18  ;;  %v1283_v59 = vld [vmem:[#allocation2 + $0x4b] sm:$0xff] }
 0x15a   : > { %v1945_v51 = vmul.f32 0.5, %v1920_v22  ;;  %v1625_v60 = vadd.f32 %v1600_v25, %v1543_v15  ;;  %v1257_v36 = vadd.f32 %v1232_v53, %v3853_v42  ;;  %v1336_v31 = vmul.f32 %v3538_v20, %v1307_v50  ;;  %v1389_v25 = vld [vmem:[#allocation2 + $0x67] sm:$0xff]  ;;  %v4460_v15 = vld [vmem:[#allocation9_spill] sm:$0xff] }
 0x15b   : > { %v1971_v0 = vmul.f32 0.70710677, %v1921_v41  ;;  %v1865_v28 = vmul.f32 %v3640_v11, %v1836_v19  ;;  %2903 = verf.f32 %v684_v23  ;;  %v1126_v8 = vmul.f32 %v1101_v30, %v4459_v55 }
 0x15c   : > { %v2900_v49 = vpop.eup %2899  ;;  %v1729_v16 = vadd.f32 %v1704_v5, %v1625_v60  ;;  %v3901_v2 = vmul.f32 0.5, %v632_v18  ;;  %v1361_v9 = vadd.f32 %v1336_v31, %v1257_v36  ;;  %v1572_v22 = vmul.f32 %v1101_v30, %v4458_v45  ;;  %v1755_v18 = vld [vmem:[#allocation2 + $0x5e] sm:$0xff] }
 0x15d   : > { %2905 = verf.f32 %v1971_v0  ;;  %v733_v42 = vadd.f32 1.0, %v2900_v49  ;;  %v1413_v14 = vmul.f32 %v1388_v34, %v4459_v55  ;;  %v1676_v29 = vmul.f32 %v1651_v10, %v3390_v37  ;;  %v4461_v30 = vld [vmem:[#allocation5_spill] sm:$0xff]  ;;  %v1652_v31 = vld [vmem:[#allocation2 + $0x65] sm:$0xff] }
 0x15e   : > { %v1808_v1 = vadd.f32 %v1783_v46, %v1729_v16  ;;  %v1465_v12 = vadd.f32 %v3867_v52, %v1361_v9  ;;  %v1519_v24 = vmul.f32 %v3568_v17, %v3753_v44  ;;  %v1601_v26 = vmul.f32 %v3571_v56, %v1572_v22  ;;  %v1205_v16 = vld [vmem:[#allocation2 + $0x52] sm:$0xff] }
 0x15f   : > { %v758_v3 = vmul.f32 %v733_v42, %v658_v61  ;;  %v1705_v19 = vmul.f32 %v3554_v38, %v1676_v29  ;;  %v1837_v57 = vmul.f32 %v1388_v34, %v4458_v45  ;;  %v1233_v32 = vmul.f32 %v3517_v63, %v1204_v27  ;;  %v1284_v9 = vld [vmem:[#allocation2 + $0x53] sm:$0xff] }
 0x160   : > { %v1890_v54 = vadd.f32 %v1865_v28, %v1808_v1  ;;  %v1544_v37 = vadd.f32 %v1519_v24, %v1465_v12  ;;  %v1127_v5 = vmul.f32 %v1102_v62, %v4460_v15  ;;  %v1308_v52 = vmul.f32 %v1283_v59, %v4461_v30  ;;  %v1103_v59 = vld [vmem:[#allocation2 + $0x61] sm:$0xff] }
 0x161   : > { %v2902_v53 = vpop.eup %2901  ;;  %v1946_v50 = vmul.f32 0.5, %v1921_v41  ;;  %787 = vst [vmem:[#allocation2 + $0xc8] sm:$0xff] %v758_v3  ;;  %v1155_v44 = vmul.f32 %v3522_v21, %v1126_v8  ;;  %v1258_v61 = vadd.f32 %v1233_v32, %v3876_v40  ;;  %v1414_v46 = vmul.f32 %v1389_v25, %v4460_v15 }
 0x162   : > { %v2020_v23 = vadd.f32 1.0, %v2902_v53  ;;  %v1922_v45 = vadd.f32 %v3656_v6, %v1890_v54  ;;  %v1442_v60 = vmul.f32 %v3565_v43, %v1413_v14  ;;  %v1626_v36 = vadd.f32 %v1601_v26, %v1544_v37  ;;  %v1756_v26 = vld [vmem:[#allocation2 + $0x66] sm:$0xff] }
 0x163   : > { %v1784_v34 = vmul.f32 %v3576_v35, %v1755_v18  ;;  %v1866_v10 = vmul.f32 %v3640_v11, %v1837_v57  ;;  %v1337_v41 = vmul.f32 %v3538_v20, %v1308_v52  ;;  %v1573_v0 = vmul.f32 %v1102_v62, %v4461_v30  ;;  %v4463_v37 = vld [vmem:[#allocation11_spill] sm:$0xff] }
 0x164   : > { %v2045_v28 = vmul.f32 %v2020_v23, %v1945_v51  ;;  %v1972_v8 = vmul.f32 0.70710677, %v1922_v45  ;;  %v1730_v40 = vadd.f32 %v1705_v19, %v1626_v36  ;;  %v3925_v49 = vmul.f32 %v3522_v21, %v1127_v5  ;;  %v4462_v19 = vld [vmem:[#allocation7_spill] sm:$0xff] }
 0x165   : > { %v2904_v22 = vpop.eup %2903  ;;  %v1362_v27 = vadd.f32 %v1337_v41, %v1258_v61  ;;  %v3928_v42 = vmul.f32 %v3565_v43, %v1414_v46  ;;  %v1520_v14 = vmul.f32 %v3568_v17, %v3758_v58  ;;  %v1677_v29 = vmul.f32 %v1652_v31, %v4457_v7  ;;  %v1390_v5 = vld [vmem:[#allocation2 + $0x6f] sm:$0xff]  ;;  %v1206_v41 = vld [vmem:[#allocation2 + $0x5a] sm:$0xff] }
 0x166   : > { %2723 = vmatmul.mubr.f32.gmra.mrb[4].mxu1 %v2045_v28  ;;  %2907 = verf.f32 %v1972_v8  ;;  %v734_v51 = vadd.f32 1.0, %v2904_v22  ;;  %v1809_v62 = vadd.f32 %v1784_v34, %v1730_v40  ;;  %v1602_v1 = vmul.f32 %v3571_v56, %v1573_v0  ;;  %v1653_v52 = vld [vmem:[#allocation2 + $0x6d] sm:$0xff]  ;;  %v1285_v0 = vld [vmem:[#allocation2 + $0x5b] sm:$0xff] }
 0x167   : > { %v2906_v12 = vpop.eup %2905  ;;  %2725 = vmatprep.mubr.msk.f32.mxu1 %vm3009_vm0, %v3746_v39  ;;  %v1466_v24 = vadd.f32 %v3894_v48, %v1362_v27  ;;  %v1838_v3 = vmul.f32 %v1389_v25, %v4461_v30  ;;  %v1234_v58 = vmul.f32 %v3517_v63, %v1205_v16  ;;  %v1309_v7 = vmul.f32 %v1284_v9, %v4462_v19  ;;  %v1757_v22 = vld [vmem:[#allocation2 + $0x6e] sm:$0xff] }
 0x168   : > { %v2021_v57 = vadd.f32 1.0, %v2906_v12  ;;  %v759_v32 = vmul.f32 %v734_v51, %v3901_v2  ;;  %v1891_v54 = vadd.f32 %v1866_v10, %v1809_v62  ;;  %v1128_v18 = vmul.f32 %v1103_v59, %v4463_v37  ;;  %v1654_v62 = vld [vmem:[#allocation2 + $0x75] sm:$0xff] }
 0x169   : > { %v1545_v53 = vadd.f32 %v1520_v14, %v1466_v24  ;;  %v1706_v61 = vmul.f32 %v3554_v38, %v1677_v29  ;;  %v1259_v46 = vadd.f32 %v1234_v58, %v1155_v44  ;;  %v1338_v48 = vmul.f32 %v3538_v20, %v1309_v7  ;;  %v4465_v12 = vld [vmem:[#allocation13_spill] sm:$0xff] }
 0x16a   : > { %v2046_v23 = vmul.f32 %v2021_v57, %v1946_v50  ;;  %788 = vst [vmem:[#allocation2 + $0xd0] sm:$0xf] %v759_v32  ;;  %v1923_v25 = vadd.f32 %v3656_v6, %v1891_v54  ;;  %v1785_v30 = vmul.f32 %v3576_v35, %v1756_v26  ;;  %v1574_v36 = vmul.f32 %v1103_v59, %v4462_v19  ;;  %v1391_v58 = vld [vmem:[#allocation2 + $0x77] sm:$0xff]  ;;  %v3970_v54 = vld [vmem:[%s4378_s3 + $0x8] ss:$0 sm:$0xff] }
 0x16b   : > { %v1627_v2 = vadd.f32 %v1602_v1, %v1545_v53  ;;  %v1363_v31 = vadd.f32 %v1338_v48, %v1259_v46  ;;  %v1415_v34 = vmul.f32 %v1390_v5, %v4463_v37  ;;  %v1678_v10 = vmul.f32 %v1653_v52, %v4459_v55  ;;  %v1104_v55 = vld [vmem:[#allocation2 + $0x69] sm:$0xff] }
 0x16c   : > { %2726 = vmatmul.mubr.f32.gmra.mrb[6].mxu1 %v2046_v23  ;;  %v1947_v44 = vmul.f32 0.5, %v1922_v45  ;;  %v1973_v28 = vmul.f32 0.70710677, %v1923_v25  ;;  %v1867_v50 = vmul.f32 %v3640_v11, %v1838_v3  ;;  %v1157_v8 = vmul.f32 %v3522_v21, %v1128_v18  ;;  %v4464_v11 = vld [vmem:[#allocation10_spill] sm:$0xff] }
 0x16d   : > { %2728 = vmatprep.mubr.msk.f32.mxu1 %vm3009_vm0, %v3746_v39  ;;  %v1731_v6 = vadd.f32 %v1706_v61, %v1627_v2  ;;  %v1467_v40 = vadd.f32 %v1442_v60, %v1363_v31  ;;  %v1521_v16 = vmul.f32 %v3568_v17, %v3765_v13  ;;  %v1603_v9 = vmul.f32 %v3571_v56, %v1574_v36  ;;  %v3978_v61 = vld [vmem:[%s4379_s4] ss:$0 sm:$0xff]  ;;  %v1286_v36 = vld [vmem:[#allocation2 + $0x63] sm:$0xff] }
 0x16e   : > { %2909 = verf.f32 %v1973_v28  ;;  %v1839_v45 = vmul.f32 %v1390_v5, %v4462_v19  ;;  %v1235_v27 = vmul.f32 %v3517_v63, %v1206_v41  ;;  %v1310_v14 = vmul.f32 %v1285_v0, %v4464_v11 }
 0x16f   : > { %v1810_v29 = vadd.f32 %v1785_v30, %v1731_v6  ;;  %v3960_v59 = vmul.f32 %v3565_v43, %v1415_v34  ;;  %v1546_v51 = vadd.f32 %v1521_v16, %v1467_v40  ;;  %v1707_v60 = vmul.f32 %v3554_v38, %v1678_v10  ;;  %v1207_v30 = vld [vmem:[#allocation2 + $0x62] sm:$0xff]  ;;  %v1758_v10 = vld [vmem:[#allocation2 + $0x76] sm:$0xff] }
 0x170   : > { %v2908_v13 = vpop.eup %2907  ;;  %v1948_v1 = vmul.f32 0.5, %v1923_v25  ;;  %v1129_v24 = vmul.f32 %v1104_v55, %v4465_v12  ;;  %v1260_v26 = vadd.f32 %v1235_v27, %v3925_v49  ;;  %v1339_v3 = vmul.f32 %v3538_v20, %v1310_v14  ;;  %v1105_v25 = vld [vmem:[#allocation2 + $0x71] sm:$0xff]  ;;  %v4466_v6 = vld [vmem:[#allocation15_spill] sm:$0xff] }
 0x171   : > { %v2022_v19 = vadd.f32 1.0, %v2908_v13  ;;  %v1892_v7 = vadd.f32 %v1867_v50, %v1810_v29  ;;  %v1628_v57 = vadd.f32 %v1603_v9, %v1546_v51  ;;  %v1786_v32 = vmul.f32 %v3576_v35, %v1757_v22  ;;  %v4467_v16 = vld [vmem:[#allocation12_spill] sm:$0xff]  ;;  %v1392_v51 = vld [vmem:[#allocation2 + $0x7f] sm:$0xff] }
 0x172   : > { %v1868_v18 = vmul.f32 %v3970_v54, %v1839_v45  ;;  %v1364_v5 = vadd.f32 %v1339_v3, %v1260_v26  ;;  %v1575_v52 = vmul.f32 %v1104_v55, %v4464_v11  ;;  %v1679_v49 = vmul.f32 %v1654_v62, %v4460_v15  ;;  %v1655_v45 = vld [vmem:[#allocation2 + $0x7d] sm:$0xff] }
 0x173   : > { %v2047_v53 = vmul.f32 %v2022_v19, %v1947_v44  ;;  %v1924_v46 = vadd.f32 %v3978_v61, %v1892_v7  ;;  %v1732_v48 = vadd.f32 %v1707_v60, %v1628_v57  ;;  %v1416_v23 = vmul.f32 %v1391_v58, %v4465_v12  ;;  %v1106_v57 = vld [vmem:[#allocation2 + $0x79] sm:$0xff] }
 0x174   : > { %v1158_v2 = vmul.f32 %v3522_v21, %v1129_v24  ;;  %v1468_v31 = vadd.f32 %v3928_v42, %v1364_v5  ;;  %v1522_v15 = vmul.f32 %v3568_v17, %v3780_v33  ;;  %v1604_v34 = vmul.f32 %v3571_v56, %v1575_v52 }
 0x175   : > { %2729 = vmatmul.mubr.f32.gmra.mrb[8].mxu1 %v2047_v53  ;;  %v1974_v41 = vmul.f32 0.70710677, %v1924_v46  ;;  %v1811_v0 = vadd.f32 %v1786_v32, %v1732_v48  ;;  %v1708_v44 = vmul.f32 %v3554_v38, %v1679_v49  ;;  %v1840_v28 = vmul.f32 %v1391_v58, %v4464_v11  ;;  %v1287_v32 = vld [vmem:[#allocation2 + $0x6b] sm:$0xff] }
 0x176   : > { %2731 = vmatprep.mubr.msk.f32.mxu1 %vm3009_vm0, %v3746_v39  ;;  %v1547_v50 = vadd.f32 %v1522_v15, %v1468_v31  ;;  %v1130_v40 = vmul.f32 %v1105_v25, %v4466_v6  ;;  %v1236_v42 = vmul.f32 %v3517_v63, %v1207_v30  ;;  %v1311_v33 = vmul.f32 %v1286_v36, %v4467_v16  ;;  %v1393_v53 = vld [vmem:[#allocation2 + $0x87] sm:$0xff] }
 0x177   : > { %2911 = verf.f32 %v1974_v41  ;;  %v1893_v9 = vadd.f32 %v1868_v18, %v1811_v0  ;;  %v1445_v55 = vmul.f32 %v3565_v43, %v1416_v23  ;;  %v1787_v22 = vmul.f32 %v3576_v35, %v1758_v10  ;;  %v4469_v31 = vld [vmem:[#allocation14_spill] sm:$0xff] }
 0x178   : > { %v2910_v27 = vpop.eup %2909  ;;  %v1629_v14 = vadd.f32 %v1604_v34, %v1547_v50  ;;  %v1261_v11 = vadd.f32 %v1236_v42, %v1157_v8  ;;  %v1340_v29 = vmul.f32 %v3538_v20, %v1311_v33  ;;  %v1576_v60 = vmul.f32 %v1105_v25, %v4467_v16  ;;  %v1208_v8 = vld [vmem:[#allocation2 + $0x6a] sm:$0xff]  ;;  %v1759_v25 = vld [vmem:[#allocation2 + $0x7e] sm:$0xff] }
 0x179   : > { %v2023_v62 = vadd.f32 1.0, %v2910_v27  ;;  %v1949_v13 = vmul.f32 0.5, %v1924_v46  ;;  %v1925_v24 = vadd.f32 %v3978_v61, %v1893_v9  ;;  %v1869_v26 = vmul.f32 %v3970_v54, %v1840_v28  ;;  %v1656_v41 = vld [vmem:[#allocation2 + $0x85] sm:$0xff] }
 0x17a   : > { %v1733_v3 = vadd.f32 %v1708_v44, %v1629_v14  ;;  %v4001_v58 = vmul.f32 %v3522_v21, %v1130_v40  ;;  %v1365_v19 = vadd.f32 %v1340_v29, %v1261_v11  ;;  %v1680_v7 = vmul.f32 %v1655_v45, %v4463_v37  ;;  %v4468_v37 = vld [vmem:[#allocation17_spill] sm:$0xff]  ;;  %v1107_v11 = vld [vmem:[#allocation2 + $0x81] sm:$0xff] }
 0x17b   : > { %v2048_v18 = vmul.f32 %v2023_v62, %v1948_v1  ;;  %v1975_v5 = vmul.f32 0.70710677, %v1925_v24  ;;  %v1417_v52 = vmul.f32 %v1392_v51, %v4466_v6  ;;  %v1523_v49 = vmul.f32 %v3568_v17, %v3784_v4  ;;  %v1209_v62 = vld [vmem:[#allocation2 + $0x72] sm:$0xff] }
 0x17c   : > { %v1812_v46 = vadd.f32 %v1787_v22, %v1733_v3  ;;  %v1469_v48 = vadd.f32 %v3960_v59, %v1365_v19  ;;  %v1605_v23 = vmul.f32 %v3571_v56, %v1576_v60  ;;  %v1841_v30 = vmul.f32 %v1392_v51, %v4467_v16 }
 0x17d   : > { %2732 = vmatmul.mubr.f32.gmra.mrb[10].mxu1 %v2048_v18  ;;  %2913 = verf.f32 %v1975_v5  ;;  %v1131_v36 = vmul.f32 %v1106_v57, %v4468_v37  ;;  %v1237_v1 = vmul.f32 %v3517_v63, %v1208_v8  ;;  %v1312_v15 = vmul.f32 %v1287_v32, %v4469_v31  ;;  %v1394_v8 = vld [vmem:[#allocation2 + $0x8f] sm:$0xff] }
 0x17e   : > { %2734 = vmatprep.mubr.msk.f32.mxu1 %vm3009_vm0, %v3746_v39  ;;  %v1894_v4 = vadd.f32 %v1869_v26, %v1812_v46  ;;  %v1548_v34 = vadd.f32 %v1523_v49, %v1469_v48  ;;  %v1709_v59 = vmul.f32 %v3554_v38, %v1680_v7  ;;  %v1418_v10 = vmul.f32 %v1393_v53, %v4468_v37  ;;  %v1760_v7 = vld [vmem:[#allocation2 + $0x86] sm:$0xff] }
 0x17f   : > { %v4018_v0 = vmul.f32 %v3565_v43, %v1417_v52  ;;  %v1788_v44 = vmul.f32 %v3576_v35, %v1759_v25  ;;  %v1262_v28 = vadd.f32 %v1237_v1, %v1158_v2  ;;  %v1341_v50 = vmul.f32 %v3538_v20, %v1312_v15  ;;  %v4470_v18 = vld [vmem:[#allocation19_spill] sm:$0xff] }
 0x180   : > { %v1950_v40 = vmul.f32 0.5, %v1925_v24  ;;  %v1926_v42 = vadd.f32 %v3978_v61, %v1894_v4  ;;  %v1630_v16 = vadd.f32 %v1605_v23, %v1548_v34  ;;  %v1577_v33 = vmul.f32 %v1106_v57, %v4469_v31  ;;  %v1288_v24 = vld [vmem:[#allocation2 + $0x73] sm:$0xff] }
 0x181   : > { %v2912_v9 = vpop.eup %2911  ;;  %v1870_v22 = vmul.f32 %v3970_v54, %v1841_v30  ;;  %v4026_v45 = vmul.f32 %v3522_v21, %v1131_v36  ;;  %v1366_v27 = vadd.f32 %v1341_v50, %v1262_v28  ;;  %v1681_v14 = vmul.f32 %v1656_v41, %v4465_v12  ;;  %v1657_v23 = vld [vmem:[#allocation2 + $0x8d] sm:$0xff]  ;;  %v1496_v30 = vld [vmem:[#allocation2 + $0x80] sm:$0xff] }
 0x182   : > { %v2024_v29 = vadd.f32 1.0, %v2912_v9  ;;  %v1976_v2 = vmul.f32 0.70710677, %v1926_v42  ;;  %v1734_v51 = vadd.f32 %v1709_v59, %v1630_v16  ;;  %v4030_v60 = vmul.f32 %v3565_v43, %v1418_v10  ;;  %v1289_v9 = vld [vmem:[#allocation2 + $0x7b] sm:$0xff] }
 0x183   : > { %v1470_v26 = vadd.f32 %v1445_v55, %v1366_v27  ;;  %v1524_v3 = vmul.f32 %v3568_v17, %v3789_v47  ;;  %v1606_v19 = vmul.f32 %v3571_v56, %v1577_v33  ;;  %v1842_v57 = vmul.f32 %v1393_v53, %v4469_v31  ;;  %v4471_v55 = vld [vmem:[#allocation16_spill] sm:$0xff] }
 0x184   : > { %v2049_v12 = vmul.f32 %v2024_v29, %v1949_v13  ;;  %2915 = verf.f32 %v1976_v2  ;;  %v1813_v32 = vadd.f32 %v1788_v44, %v1734_v51  ;;  %v1132_v5 = vmul.f32 %v1107_v11, %v4470_v18  ;;  %v1210_v44 = vld [vmem:[#allocation2 + $0x7a] sm:$0xff]  ;;  %v1108_v33 = vld [vmem:[#allocation2 + $0x89] sm:$0xff] }
 0x185   : > { %v1549_v52 = vadd.f32 %v1524_v3, %v1470_v26  ;;  %v1710_v49 = vmul.f32 %v3554_v38, %v1681_v14  ;;  %v1238_v46 = vmul.f32 %v3517_v63, %v1209_v62  ;;  %v1313_v48 = vmul.f32 %v1288_v24, %v4471_v55  ;;  %v1761_v2 = vld [vmem:[#allocation2 + $0x8e] sm:$0xff]  ;;  %v4473_v3 = vld [vmem:[#allocation18_spill] sm:$0xff] }
 0x186   : > { %2735 = vmatmul.mubr.f32.gmra.mrb[12].mxu1 %v2049_v12  ;;  %v1895_v47 = vadd.f32 %v1870_v22, %v1813_v32  ;;  %v1789_v25 = vmul.f32 %v3576_v35, %v1760_v7  ;;  %v1419_v53 = vmul.f32 %v1394_v8, %v4470_v18  ;;  %v1578_v13 = vmul.f32 %v1107_v11, %v4471_v55  ;;  %v1395_v11 = vld [vmem:[#allocation2 + $0x97] sm:$0xff] }
 0x187   : > { %v2914_v36 = vpop.eup %2913  ;;  %2737 = vmatprep.mubr.msk.f32.mxu1 %vm3009_vm0, %v3746_v39  ;;  %v1951_v1 = vmul.f32 0.5, %v1926_v42  ;;  %v1631_v31 = vadd.f32 %v1606_v19, %v1549_v52  ;;  %v1263_v15 = vadd.f32 %v1238_v46, %v4001_v58  ;;  %v1342_v4 = vmul.f32 %v3538_v20, %v1313_v48  ;;  %v1658_v32 = vld [vmem:[#allocation2 + $0x95] sm:$0xff] }
 0x188   : > { %v2025_v34 = vadd.f32 1.0, %v2914_v36  ;;  %v1927_v59 = vadd.f32 %v3978_v61, %v1895_v47  ;;  %v1871_v10 = vmul.f32 %v3970_v54, %v1842_v57  ;;  %v1682_v41 = vmul.f32 %v1657_v23, %v4466_v6  ;;  %v1109_v36 = vld [vmem:[#allocation2 + $0x91] sm:$0xff] }
 0x189   : > { %v1735_v28 = vadd.f32 %v1710_v49, %v1631_v31  ;;  %v4051_v50 = vmul.f32 %v3522_v21, %v1132_v5  ;;  %v1367_v16 = vadd.f32 %v1342_v4, %v1263_v15  ;;  %v1525_v42 = vmul.f32 %v3568_v17, %v1496_v30  ;;  %v1290_v31 = vld [vmem:[#allocation2 + $0x83] sm:$0xff] }
 0x18a   : > { %v2050_v58 = vmul.f32 %v2025_v34, %v1950_v40  ;;  %v1977_v22 = vmul.f32 0.70710677, %v1927_v59  ;;  %v4055_v27 = vmul.f32 %v3565_v43, %v1419_v53  ;;  %v1607_v14 = vmul.f32 %v3571_v56, %v1578_v13  ;;  %v4472_v40 = vld [vmem:[#allocation21_spill] sm:$0xff] }
 0x18b   : > { %v1814_v29 = vadd.f32 %v1789_v25, %v1735_v28  ;;  %v1471_v6 = vadd.f32 %v4018_v0, %v1367_v16  ;;  %v1843_v51 = vmul.f32 %v1394_v8, %v4471_v55  ;;  %v1239_v62 = vmul.f32 %v3517_v63, %v1210_v44  ;;  %v1497_v8 = vld [vmem:[#allocation2 + $0x88] sm:$0xff]  ;;  %v1762_v28 = vld [vmem:[#allocation2 + $0x96] sm:$0xff] }
 0x18c   : > { %2738 = vmatmul.mubr.f32.gmra.mrb[14].mxu1 %v2050_v58  ;;  %2917 = verf.f32 %v1977_v22  ;;  %v1711_v24 = vmul.f32 %v3554_v38, %v1682_v41  ;;  %v1133_v26 = vmul.f32 %v1108_v33, %v4472_v40  ;;  %v1314_v19 = vmul.f32 %v1289_v9, %v4473_v3  ;;  %v1211_v25 = vld [vmem:[#allocation2 + $0x82] sm:$0xff]  ;;  %v4475_v9 = vld [vmem:[#allocation20_spill] sm:$0xff] }
 0x18d   : > { %2740 = vmatprep.mubr.msk.f32.mxu1 %vm3009_vm0, %v3746_v39  ;;  %v1896_v7 = vadd.f32 %v1871_v10, %v1814_v29  ;;  %v1550_v57 = vadd.f32 %v1525_v42, %v1471_v6  ;;  %v1264_v0 = vadd.f32 %v1239_v62, %v4026_v45  ;;  %v1420_v12 = vmul.f32 %v1395_v11, %v4472_v40  ;;  %v1396_v10 = vld [vmem:[#allocation2 + $0x9f] sm:$0xff] }
 0x18e   : > { %v2916_v5 = vpop.eup %2915  ;;  %v1952_v52 = vmul.f32 0.5, %v1927_v59  ;;  %v1790_v49 = vmul.f32 %v3576_v35, %v1761_v2  ;;  %v1343_v46 = vmul.f32 %v3538_v20, %v1314_v19  ;;  %v1579_v55 = vmul.f32 %v1108_v33, %v4473_v3  ;;  %v4474_v33 = vld [vmem:[#allocation23_spill] sm:$0xff]  ;;  %v1659_v22 = vld [vmem:[#allocation2 + $0x9d] sm:$0xff] }
 0x18f   : > { %v2026_v48 = vadd.f32 1.0, %v2916_v5  ;;  %v1928_v23 = vadd.f32 %v3978_v61, %v1896_v7  ;;  %v1632_v39 = vadd.f32 %v1607_v14, %v1550_v57  ;;  %v1872_v47 = vmul.f32 %v3970_v54, %v1843_v51  ;;  %v4087_v14 = vld [vmem:[#allocation2] sm:$0xff]  ;;  %v1212_v5 = vld [vmem:[#allocation2 + $0x8a] sm:$0xff] }
 0x190   : > { %v4074_v45 = vmul.f32 %v3522_v21, %v1133_v26  ;;  %v1368_v53 = vadd.f32 %v1343_v46, %v1264_v0  ;;  %v1526_v30 = vmul.f32 %v3568_v17, %v1497_v8  ;;  %v1683_v13 = vmul.f32 %v1658_v32, %v4468_v37 }
 0x191   : > { %v2051_v15 = vmul.f32 %v2026_v48, %v1951_v1  ;;  %v1978_v4 = vmul.f32 0.70710677, %v1928_v23  ;;  %v1736_v34 = vadd.f32 %v1711_v24, %v1632_v39  ;;  %v4079_v59 = vmul.f32 %v3565_v43, %v1420_v12  ;;  %v1498_v24 = vld [vmem:[#allocation2 + $0x90] sm:$0xff]  ;;  %v1110_v39 = vld [vmem:[#allocation2 + $0x99] sm:$0xff] }
 0x192   : > { %v1472_v41 = vadd.f32 %v4030_v60, %v1368_v53  ;;  %v1608_v44 = vmul.f32 %v3571_v56, %v1579_v55  ;;  %v1844_v16 = vmul.f32 %v1395_v11, %v4473_v3  ;;  %v1240_v42 = vmul.f32 %v3517_v63, %v1211_v25 }
 0x193   : > { %2741 = vmatmul.mubr.f32.gmra.mrb[16].mxu1 %v2051_v15  ;;  %2919 = verf.f32 %v1978_v4  ;;  %v1815_v37 = vadd.f32 %v1790_v49, %v1736_v34  ;;  %v1134_v1 = vmul.f32 %v1109_v36, %v4474_v33  ;;  %v1315_v58 = vmul.f32 %v1290_v31, %v4475_v9  ;;  %v1291_v49 = vld [vmem:[#allocation2 + $0x8b] sm:$0xff]  ;;  %v1763_v31 = vld [vmem:[#allocation2 + $0x9e] sm:$0xff] }
 0x194   : > { %2743 = vmatprep.mubr.msk.f32.mxu1 %vm3009_vm0, %v4087_v14  ;;  %v1551_v60 = vadd.f32 %v1526_v30, %v1472_v41  ;;  %v1712_v29 = vmul.f32 %v3554_v38, %v1683_v13  ;;  %v1265_v11 = vadd.f32 %v1240_v42, %v4051_v50  ;;  %v1421_v6 = vmul.f32 %v1396_v10, %v4474_v33  ;;  %v4476_v4 = vld [vmem:[#allocation22_spill] sm:$0xff] }
 0x195   : > { %v1897_v2 = vadd.f32 %v1872_v47, %v1815_v37  ;;  %v1791_v51 = vmul.f32 %v3576_v35, %v1762_v28  ;;  %v1344_v62 = vmul.f32 %v3538_v20, %v1315_v58  ;;  %v1580_v26 = vmul.f32 %v1109_v36, %v4475_v9  ;;  %v1397_v47 = vld [vmem:[#allocation2 + $0xa7] sm:$0xff]  ;;  %v1499_v37 = vld [vmem:[#allocation2 + $0x98] sm:$0xff] }
 0x196   : > { %v2918_v3 = vpop.eup %2917  ;;  %v1953_v19 = vmul.f32 0.5, %v1928_v23  ;;  %v1633_v7 = vadd.f32 %v1608_v44, %v1551_v60  ;;  %v1873_v57 = vmul.f32 %v3970_v54, %v1844_v16  ;;  %v1684_v0 = vmul.f32 %v1659_v22, %v4470_v18  ;;  %v1660_v28 = vld [vmem:[#allocation2 + $0xa5] sm:$0xff] }
 0x197   : > { %v2027_v12 = vadd.f32 1.0, %v2918_v3  ;;  %v1929_v50 = vadd.f32 %v3978_v61, %v1897_v2  ;;  %v4101_v8 = vmul.f32 %v3522_v21, %v1134_v1  ;;  %v1369_v32 = vadd.f32 %v1344_v62, %v1265_v11  ;;  %v1111_v62 = vld [vmem:[#allocation2 + $0xa1] sm:$0xff] }
 0x198   : > { %v1737_v46 = vadd.f32 %v1712_v29, %v1633_v7  ;;  %v4104_v55 = vmul.f32 %v3565_v43, %v1421_v6  ;;  %v1527_v48 = vmul.f32 %v3568_v17, %v1498_v24  ;;  %v1845_v23 = vmul.f32 %v1396_v10, %v4475_v9  ;;  %v4477_v10 = vld [vmem:[#allocation25_spill] sm:$0xff] }
 0x199   : > { %v2052_v18 = vmul.f32 %v2027_v12, %v1952_v52  ;;  %v1979_v25 = vmul.f32 0.70710677, %v1929_v50  ;;  %v1473_v53 = vadd.f32 %v4055_v27, %v1369_v32  ;;  %v1609_v30 = vmul.f32 %v3571_v56, %v1580_v26 }
 0x19a   : > { %v1816_v13 = vadd.f32 %v1791_v51, %v1737_v46  ;;  %v1713_v36 = vmul.f32 %v3554_v38, %v1684_v0  ;;  %v1241_v15 = vmul.f32 %v3517_v63, %v1212_v5  ;;  %v1316_v34 = vmul.f32 %v1291_v49, %v4476_v4  ;;  %v1398_v5 = vld [vmem:[#allocation2 + $0xaf] sm:$0xff] }
 0x19b   : > { %2744 = vmatmul.mubr.f32.gmra.mrb[18].mxu1 %v2052_v18  ;;  %2921 = verf.f32 %v1979_v25  ;;  %v1552_v41 = vadd.f32 %v1527_v48, %v1473_v53  ;;  %v1135_v44 = vmul.f32 %v1110_v39, %v4477_v10  ;;  %v1422_v52 = vmul.f32 %v1397_v47, %v4477_v10  ;;  %v4478_v48 = vld [vmem:[#allocation27_spill] sm:$0xff] }
 0x19c   : > { %2746 = vmatprep.mubr.msk.f32.mxu1 %vm3009_vm0, %v4087_v14  ;;  %v1898_v27 = vadd.f32 %v1873_v57, %v1816_v13  ;;  %v1266_v16 = vadd.f32 %v1241_v15, %v4074_v45  ;;  %v1345_v42 = vmul.f32 %v3538_v20, %v1316_v34  ;;  %v1581_v1 = vmul.f32 %v1110_v39, %v4476_v4  ;;  %v1213_v45 = vld [vmem:[#allocation2 + $0x92] sm:$0xff] }
 0x19d   : > { %v2920_v9 = vpop.eup %2919  ;;  %v1954_v58 = vmul.f32 0.5, %v1929_v50  ;;  %v1634_v22 = vadd.f32 %v1609_v30, %v1552_v41  ;;  %v1792_v60 = vmul.f32 %v3576_v35, %v1763_v31  ;;  %v1874_v29 = vmul.f32 %v3970_v54, %v1845_v23  ;;  %v1292_v57 = vld [vmem:[#allocation2 + $0x93] sm:$0xff] }
 0x19e   : > { %v2028_v11 = vadd.f32 1.0, %v2920_v9  ;;  %v1930_v6 = vadd.f32 %v3978_v61, %v1898_v27  ;;  %v1370_v2 = vadd.f32 %v1345_v42, %v1266_v16  ;;  %v1685_v51 = vmul.f32 %v1660_v28, %v4472_v40  ;;  %v1764_v40 = vld [vmem:[#allocation2 + $0xa6] sm:$0xff]  ;;  %v1214_v16 = vld [vmem:[#allocation2 + $0x9a] sm:$0xff] }
 0x19f   : > { %v1738_v24 = vadd.f32 %v1713_v36, %v1634_v22  ;;  %v1164_v26 = vmul.f32 %v3522_v21, %v1135_v44  ;;  %v4126_v3 = vmul.f32 %v3565_v43, %v1422_v52  ;;  %v1528_v7 = vmul.f32 %v3568_v17, %v1499_v37  ;;  %v1661_v30 = vld [vmem:[#allocation2 + $0xad] sm:$0xff]  ;;  %v1500_v36 = vld [vmem:[#allocation2 + $0xa0] sm:$0xff] }
 0x1a0   : > { %v2053_v0 = vmul.f32 %v2028_v11, %v1953_v19  ;;  %v1980_v12 = vmul.f32 0.70710677, %v1930_v6  ;;  %v1474_v50 = vadd.f32 %v4079_v59, %v1370_v2  ;;  %v1610_v32 = vmul.f32 %v3571_v56, %v1581_v1  ;;  %v4479_v19 = vld [vmem:[#allocation24_spill] sm:$0xff] }
 0x1a1   : > { %v1817_v49 = vadd.f32 %v1792_v60, %v1738_v24  ;;  %v1846_v46 = vmul.f32 %v1397_v47, %v4476_v4  ;;  %v1136_v23 = vmul.f32 %v1111_v62, %v4478_v48  ;;  %v1242_v39 = vmul.f32 %v3517_v63, %v1213_v45  ;;  %v1112_v22 = vld [vmem:[#allocation2 + $0xa9] sm:$0xff]  ;;  %v1293_v60 = vld [vmem:[#allocation2 + $0x9b] sm:$0xff] }
 0x1a2   : > { %2747 = vmatmul.mubr.f32.gmra.mrb[20].mxu1 %v2053_v0  ;;  %2923 = verf.f32 %v1980_v12  ;;  %v1553_v18 = vadd.f32 %v1528_v7, %v1474_v50  ;;  %v1714_v25 = vmul.f32 %v3554_v38, %v1685_v51  ;;  %v1317_v53 = vmul.f32 %v1292_v57, %v4479_v19  ;;  %v1399_v51 = vld [vmem:[#allocation2 + $0xb7] sm:$0xff]  ;;  %v1765_v24 = vld [vmem:[#allocation2 + $0xae] sm:$0xff]  ;;  %v4481_v50 = vld [vmem:[#allocation26_spill] sm:$0xff] }
 0x1a3   : > { %2749 = vmatprep.mubr.msk.f32.mxu1 %vm3009_vm0, %v4087_v14  ;;  %v1899_v59 = vadd.f32 %v1874_v29, %v1817_v49  ;;  %v1267_v13 = vadd.f32 %v1242_v39, %v4101_v8  ;;  %v1423_v47 = vmul.f32 %v1398_v5, %v4478_v48  ;;  %v1582_v31 = vmul.f32 %v1111_v62, %v4479_v19  ;;  %v4480_v0 = vld [vmem:[#allocation29_spill] sm:$0xff] }
 0x1a4   : > { %v1955_v15 = vmul.f32 0.5, %v1930_v6  ;;  %v1635_v4 = vadd.f32 %v1610_v32, %v1553_v18  ;;  %v1793_v34 = vmul.f32 %v3576_v35, %v1764_v40  ;;  %v1346_v41 = vmul.f32 %v3538_v20, %v1317_v53  ;;  %v1662_v49 = vld [vmem:[#allocation2 + $0xb5] sm:$0xff] }
 0x1a5   : > { %v2922_v44 = vpop.eup %2921  ;;  %v1931_v52 = vadd.f32 %v3978_v61, %v1899_v59  ;;  %v1875_v28 = vmul.f32 %v3970_v54, %v1846_v46  ;;  %v4146_v27 = vmul.f32 %v3522_v21, %v1136_v23  ;;  %v1686_v8 = vmul.f32 %v1661_v30, %v4474_v33  ;;  %v1501_v23 = vld [vmem:[#allocation2 + $0xa8] sm:$0xff] }
 0x1a6   : > { %v2029_v42 = vadd.f32 1.0, %v2922_v44  ;;  %v1739_v37 = vadd.f32 %v1714_v25, %v1635_v4  ;;  %v1371_v1 = vadd.f32 %v1346_v41, %v1267_v13  ;;  %v1529_v9 = vmul.f32 %v3568_v17, %v1500_v36  ;;  %v1215_v13 = vld [vmem:[#allocation2 + $0xa2] sm:$0xff] }
 0x1a7   : > { %v1981_v29 = vmul.f32 0.70710677, %v1931_v52  ;;  %v4151_v11 = vmul.f32 %v3565_v43, %v1423_v47  ;;  %v1611_v6 = vmul.f32 %v3571_v56, %v1582_v31  ;;  %v1847_v2 = vmul.f32 %v1398_v5, %v4479_v19 }
 0x1a8   : > { %v2054_v62 = vmul.f32 %v2029_v42, %v1954_v58  ;;  %v1818_v45 = vadd.f32 %v1793_v34, %v1739_v37  ;;  %v1475_v33 = vadd.f32 %v4104_v55, %v1371_v1  ;;  %v1243_v7 = vmul.f32 %v3517_v63, %v1214_v16  ;;  %v1294_v34 = vld [vmem:[#allocation2 + $0xa3] sm:$0xff]  ;;  %v1766_v1 = vld [vmem:[#allocation2 + $0xb6] sm:$0xff] }
 0x1a9   : > { %2925 = verf.f32 %v1981_v29  ;;  %v1715_v57 = vmul.f32 %v3554_v38, %v1686_v8  ;;  %v1137_v12 = vmul.f32 %v1112_v22, %v4480_v0  ;;  %v1318_v32 = vmul.f32 %v1293_v60, %v4481_v50  ;;  %v1113_v8 = vld [vmem:[#allocation2 + $0xb1] sm:$0xff]  ;;  %v1400_v16 = vld [vmem:[#allocation2 + $0xbf] sm:$0xff] }
 0x1aa   : > { %2750 = vmatmul.mubr.f32.gmra.mrb[22].mxu1 %v2054_v62  ;;  %v1900_v40 = vadd.f32 %v1875_v28, %v1818_v45  ;;  %v1554_v46 = vadd.f32 %v1529_v9, %v1475_v33  ;;  %v1268_v5 = vadd.f32 %v1243_v7, %v1164_v26  ;;  %v1424_v58 = vmul.f32 %v1399_v51, %v4480_v0  ;;  %v4482_v29 = vld [vmem:[#allocation28_spill] sm:$0xff] }
 0x1ab   : > { %2752 = vmatprep.mubr.msk.f32.mxu1 %vm3009_vm0, %v4087_v14  ;;  %v1956_v55 = vmul.f32 0.5, %v1931_v52  ;;  %v1794_v39 = vmul.f32 %v3576_v35, %v1765_v24  ;;  %v1347_v18 = vmul.f32 %v3538_v20, %v1318_v32  ;;  %v1583_v25 = vmul.f32 %v1112_v22, %v4481_v50 }
 0x1ac   : > { %v2924_v19 = vpop.eup %2923  ;;  %v1932_v53 = vadd.f32 %v3978_v61, %v1900_v40  ;;  %v1636_v30 = vadd.f32 %v1611_v6, %v1554_v46  ;;  %v1876_v59 = vmul.f32 %v3970_v54, %v1847_v2  ;;  %v1687_v26 = vmul.f32 %v1662_v49, %v4477_v10  ;;  %v1663_v2 = vld [vmem:[#allocation2 + $0xbd] sm:$0xff] }
 0x1ad   : > { %v2030_v47 = vadd.f32 1.0, %v2924_v19  ;;  %v4170_v36 = vmul.f32 %v3522_v21, %v1137_v12  ;;  %v1372_v31 = vadd.f32 %v1347_v18, %v1268_v5  ;;  %v1530_v4 = vmul.f32 %v3568_v17, %v1501_v23  ;;  %v1767_v23 = vld [vmem:[#allocation2 + $0xbe] sm:$0xff]  ;;  %v1216_v18 = vld [vmem:[#allocation2 + $0xaa] sm:$0xff] }
 0x1ae   : > { %v1982_v41 = vmul.f32 0.70710677, %v1932_v53  ;;  %v1740_v44 = vadd.f32 %v1715_v57, %v1636_v30  ;;  %v4174_v52 = vmul.f32 %v3565_v43, %v1424_v58  ;;  %v1848_v28 = vmul.f32 %v1399_v51, %v4481_v50  ;;  %v4483_v51 = vld [vmem:[#allocation31_spill] sm:$0xff]  ;;  %v1502_v57 = vld [vmem:[#allocation2 + $0xb0] sm:$0xff] }
 0x1af   : > { %v2055_v42 = vmul.f32 %v2030_v47, %v1955_v15  ;;  %v1476_v10 = vadd.f32 %v4126_v3, %v1372_v31  ;;  %v1612_v37 = vmul.f32 %v3571_v56, %v1583_v25  ;;  %v1244_v9 = vmul.f32 %v3517_v63, %v1215_v13  ;;  %v1295_v25 = vld [vmem:[#allocation2 + $0xab] sm:$0xff]  ;;  %v1114_v31 = vld [vmem:[#allocation2 + $0xb9] sm:$0xff] }
 0x1b0   : > { %2927 = verf.f32 %v1982_v41  ;;  %v1819_v22 = vadd.f32 %v1794_v39, %v1740_v44  ;;  %v1716_v60 = vmul.f32 %v3554_v38, %v1687_v26  ;;  %v1319_v6 = vmul.f32 %v1294_v34, %v4482_v29  ;;  %v4484_v44 = vld [vmem:[#allocation30_spill] sm:$0xff] }
 0x1b1   : > { %2753 = vmatmul.mubr.f32.gmra.mrb[24].mxu1 %v2055_v42  ;;  %v1555_v62 = vadd.f32 %v1530_v4, %v1476_v10  ;;  %v1138_v45 = vmul.f32 %v1113_v8, %v4483_v51  ;;  %v1269_v15 = vadd.f32 %v1244_v9, %v4146_v27  ;;  %v1425_v3 = vmul.f32 %v1400_v16, %v4483_v51  ;;  %v1664_v10 = vld [vmem:[#allocation2 + $0xc5] sm:$0xff]  ;;  %v1503_v9 = vld [vmem:[#allocation2 + $0xb8] sm:$0xff] }
 0x1b2   : > { %2755 = vmatprep.mubr.msk.f32.mxu1 %vm3009_vm0, %v4087_v14  ;;  %v1901_v33 = vadd.f32 %v1876_v59, %v1819_v22  ;;  %v1795_v24 = vmul.f32 %v3576_v35, %v1766_v1  ;;  %v1348_v7 = vmul.f32 %v3538_v20, %v1319_v6  ;;  %v1584_v12 = vmul.f32 %v1113_v8, %v4482_v29  ;;  %v1401_v8 = vld [vmem:[#allocation2 + $0xc7] sm:$0xff] }
 0x1b3   : > { %v2926_v50 = vpop.eup %2925  ;;  %v1957_v32 = vmul.f32 0.5, %v1932_v53  ;;  %v1637_v49 = vadd.f32 %v1612_v37, %v1555_v62  ;;  %v1877_v40 = vmul.f32 %v3970_v54, %v1848_v28  ;;  %v1688_v27 = vmul.f32 %v1663_v2, %v4478_v48  ;;  %v4485_v62 = vld [vmem:[#allocation33_spill] sm:$0xff] }
 0x1b4   : > { %v2031_v46 = vadd.f32 1.0, %v2926_v50  ;;  %v1933_v5 = vadd.f32 %v3978_v61, %v1901_v33  ;;  %v1373_v58 = vadd.f32 %v1348_v7, %v1269_v15  ;;  %v1849_v39 = vmul.f32 %v1400_v16, %v4482_v29 }
 0x1b5   : > { %v1741_v19 = vadd.f32 %v1716_v60, %v1637_v49  ;;  %v1167_v30 = vmul.f32 %v3522_v21, %v1138_v45  ;;  %v4196_v59 = vmul.f32 %v3565_v43, %v1425_v3  ;;  %v1531_v53 = vmul.f32 %v3568_v17, %v1502_v57  ;;  %v1217_v60 = vld [vmem:[#allocation2 + $0xb2] sm:$0xff] }
 0x1b6   : > { %v2056_v26 = vmul.f32 %v2031_v46, %v1956_v55  ;;  %v1983_v13 = vmul.f32 0.70710677, %v1933_v5  ;;  %v1477_v48 = vadd.f32 %v4151_v11, %v1373_v58  ;;  %v1613_v47 = vmul.f32 %v3571_v56, %v1584_v12 }
 0x1b7   : > { %v1820_v4 = vadd.f32 %v1795_v24, %v1741_v19  ;;  %v1796_v34 = vmul.f32 %v3576_v35, %v1767_v23  ;;  %v1245_v41 = vmul.f32 %v3517_v63, %v1216_v18  ;;  %v1320_v28 = vmul.f32 %v1295_v25, %v4484_v44  ;;  %v1561_v23 = vld [vmem:[#allocation2 + $0xc1] sm:$0xff]  ;;  %v4486_v25 = vld [vmem:[#allocation32_spill] sm:$0xff] }
 0x1b8   : > { %2756 = vmatmul.mubr.f32.gmra.mrb[26].mxu1 %v2056_v26  ;;  %2929 = verf.f32 %v1983_v13  ;;  %v1556_v16 = vadd.f32 %v1531_v53, %v1477_v48  ;;  %v1717_v42 = vmul.f32 %v3554_v38, %v1688_v27  ;;  %v1878_v55 = vmul.f32 %v3970_v54, %v1849_v39  ;;  %v1218_v53 = vld [vmem:[#allocation2 + $0xba] sm:$0xff]  ;;  %v1665_v48 = vld [vmem:[#allocation2 + $0xcd] sm:$0xff] }
 0x1b9   : > { %2758 = vmatprep.mubr.msk.f32.mxu1 %vm3009_vm0, %v4087_v14  ;;  %v1902_v11 = vadd.f32 %v1877_v40, %v1820_v4  ;;  %v1270_v37 = vadd.f32 %v1245_v41, %v4170_v36  ;;  %v1349_v1 = vmul.f32 %v3538_v20, %v1320_v28  ;;  %v1585_v22 = vmul.f32 %v1114_v31, %v4484_v44  ;;  %v1296_v36 = vld [vmem:[#allocation2 + $0xb3] sm:$0xff]  ;;  %v1504_v4 = vld [vmem:[#allocation2 + $0xc0] sm:$0xff]  ;;  %v4229_v41 = vpop.permute.xlu1 %936 }
 0x1ba   : > { %v2928_v29 = vpop.eup %2927  ;;  %v1958_v6 = vmul.f32 0.5, %v1933_v5  ;;  %v1638_v2 = vadd.f32 %v1613_v47, %v1556_v16  ;;  %v1139_v45 = vmul.f32 %v1114_v31, %v4485_v62  ;;  %v1426_v15 = vmul.f32 %v1401_v8, %v4485_v62  ;;  %v1768_v5 = vld [vmem:[#allocation2 + $0xc6] sm:$0xff] }
 0x1bb   : > { %v2032_v3 = vadd.f32 1.0, %v2928_v29  ;;  %v1934_v33 = vadd.f32 %v3978_v61, %v1902_v11  ;;  %v1374_v24 = vadd.f32 %v1349_v1, %v1270_v37  ;;  %v1689_v7 = vmul.f32 %v1664_v10, %v4480_v0  ;;  %v1826_v37 = vld [vmem:[#allocation2 + $0xcf] sm:$0xff] }
 0x1bc   : > { %v1742_v57 = vadd.f32 %v1717_v42, %v1638_v2  ;;  %v1532_v12 = vmul.f32 %v3568_v17, %v1503_v9  ;;  %v1614_v50 = vmul.f32 %v3571_v56, %v1585_v22  ;;  %v1246_v49 = vmul.f32 %v3517_v63, %v1217_v60  ;;  %v4487_v1 = vld [vmem:[#allocation35_spill] sm:$0xff] }
 0x1bd   : > { %v2057_v40 = vmul.f32 %v2032_v3, %v1957_v32  ;;  %v1984_v27 = vmul.f32 0.70710677, %v1934_v33  ;;  %v1478_v46 = vadd.f32 %v4174_v52, %v1374_v24  ;;  %v1850_v58 = vmul.f32 %v1401_v8, %v4484_v44  ;;  %v1297_v52 = vld [vmem:[#allocation2 + $0xbb] sm:$0xff]  ;;  %v1562_v22 = vld [vmem:[#allocation2 + $0xc9] sm:$0xff] }
 0x1be   : > { %v1821_v39 = vadd.f32 %v1796_v34, %v1742_v57  ;;  %v1168_v18 = vmul.f32 %v3522_v21, %v1139_v45  ;;  %v1271_v0 = vadd.f32 %v1246_v49, %v1167_v30  ;;  %v1321_v19 = vmul.f32 %v1296_v36, %v4486_v25  ;;  %v1505_v24 = vld [vmem:[#allocation2 + $0xc8] sm:$0xff] }
 0x1bf   : > { %2759 = vmatmul.mubr.f32.gmra.mrb[28].mxu1 %v2057_v40  ;;  %2931 = verf.f32 %v1984_v27  ;;  %v1455_v26 = vmul.f32 %v3565_v43, %v1426_v15  ;;  %v1557_v13 = vadd.f32 %v1532_v12, %v1478_v46  ;;  %v1718_v32 = vmul.f32 %v3554_v38, %v1689_v7  ;;  %v1115_v7 = vld [vmem:[#allocation2 + $0xc1] sm:$0xf]  ;;  %v1402_v49 = vld [vmem:[#allocation2 + $0xcf] sm:$0xf] }
 0x1c0   : > { %2761 = vmatprep.mubr.msk.f32.mxu1 %vm3009_vm0, %v4087_v14  ;;  %v1903_v47 = vadd.f32 %v1878_v55, %v1821_v39  ;;  %v1797_v31 = vmul.f32 %v3576_v35, %v1768_v5  ;;  %v1350_v30 = vmul.f32 %v3538_v20, %v1321_v19  ;;  %v1586_v34 = vmul.f32 %v1561_v23, %v4486_v25  ;;  %v1769_v46 = vld [vmem:[#allocation2 + $0xce] sm:$0xff]  ;;  %v1219_v5 = vld [vmem:[#allocation2 + $0xc2] sm:$0xf] }
 0x1c1   : > { %v1959_v44 = vmul.f32 0.5, %v1934_v33  ;;  %v1639_v28 = vadd.f32 %v1614_v50, %v1557_v13  ;;  %v1879_v8 = vmul.f32 %v3970_v54, %v1850_v58  ;;  %v1247_v16 = vmul.f32 %v3517_v63, %v1218_v53  ;;  %v1298_v50 = vld [vmem:[#allocation2 + $0xc3] sm:$0xf]  ;;  %v1087_v58 = vpop.permute.xlu1 %1086 }
 0x1c2   : > { %v2930_v42 = vpop.eup %2929  ;;  %v4234_v10 = vadd.f32 %v3978_v61, %v1903_v47  ;;  %v1375_v55 = vadd.f32 %v1350_v30, %v1271_v0  ;;  %v1690_v11 = vmul.f32 %v1665_v48, %v4483_v51  ;;  %v1322_v9 = vmul.f32 %v1297_v52, %v4487_v1  ;;  %v1770_v52 = vld [vmem:[#allocation2 + $0xd6] sm:$0xff] }
 0x1c3   : > { %v2033_v60 = vadd.f32 1.0, %v2930_v42  ;;  %v1743_v29 = vadd.f32 %v1718_v32, %v1639_v28  ;;  %v1533_v2 = vmul.f32 %v3568_v17, %v1504_v4  ;;  %v1272_v62 = vadd.f32 %v1247_v16, %v1168_v18 }
 0x1c4   : > { %v1985_v45 = vmul.f32 0.70710677, %v4234_v10  ;;  %v1479_v15 = vadd.f32 %v4196_v59, %v1375_v55  ;;  %v1615_v3 = vmul.f32 %v3571_v56, %v1586_v34  ;;  %v1351_v33 = vmul.f32 %v3538_v20, %v1322_v9 }
 0x1c5   : > { %v2058_v51 = vmul.f32 %v2033_v60, %v1958_v6  ;;  %v1822_v36 = vadd.f32 %v1797_v31, %v1743_v29  ;;  %v1851_v57 = vmul.f32 %v1826_v37, %v4486_v25  ;;  %v1587_v12 = vmul.f32 %v1562_v22, %v4487_v1  ;;  %v1506_v22 = vld [vmem:[#allocation2 + $0xd0] sm:$0xf] }
 0x1c6   : > { %2933 = verf.f32 %v1985_v45  ;;  %v1558_v40 = vadd.f32 %v1533_v2, %v1479_v15  ;;  %v1719_v27 = vmul.f32 %v3554_v38, %v1690_v11  ;;  %v1376_v59 = vadd.f32 %v1351_v33, %v1272_v62  ;;  %v4488_v62 = vld [vmem:[#allocation34_spill] sm:$0xff]  ;;  %v4489_v15 = vld [vmem:[#allocation36_spill] sm:$0xff] }
 0x1c7   : > { %2762 = vmatmul.mubr.f32.gmra.mrb[30].mxu1 %v2058_v51  ;;  %v1904_v23 = vadd.f32 %v1879_v8, %v1822_v36  ;;  %v1534_v39 = vmul.f32 %v3568_v17, %v1505_v24  ;;  %v1616_v6 = vmul.f32 %v3571_v56, %v1587_v12  ;;  %v1140_v18 = vmul.f32 %v1115_v7, %v4229_v41  ;;  %v1563_v8 = vld [vmem:[#allocation2 + $0xd1] sm:$0xf]  ;;  %v1828_v33 = vld [vmem:[#allocation2 + $0xdf] sm:$0xf] }
 0x1c8   : > { %2764 = vmatprep.mubr.msk.f32.mxu1 %vm3009_vm0, %v4087_v14  ;;  %v1640_v0 = vadd.f32 %v1615_v3, %v1558_v40  ;;  %v1480_v25 = vadd.f32 %v1455_v26, %v1376_v59  ;;  %v1323_v19 = vmul.f32 %v1298_v50, %v1087_v58  ;;  %v1427_v53 = vmul.f32 %v1402_v49, %v4229_v41  ;;  %v1667_v26 = vld [vmem:[#allocation2 + $0xdd] sm:$0xf] }
 0x1c9   : > { %v2932_v13 = vpop.eup %2931  ;;  %v1936_v32 = vadd.f32 %v3978_v61, %v1904_v23  ;;  %v1798_v48 = vmul.f32 %v3576_v35, %v1769_v46  ;;  %v1169_v47 = vmul.f32 %v3522_v21, %v1140_v18  ;;  %v1248_v31 = vmul.f32 %v3517_v63, %v1219_v5  ;;  %v1771_v51 = vld [vmem:[#allocation2 + $0xde] sm:$0xf]  ;;  %v2999_v5 = vld [vmem:[%s4378_s3 + $0x8] ss:$0 sm:$0xff] }
 0x1ca   : > { %v2034_v30 = vadd.f32 1.0, %v2932_v13  ;;  %v1744_v4 = vadd.f32 %v1719_v27, %v1640_v0  ;;  %v1880_v34 = vmul.f32 %v3970_v54, %v1851_v57  ;;  %v1559_v28 = vadd.f32 %v1534_v39, %v1480_v25 }
 0x1cb   : > { %v1986_v16 = vmul.f32 0.70710677, %v1936_v32  ;;  %v1273_v42 = vadd.f32 %v1248_v31, %v1169_v47  ;;  %v1352_v55 = vmul.f32 %v3538_v20, %v1323_v19  ;;  %v1456_v11 = vmul.f32 %v3565_v43, %v1427_v53 }
 0x1cc   : > { %v2059_v37 = vmul.f32 %v2034_v30, %v1959_v44  ;;  %v1823_v1 = vadd.f32 %v1798_v48, %v1744_v4  ;;  %v1641_v9 = vadd.f32 %v1616_v6, %v1559_v28  ;;  %v1799_v21 = vmul.f32 %v3576_v35, %v1770_v52 }
 0x1cd   : > { %2935 = verf.f32 %v1986_v16  ;;  %v1377_v63 = vadd.f32 %v1352_v55, %v1273_v42  ;;  %v1588_v60 = vmul.f32 %v1563_v8, %v1087_v58  ;;  %v1692_v29 = vmul.f32 %v1667_v26, %v4229_v41  ;;  %v4289_v8 = vld [vmem:[%s4383_s8] ss:$0 sm:$0xff] }
 0x1ce   : > { %2765 = vmatmul.mubr.f32.gmra.mrb[32].mxu1 %v2059_v37  ;;  %v1905_v2 = vadd.f32 %v1880_v34, %v1823_v1  ;;  %v1745_v45 = vadd.f32 %v4488_v62, %v1641_v9  ;;  %v1535_v43 = vmul.f32 %v3568_v17, %v1506_v22  ;;  %v1881_v3 = vmul.f32 %v3970_v54, %v4489_v15 }
 0x1cf   : > { %2767 = vmatprep.mubr.msk.f32.mxu1 %vm3009_vm0, %v4087_v14  ;;  %v1481_v20 = vadd.f32 %v1456_v11, %v1377_v63  ;;  %v1960_v41 = vmul.f32 0.5, %v4234_v10  ;;  %v1617_v12 = vmul.f32 %v3571_v56, %v1588_v60  ;;  %v1721_v50 = vmul.f32 %v3554_v38, %v1692_v29 }
 0x1d0   : > { %v2934_v44 = vpop.eup %2933  ;;  %v1937_v24 = vadd.f32 %v3978_v61, %v1905_v2  ;;  %v1824_v7 = vadd.f32 %v1799_v21, %v1745_v45  ;;  %v1853_v17 = vmul.f32 %v1828_v33, %v1087_v58  ;;  %v1800_v54 = vmul.f32 %v3576_v35, %v1771_v51  ;;  %v2998_v61 = vld [vmem:[%s4379_s4] ss:$0 sm:$0xff] }
 0x1d1   : > { %v2035_v36 = vadd.f32 1.0, %v2934_v44  ;;  %v1560_v57 = vadd.f32 %v1535_v43, %v1481_v20  ;;  %v1961_v35 = vmul.f32 0.5, %v1936_v32 }
 0x1d2   : > { %v1987_v49 = vmul.f32 0.70710677, %v1937_v24  ;;  %v1906_v40 = vadd.f32 %v1881_v3, %v1824_v7  ;;  %v1882_v58 = vmul.f32 %v2999_v5, %v1853_v17  ;;  %v1962_v53 = vmul.f32 0.5, %v1937_v24 }
 0x1d3   : > { %v2060_v27 = vmul.f32 %v2035_v36, %v1960_v41  ;;  %v1642_v46 = vadd.f32 %v1617_v12, %v1560_v57 }
 0x1d4   : > { %2937 = verf.f32 %v1987_v49  ;;  %v1938_v59 = vadd.f32 %v2998_v61, %v1906_v40 }
 0x1d5   : > { %2768 = vmatmul.mubr.f32.gmra.mrb[34].mxu1 %v2060_v27  ;;  %v1746_v10 = vadd.f32 %v1721_v50, %v1642_v46 }
 0x1d6   : > { %2770 = vmatprep.mubr.msk.f32.mxu1 %vm3009_vm0, %v4087_v14  ;;  %v1988_v56 = vmul.f32 0.70710677, %v1938_v59  ;;  %v1963_v47 = vmul.f32 0.5, %v1938_v59 }
 0x1d7   : > { %v2936_v38 = vpop.eup %2935  ;;  %v1825_v23 = vadd.f32 %v1800_v54, %v1746_v10 }
 0x1d8   : > { %v2036_v39 = vadd.f32 1.0, %v2936_v38  ;;  %2939 = verf.f32 %v1988_v56 }
 0x1d9   : > { %v1907_v6 = vadd.f32 %v1882_v58, %v1825_v23 }
 0x1da   : > { %v2061_v18 = vmul.f32 %v2036_v39, %v1961_v35 }
 0x1db   : > { %v1939_v0 = vadd.f32 %v2998_v61, %v1907_v6 }
 0x1dc   : > { %2771 = vmatmul.mubr.f32.gmra.mrb[36].mxu1 %v2061_v18 }
 0x1dd   : > { %2773 = vmatprep.mubr.msk.f32.mxu1 %vm3009_vm0, %v4087_v14  ;;  %v1989_v25 = vmul.f32 0.70710677, %v1939_v0  ;;  %v1964_v4 = vmul.f32 0.5, %v1939_v0 }
 0x1de   : > { %v2938_v19 = vpop.eup %2937 }
 0x1df   : > { %v2037_v13 = vadd.f32 1.0, %v2938_v19  ;;  %2941 = verf.f32 %v1989_v25 }
 0x1e1   : > { %v2062_v48 = vmul.f32 %v2037_v13, %v1962_v53 }
 0x1e2   : > { %v2940_v52 = vpop.eup %2939 }
 0x1e3   : > { %2774 = vmatmul.mubr.f32.gmra.mrb[38].mxu1 %v2062_v48  ;;  %v2038_v31 = vadd.f32 1.0, %v2940_v52 }
 0x1e4   : > { %2776 = vmatprep.mubr.msk.f32.mxu1 %vm3009_vm0, %v4087_v14 }
 0x1e5   : > { %v2063_v32 = vmul.f32 %v2038_v31, %v1963_v47 }
 0x1e7   : > { %2777 = vmatmul.mubr.f32.gmra.mrb[40].mxu1 %v2063_v32 }
 0x1e8   : > { %2779 = vmatprep.mubr.msk.f32.mxu1 %vm3009_vm0, %v4087_v14 }
 0x1e9   : > { %v2942_v30 = vpop.eup %2941 }
 0x1ea   : > { %v2039_v34 = vadd.f32 1.0, %v2942_v30 }
 0x1ec   : > { %v2064_v28 = vmul.f32 %v2039_v34, %v1964_v4 }
 0x1ee   : > { %2780 = vmatmul.mubr.f32.gmra.mrb[42].mxu1 %v2064_v28 }
 0x203   : > { %v2154_v26 = vpop.f32.mrb[50].mxu0 }
 0x204   : > { %v2155_v16 = vadd.f32 %v4289_v8, %v2154_v26  ;;  %v2709_v42 = vpop.f32.mrb[51].mxu0 }
 0x206   : > { %v2303_v55 = vmul.f32 0.70710677, %v2155_v16  ;;  %v2278_v37 = vmul.f32 0.5, %v2155_v16 }
 0x208   : > { %2943 = verf.f32 %v2303_v55 }
 0x212   : > { %v2944_v11 = vpop.eup %2943 }
 0x213   : > { %v2353_v14 = vadd.f32 1.0, %v2944_v11  ;;  %v2159_v1 = vpop.f32.mrb[52].mxu0 }
 0x214   : > { %v2160_v9 = vadd.f32 %v4289_v8, %v2159_v1  ;;  %v2712_v21 = vpop.f32.mrb[53].mxu0 }
 0x215   : > { %v2378_v22 = vmul.f32 %v2353_v14, %v2278_v37 }
 0x216   : > { %v2304_v63 = vmul.f32 0.70710677, %v2160_v9  ;;  %v2279_v15 = vmul.f32 0.5, %v2160_v9 }
 0x217   : > { %2403 = vst.msk [vmem:[%s4297_s11] sm:$0xff] %vm369_vm1, %v2378_v22  ;;  %v2164_v60 = vpop.f32.mrb[54].mxu0 }
 0x218   : > { %2945 = verf.f32 %v2304_v63  ;;  %v2165_v29 = vadd.f32 %v4289_v8, %v2164_v60  ;;  %v2715_v2 = vpop.f32.mrb[55].mxu0 }
 0x21a   : > { %v2305_v62 = vmul.f32 0.70710677, %v2165_v29  ;;  %v2280_v41 = vmul.f32 0.5, %v2165_v29 }
 0x21c   : > { %2947 = verf.f32 %v2305_v62 }
 0x221   : > { %v2169_v45 = vpop.f32.mrb[0].mxu1 }
 0x222   : > { %v2946_v20 = vpop.eup %2945  ;;  %v2170_v43 = vadd.f32 %v4289_v8, %v2169_v45  ;;  %v2718_v44 = vpop.f32.mrb[1].mxu1 }
 0x223   : > { %v2354_v3 = vadd.f32 1.0, %v2946_v20 }
 0x224   : > { %v2306_v33 = vmul.f32 0.70710677, %v2170_v43  ;;  %v2281_v17 = vmul.f32 0.5, %v2170_v43 }
 0x225   : > { %v2379_v24 = vmul.f32 %v2354_v3, %v2279_v15 }
 0x226   : > { %v2948_v7 = vpop.eup %2947  ;;  %2949 = verf.f32 %v2306_v33  ;;  %v2174_v51 = vpop.f32.mrb[2].mxu1 }
 0x227   : > { %2404 = vst.msk [vmem:[%s4297_s11 + $0x8] sm:$0xff] %vm369_vm1, %v2379_v24  ;;  %v2355_v36 = vadd.f32 1.0, %v2948_v7  ;;  %v2175_v57 = vadd.f32 %v4289_v8, %v2174_v51  ;;  %v2721_v12 = vpop.f32.mrb[3].mxu1 }
 0x229   : > { %v2380_v50 = vmul.f32 %v2355_v36, %v2280_v41  ;;  %v2307_v49 = vmul.f32 0.70710677, %v2175_v57  ;;  %v2282_v61 = vmul.f32 0.5, %v2175_v57 }
 0x22b   : > { %2405 = vst.msk [vmem:[%s4297_s11 + $0x10] sm:$0xff] %vm369_vm1, %v2380_v50  ;;  %2951 = verf.f32 %v2307_v49 }
 0x230   : > { %v2950_v40 = vpop.eup %2949 }
 0x231   : > { %v2356_v27 = vadd.f32 1.0, %v2950_v40 }
 0x233   : > { %v2381_v46 = vmul.f32 %v2356_v27, %v2281_v17 }
 0x235   : > { %v2952_v54 = vpop.eup %2951  ;;  %2406 = vst.msk [vmem:[%s4297_s11 + $0x18] sm:$0xff] %vm369_vm1, %v2381_v46 }
 0x236   : > { %v2357_v59 = vadd.f32 1.0, %v2952_v54 }
 0x238   : > { %v2382_v10 = vmul.f32 %v2357_v59, %v2282_v61 }
 0x239   : > { %v2179_v56 = vpop.f32.mrb[4].mxu1 }
 0x23a   : > { %2407 = vst.msk [vmem:[%s4297_s11 + $0x20] sm:$0xff] %vm369_vm1, %v2382_v10  ;;  %v2180_v38 = vadd.f32 %v4289_v8, %v2179_v56  ;;  %v2724_v5 = vpop.f32.mrb[5].mxu1 }
 0x23c   : > { %v2308_v58 = vmul.f32 0.70710677, %v2180_v38  ;;  %v2283_v25 = vmul.f32 0.5, %v2180_v38 }
 0x23e   : > { %2953 = verf.f32 %v2308_v58 }
 0x23f   : > { %v2184_v23 = vpop.f32.mrb[6].mxu1 }
 0x240   : > { %v2185_v35 = vadd.f32 %v4289_v8, %v2184_v23  ;;  %v2727_v39 = vpop.f32.mrb[7].mxu1 }
 0x242   : > { %v2309_v6 = vmul.f32 0.70710677, %v2185_v35  ;;  %v2284_v31 = vmul.f32 0.5, %v2185_v35 }
 0x244   : > { %2955 = verf.f32 %v2309_v6 }
 0x248   : > { %v2954_v18 = vpop.eup %2953  ;;  %v2189_v0 = vpop.f32.mrb[8].mxu1 }
 0x249   : > { %v2358_v19 = vadd.f32 1.0, %v2954_v18  ;;  %v2190_v53 = vadd.f32 %v4289_v8, %v2189_v0  ;;  %v2730_v13 = vpop.f32.mrb[9].mxu1 }
 0x24b   : > { %v2383_v48 = vmul.f32 %v2358_v19, %v2283_v25  ;;  %v2310_v52 = vmul.f32 0.70710677, %v2190_v53  ;;  %v2285_v42 = vmul.f32 0.5, %v2190_v53 }
 0x24d   : > { %2408 = vst.msk [vmem:[%s4297_s11 + $0x28] sm:$0xff] %vm369_vm1, %v2383_v48  ;;  %2957 = verf.f32 %v2310_v52 }
 0x24e   : > { %v2956_v47 = vpop.eup %2955 }
 0x24f   : > { %v2359_v32 = vadd.f32 1.0, %v2956_v47 }
 0x250   : > { %v2194_v30 = vpop.f32.mrb[10].mxu1 }
 0x251   : > { %v2384_v4 = vmul.f32 %v2359_v32, %v2284_v31  ;;  %v2195_v34 = vadd.f32 %v4289_v8, %v2194_v30  ;;  %v2733_v28 = vpop.f32.mrb[11].mxu1 }
 0x253   : > { %2409 = vst.msk [vmem:[%s4297_s11 + $0x30] sm:$0xff] %vm369_vm1, %v2384_v4  ;;  %v2311_v26 = vmul.f32 0.70710677, %v2195_v34  ;;  %v2286_v63 = vmul.f32 0.5, %v2195_v34 }
 0x255   : > { %2959 = verf.f32 %v2311_v26 }
 0x257   : > { %v2958_v16 = vpop.eup %2957 }
 0x258   : > { %v2360_v55 = vadd.f32 1.0, %v2958_v16 }
 0x259   : > { %v2199_v11 = vpop.f32.mrb[12].mxu1 }
 0x25a   : > { %v2385_v37 = vmul.f32 %v2360_v55, %v2285_v42  ;;  %v2200_v14 = vadd.f32 %v4289_v8, %v2199_v11  ;;  %v2736_v1 = vpop.f32.mrb[13].mxu1 }
 0x25c   : > { %2410 = vst.msk [vmem:[%s4297_s11 + $0x38] sm:$0xff] %vm369_vm1, %v2385_v37  ;;  %v2312_v9 = vmul.f32 0.70710677, %v2200_v14  ;;  %v2287_v3 = vmul.f32 0.5, %v2200_v14 }
 0x25e   : > { %2961 = verf.f32 %v2312_v9 }
 0x25f   : > { %v2960_v21 = vpop.eup %2959  ;;  %v2204_v22 = vpop.f32.mrb[14].mxu1 }
 0x260   : > { %v2361_v60 = vadd.f32 1.0, %v2960_v21  ;;  %v2205_v29 = vadd.f32 %v4289_v8, %v2204_v22  ;;  %v2739_v2 = vpop.f32.mrb[15].mxu1 }
 0x262   : > { %v2386_v62 = vmul.f32 %v2361_v60, %v2286_v63  ;;  %v2313_v45 = vmul.f32 0.70710677, %v2205_v29  ;;  %v2288_v36 = vmul.f32 0.5, %v2205_v29 }
 0x264   : > { %2411 = vst.msk [vmem:[%s4297_s11 + $0x40] sm:$0xff] %vm369_vm1, %v2386_v62  ;;  %2963 = verf.f32 %v2313_v45 }
 0x266   : > { %v2209_v20 = vpop.f32.mrb[16].mxu1 }
 0x267   : > { %v2210_v43 = vadd.f32 %v4289_v8, %v2209_v20  ;;  %v2742_v44 = vpop.f32.mrb[17].mxu1 }
 0x268   : > { %v2962_v15 = vpop.eup %2961 }
 0x269   : > { %v2362_v33 = vadd.f32 1.0, %v2962_v15  ;;  %v2314_v24 = vmul.f32 0.70710677, %v2210_v43  ;;  %v2289_v46 = vmul.f32 0.5, %v2210_v43 }
 0x26b   : > { %v2387_v7 = vmul.f32 %v2362_v33, %v2287_v3  ;;  %2965 = verf.f32 %v2314_v24 }
 0x26d   : > { %2412 = vst.msk [vmem:[%s4297_s11 + $0x48] sm:$0xff] %vm369_vm1, %v2387_v7 }
 0x26e   : > { %v2964_v51 = vpop.eup %2963  ;;  %v2214_v41 = vpop.f32.mrb[18].mxu1 }
 0x26f   : > { %v2363_v57 = vadd.f32 1.0, %v2964_v51  ;;  %v2215_v12 = vadd.f32 %v4289_v8, %v2214_v41  ;;  %v2745_v50 = vpop.f32.mrb[19].mxu1 }
 0x271   : > { %v2388_v49 = vmul.f32 %v2363_v57, %v2288_v36  ;;  %v2315_v40 = vmul.f32 0.70710677, %v2215_v12  ;;  %v2290_v58 = vmul.f32 0.5, %v2215_v12 }
 0x273   : > { %2413 = vst.msk [vmem:[%s4297_s11 + $0x50] sm:$0xff] %vm369_vm1, %v2388_v49  ;;  %2967 = verf.f32 %v2315_v40 }
 0x275   : > { %v2966_v17 = vpop.eup %2965  ;;  %v2219_v27 = vpop.f32.mrb[20].mxu1 }
 0x276   : > { %v2364_v54 = vadd.f32 1.0, %v2966_v17  ;;  %v2220_v61 = vadd.f32 %v4289_v8, %v2219_v27  ;;  %v2748_v59 = vpop.f32.mrb[21].mxu1 }
 0x278   : > { %v2389_v10 = vmul.f32 %v2364_v54, %v2289_v46  ;;  %v2316_v56 = vmul.f32 0.70710677, %v2220_v61  ;;  %v2291_v19 = vmul.f32 0.5, %v2220_v61 }
 0x27a   : > { %2414 = vst.msk [vmem:[%s4297_s11 + $0x58] sm:$0xff] %vm369_vm1, %v2389_v10  ;;  %2969 = verf.f32 %v2316_v56 }
 0x27d   : > { %v2968_v38 = vpop.eup %2967  ;;  %v2224_v5 = vpop.f32.mrb[22].mxu1 }
 0x27e   : > { %v2365_v23 = vadd.f32 1.0, %v2968_v38  ;;  %v2225_v35 = vadd.f32 %v4289_v8, %v2224_v5  ;;  %v2751_v39 = vpop.f32.mrb[23].mxu1 }
 0x280   : > { %v2390_v6 = vmul.f32 %v2365_v23, %v2290_v58  ;;  %v2317_v18 = vmul.f32 0.70710677, %v2225_v35  ;;  %v2292_v34 = vmul.f32 0.5, %v2225_v35 }
 0x282   : > { %2415 = vst.msk [vmem:[%s4297_s11 + $0x60] sm:$0xff] %vm369_vm1, %v2390_v6  ;;  %2971 = verf.f32 %v2317_v18 }
 0x284   : > { %v2970_v0 = vpop.eup %2969  ;;  %v2229_v25 = vpop.f32.mrb[24].mxu1 }
 0x285   : > { %v2366_v53 = vadd.f32 1.0, %v2970_v0  ;;  %v2230_v13 = vadd.f32 %v4289_v8, %v2229_v25  ;;  %v2754_v48 = vpop.f32.mrb[25].mxu1 }
 0x287   : > { %v2391_v52 = vmul.f32 %v2366_v53, %v2291_v19  ;;  %v2318_v47 = vmul.f32 0.70710677, %v2230_v13  ;;  %v2293_v14 = vmul.f32 0.5, %v2230_v13 }
 0x289   : > { %2416 = vst.msk [vmem:[%s4297_s11 + $0x68] sm:$0xff] %vm369_vm1, %v2391_v52  ;;  %2973 = verf.f32 %v2318_v47 }
 0x28b   : > { %v2234_v31 = vpop.f32.mrb[26].mxu1 }
 0x28c   : > { %v2972_v32 = vpop.eup %2971  ;;  %v2235_v30 = vadd.f32 %v4289_v8, %v2234_v31  ;;  %v2757_v4 = vpop.f32.mrb[27].mxu1 }
 0x28d   : > { %v2367_v28 = vadd.f32 1.0, %v2972_v32 }
 0x28e   : > { %v2319_v26 = vmul.f32 0.70710677, %v2235_v30  ;;  %v2294_v60 = vmul.f32 0.5, %v2235_v30 }
 0x28f   : > { %v2392_v16 = vmul.f32 %v2367_v28, %v2292_v34 }
 0x290   : > { %2975 = verf.f32 %v2319_v26 }
 0x291   : > { %2417 = vst.msk [vmem:[%s4297_s11 + $0x70] sm:$0xff] %vm369_vm1, %v2392_v16 }
 0x292   : > { %v2239_v42 = vpop.f32.mrb[28].mxu1 }
 0x293   : > { %v2974_v55 = vpop.eup %2973  ;;  %v2240_v11 = vadd.f32 %v4289_v8, %v2239_v42  ;;  %v2760_v37 = vpop.f32.mrb[29].mxu1 }
 0x294   : > { %v2368_v1 = vadd.f32 1.0, %v2974_v55 }
 0x295   : > { %v2320_v9 = vmul.f32 0.70710677, %v2240_v11  ;;  %v2295_v15 = vmul.f32 0.5, %v2240_v11 }
 0x296   : > { %v2393_v21 = vmul.f32 %v2368_v1, %v2293_v14 }
 0x297   : > { %2977 = verf.f32 %v2320_v9 }
 0x298   : > { %2418 = vst.msk [vmem:[%s4297_s11 + $0x78] sm:$0xff] %vm369_vm1, %v2393_v21 }
 0x29a   : > { %v2976_v22 = vpop.eup %2975  ;;  %v2244_v63 = vpop.f32.mrb[30].mxu1 }
 0x29b   : > { %v2369_v29 = vadd.f32 1.0, %v2976_v22  ;;  %v2245_v2 = vadd.f32 %v4289_v8, %v2244_v63  ;;  %v2763_v62 = vpop.f32.mrb[31].mxu1 }
 0x29d   : > { %v2394_v45 = vmul.f32 %v2369_v29, %v2294_v60  ;;  %v2321_v20 = vmul.f32 0.70710677, %v2245_v2  ;;  %v2296_v50 = vmul.f32 0.5, %v2245_v2 }
 0x29f   : > { %2419 = vst.msk [vmem:[%s4297_s11 + $0x80] sm:$0xff] %vm369_vm1, %v2394_v45  ;;  %2979 = verf.f32 %v2321_v20 }
 0x2a1   : > { %v2978_v43 = vpop.eup %2977  ;;  %v2249_v44 = vpop.f32.mrb[32].mxu1 }
 0x2a2   : > { %v2370_v3 = vadd.f32 1.0, %v2978_v43  ;;  %v2250_v33 = vadd.f32 %v4289_v8, %v2249_v44  ;;  %v2766_v24 = vpop.f32.mrb[33].mxu1 }
 0x2a4   : > { %v2395_v7 = vmul.f32 %v2370_v3, %v2295_v15  ;;  %v2322_v51 = vmul.f32 0.70710677, %v2250_v33  ;;  %v2297_v59 = vmul.f32 0.5, %v2250_v33 }
 0x2a6   : > { %2420 = vst.msk [vmem:[%s4297_s11 + $0x88] sm:$0xff] %vm369_vm1, %v2395_v7  ;;  %2981 = verf.f32 %v2322_v51 }
 0x2a8   : > { %v2254_v41 = vpop.f32.mrb[34].mxu1 }
 0x2a9   : > { %v2980_v36 = vpop.eup %2979  ;;  %v2255_v57 = vadd.f32 %v4289_v8, %v2254_v41  ;;  %v2769_v12 = vpop.f32.mrb[35].mxu1 }
 0x2aa   : > { %v2371_v49 = vadd.f32 1.0, %v2980_v36 }
 0x2ab   : > { %v2323_v40 = vmul.f32 0.70710677, %v2255_v57  ;;  %v2298_v39 = vmul.f32 0.5, %v2255_v57 }
 0x2ac   : > { %v2396_v17 = vmul.f32 %v2371_v49, %v2296_v50 }
 0x2ad   : > { %2983 = verf.f32 %v2323_v40 }
 0x2ae   : > { %2421 = vst.msk [vmem:[%s4297_s11 + $0x90] sm:$0xff] %vm369_vm1, %v2396_v17 }
 0x2af   : > { %v2259_v27 = vpop.f32.mrb[36].mxu1 }
 0x2b0   : > { %v2982_v46 = vpop.eup %2981  ;;  %v2260_v54 = vadd.f32 %v4289_v8, %v2259_v27  ;;  %v2772_v61 = vpop.f32.mrb[37].mxu1 }
 0x2b1   : > { %v2372_v10 = vadd.f32 1.0, %v2982_v46 }
 0x2b2   : > { %v2324_v56 = vmul.f32 0.70710677, %v2260_v54  ;;  %v2299_v52 = vmul.f32 0.5, %v2260_v54 }
 0x2b3   : > { %v2397_v38 = vmul.f32 %v2372_v10, %v2297_v59 }
 0x2b4   : > { %2985 = verf.f32 %v2324_v56 }
 0x2b5   : > { %2422 = vst.msk [vmem:[%s4297_s11 + $0x98] sm:$0xff] %vm369_vm1, %v2397_v38 }
 0x2b6   : > { %v2264_v5 = vpop.f32.mrb[38].mxu1 }
 0x2b7   : > { %v2984_v58 = vpop.eup %2983  ;;  %v2265_v23 = vadd.f32 %v4289_v8, %v2264_v5  ;;  %v2775_v35 = vpop.f32.mrb[39].mxu1 }
 0x2b8   : > { %v2373_v6 = vadd.f32 1.0, %v2984_v58 }
 0x2b9   : > { %v2325_v18 = vmul.f32 0.70710677, %v2265_v23  ;;  %v2300_v26 = vmul.f32 0.5, %v2265_v23 }
 0x2ba   : > { %v2398_v0 = vmul.f32 %v2373_v6, %v2298_v39  ;;  %v2269_v25 = vpop.f32.mrb[40].mxu1 }
 0x2bb   : > { %2987 = verf.f32 %v2325_v18  ;;  %v2270_v19 = vadd.f32 %v4289_v8, %v2269_v25  ;;  %v2778_v53 = vpop.f32.mrb[41].mxu1 }
 0x2bc   : > { %2423 = vst.msk [vmem:[%s4297_s11 + $0xa0] sm:$0xff] %vm369_vm1, %v2398_v0 }
 0x2bd   : > { %v2326_v13 = vmul.f32 0.70710677, %v2270_v19  ;;  %v2301_v11 = vmul.f32 0.5, %v2270_v19 }
 0x2be   : > { %v2986_v48 = vpop.eup %2985 }
 0x2bf   : > { %v2374_v47 = vadd.f32 1.0, %v2986_v48  ;;  %2989 = verf.f32 %v2326_v13 }
 0x2c1   : > { %v2399_v31 = vmul.f32 %v2374_v47, %v2299_v52  ;;  %v2274_v32 = vpop.f32.mrb[42].mxu1 }
 0x2c2   : > { %v2275_v30 = vadd.f32 %v4289_v8, %v2274_v32  ;;  %v2781_v4 = vpop.f32.mrb[43].mxu1 }
 0x2c3   : > { %2424 = vst.msk [vmem:[%s4297_s11 + $0xa8] sm:$0xff] %vm369_vm1, %v2399_v31 }
 0x2c4   : > { %v2327_v34 = vmul.f32 0.70710677, %v2275_v30  ;;  %v2302_v8 = vmul.f32 0.5, %v2275_v30 }
 0x2c5   : > { %v2988_v28 = vpop.eup %2987 }
 0x2c6   : > { %v2375_v16 = vadd.f32 1.0, %v2988_v28  ;;  %2991 = verf.f32 %v2327_v34 }
 0x2c8   : > { %v2400_v42 = vmul.f32 %v2375_v16, %v2300_v26 }
 0x2c9   : > { %v2990_v55 = vpop.eup %2989 }
 0x2ca   : > { %2425 = vst.msk [vmem:[%s4297_s11 + $0xb0] sm:$0xff] %vm369_vm1, %v2400_v42  ;;  %v2376_v37 = vadd.f32 1.0, %v2990_v55 }
 0x2cc   : > { %v2401_v14 = vmul.f32 %v2376_v37, %v2301_v11 }
 0x2ce   : > { %2426 = vst.msk [vmem:[%s4297_s11 + $0xb8] sm:$0xff] %vm369_vm1, %v2401_v14 }
 0x2d0   : > { %v2992_v1 = vpop.eup %2991 }
 0x2d1   : > { %v2377_v9 = vadd.f32 1.0, %v2992_v1 }
 0x2d3   : > { %v2402_v21 = vmul.f32 %v2377_v9, %v2302_v8 }
 0x2d5   : > { %2428 = vst.msk [vmem:[%s4297_s11 + $0xc0] sm:$0xf] %vm2427_vm2, %v2402_v21 }
 0x2d6 PF: > { %s19_s30 = sadd.s32 1, %s3006_s30  }
 0x2d7   : > { %p16_p4 = scmp.ge.s32.totalorder %s19_s30, 4  }
 0x2d9   :  { %18 = sbr.rel (!%p16_p4) target bundleno = 1 (0x1), region = 86 }

</bundles_post_ra>
